<compile_context>
chip_gen: v7x
topology: tpu7x:2x2x1
jax: 0.10.0
libtpu: 0.0.40
codegen_flags: <defaults>
</compile_context>

<pallas_src>
import functools

import jax
import jax.numpy as jnp
from jax.experimental import pallas as pl
from jax.experimental.pallas import tpu as pltpu

C_FEAT = 512  # fixed by x.view(-1, 512) in the PyTorch module

# TODO(synk): base_network is an injected dependency in SSLNET.__init__; it is
# treated as identity here (the kernel implements the SSLNET-specific compute:
# global avg pool + optional fc6).


def _pool_fc_kernel(x_ref, w_ref, b_ref, o_ref, acc_ref, *, s_total, ts):
    """Grid = (batch tiles, S tiles).  Sum over S into acc, FC on last S step."""
    si = pl.program_id(1)

    @pl.when(si == 0)
    def _():
        acc_ref[...] = jnp.zeros_like(acc_ref)

    x = x_ref[...].astype(jnp.float32)                    # (TB, C, TS)
    if s_total % ts != 0:                                  # mask ragged last S tile
        lane = jax.lax.broadcasted_iota(jnp.int32, x.shape, 2)
        x = jnp.where((lane + si * ts) < s_total, x, 0.0)
    acc_ref[...] += jnp.sum(x, axis=-1)                    # (TB, C)  lane-dense

    @pl.when(si == pl.num_programs(1) - 1)
    def _():
        pooled = acc_ref[...] * (1.0 / s_total)            # (TB, C)
        out = jnp.dot(pooled, w_ref[...].astype(jnp.float32),
                      preferred_element_type=jnp.float32)  # (TB, Kp)
        out = out + b_ref[...].astype(jnp.float32)
        o_ref[...] = out.astype(o_ref.dtype)


def _pool_only_kernel(x_ref, o_ref, acc_ref, *, s_total, ts):
    """Grid = (batch tiles, S tiles).  Global average pool only."""
    si = pl.program_id(1)

    @pl.when(si == 0)
    def _():
        acc_ref[...] = jnp.zeros_like(acc_ref)

    x = x_ref[...].astype(jnp.float32)                     # (TB, C, TS)
    if s_total % ts != 0:
        lane = jax.lax.broadcasted_iota(jnp.int32, x.shape, 2)
        x = jnp.where((lane + si * ts) < s_total, x, 0.0)
    acc_ref[...] += jnp.sum(x, axis=-1)                    # (TB, C)

    @pl.when(si == pl.num_programs(1) - 1)
    def _():
        o_ref[...] = (acc_ref[...] * (1.0 / s_total)).astype(o_ref.dtype)


def _choose_tiles(n, s):
    """Pick (TB, TS) so 2 * TB * C * TS * 4B stays well under scoped VMEM."""
    bytes_per_col = C_FEAT * 4                 # one spatial column, f32
    budget = 16 * 1024 * 1024                  # double-buffered feature budget
    ts = s if s <= 512 else 512                # lane-aligned S tile when tiling
    max_tb = max(1, budget // (2 * ts * bytes_per_col))
    tb = min(32, max_tb, n)
    if tb < n:
        tb = max(8, (tb // 8) * 8)             # keep output sublane tiling legal
    n_b = -(-n // tb)
    n_s = -(-s // ts)
    return tb, ts, n_b, n_s


def sslnet_forward(x_ncdhw, fc_w=None, fc_b=None, *, with_classifier=True):
    """x_ncdhw: (N, 512, D, H, W) float32 (output of base_network)."""
    n, c, d, h, w = x_ncdhw.shape
    assert c == C_FEAT, f"expected {C_FEAT} channels, got {c}"
    s = d * h * w

    # Free reshape (no HBM data movement): (N, C, D, H, W) -> (N, C, S).
    x_ncs = x_ncdhw.reshape(n, c, s)

    tb, ts, n_b, n_s = _choose_tiles(n, s)
    compiler_params = pltpu.CompilerParams(
        dimension_semantics=("parallel", "arbitrary"),
        vmem_limit_bytes=32 * 1024 * 1024,
    )

    if with_classifier:
        k = fc_w.shape[1]
        kp = max(128, -(-k // 128) * 128)               # lane-dense padded K
        w_pad = jnp.pad(fc_w.astype(jnp.float32), ((0, 0), (0, kp - k)))
        b_pad = jnp.pad(fc_b.astype(jnp.float32), (0, kp - k)).reshape(1, kp)

        cost = pl.CostEstimate(
            flops=n * s * c + 2 * n * c * kp,
            transcendentals=0,
            bytes_accessed=n * s * c * 4 + c * kp * 4 + n * kp * 4,
        )
        out = pl.pallas_call(
            functools.partial(_pool_fc_kernel, s_total=s, ts=ts),
            out_shape=jax.ShapeDtypeStruct((n, kp), x_ncdhw.dtype),
            grid_spec=pltpu.PrefetchScalarGridSpec(
                num_scalar_prefetch=0,
                grid=(n_b, n_s),
                in_specs=[
                    pl.BlockSpec((tb, c, ts), lambda b, si: (b, 0, si)),  # features
                    pl.BlockSpec((c, kp), lambda b, si: (0, 0)),          # fc6 weight
                    pl.BlockSpec((1, kp), lambda b, si: (0, 0)),          # fc6 bias
                ],
                out_specs=pl.BlockSpec((tb, kp), lambda b, si: (b, 0)),
                scratch_shapes=[pltpu.VMEM((tb, c), jnp.float32)],
            ),
            compiler_params=compiler_params,
            cost_estimate=cost,
        )(x_ncs, w_pad, b_pad)
        return out[:, :k]
    else:
        cost = pl.CostEstimate(
            flops=n * s * c,
            transcendentals=0,
            bytes_accessed=n * s * c * 4 + n * c * 4,
        )
        return pl.pallas_call(
            functools.partial(_pool_only_kernel, s_total=s, ts=ts),
            out_shape=jax.ShapeDtypeStruct((n, c), x_ncdhw.dtype),
            grid_spec=pltpu.PrefetchScalarGridSpec(
                num_scalar_prefetch=0,
                grid=(n_b, n_s),
                in_specs=[
                    pl.BlockSpec((tb, c, ts), lambda b, si: (b, 0, si)),
                ],
                out_specs=pl.BlockSpec((tb, c), lambda b, si: (b, 0)),
                scratch_shapes=[pltpu.VMEM((tb, c), jnp.float32)],
            ),
            compiler_params=compiler_params,
            cost_estimate=cost,
        )(x_ncs)


def _reference(x_ncdhw, fc_w, fc_b, with_classifier):
    pooled = jnp.mean(x_ncdhw, axis=(2, 3, 4))            # (N, 512)
    if with_classifier:
        return pooled @ fc_w + fc_b
    return pooled


if __name__ == "__main__":
    key = jax.random.PRNGKey(0)
    k_x, k_w, k_b = jax.random.split(key, 3)

    # Small shapes: batch=2, channels=512 (required by view(-1, 512)),
    # spatial (D, H, W) = (2, 4, 4), num_classes=8.
    N, D, H, W = 2, 2, 4, 4
    NUM_CLASSES = 8

    x = jax.random.normal(k_x, (N, C_FEAT, D, H, W), dtype=jnp.float32)

    # Deterministic fc6 params (PyTorch Linear(512, 8) shapes, uniform init).
    bound = 1.0 / (C_FEAT ** 0.5)
    fc_w = jax.random.uniform(k_w, (C_FEAT, NUM_CLASSES), jnp.float32,
                              minval=-bound, maxval=bound)
    fc_b = jax.random.uniform(k_b, (NUM_CLASSES,), jnp.float32,
                              minval=-bound, maxval=bound)

    out = sslnet_forward(x, fc_w, fc_b, with_classifier=True)
    out = jax.block_until_ready(out)

    ref = _reference(x, fc_w, fc_b, with_classifier=True)
    assert out.shape == (N, NUM_CLASSES), out.shape
    assert jnp.allclose(out, ref, atol=1e-4, rtol=1e-4), "mismatch vs reference"

    # Also exercise the with_classifier=False path (pool only -> (N, 512)).
    out_pool = jax.block_until_ready(sslnet_forward(x, with_classifier=False))
    ref_pool = _reference(x, fc_w, fc_b, with_classifier=False)
    assert out_pool.shape == (N, C_FEAT)
    assert jnp.allclose(out_pool, ref_pool, atol=1e-4, rtol=1e-4)

    print("KERNEL_OK")
</pallas_src>

<mosaic_0001>
module attributes {stable_mosaic.version = 11 : i64} {
  func.func @_pool_fc_kernel(%arg0: i32, %arg1: i32, %arg2: memref<2x512x32xf32, #tpu.memory_space<vmem>>, %arg3: memref<512x128xf32, #tpu.memory_space<vmem>>, %arg4: memref<1x128xf32, #tpu.memory_space<vmem>>, %arg5: memref<2x128xf32, #tpu.memory_space<vmem>>, %arg6: memref<2x512xf32, #tpu.memory_space<vmem>>) attributes {dimension_semantics = [#tpu.dimension_semantics<parallel>, #tpu.dimension_semantics<arbitrary>], iteration_bounds = array<i64: 1, 1>, scalar_prefetch = 0 : i64, scratch_operands = 1 : i64, tpu.core_type = #tpu.core_type<tc>, window_params = [{transform_indices = @transform_0, window_bounds = array<i64: 2, 512, 32>}, {pipeline_mode = #tpu.pipeline_mode<synchronous>, transform_indices = @transform_1, window_bounds = array<i64: 512, 128>}, {pipeline_mode = #tpu.pipeline_mode<synchronous>, transform_indices = @transform_2, window_bounds = array<i64: 1, 128>}, {transform_indices = @transform_3, window_bounds = array<i64: 2, 128>}]} {
    %c0_i32 = arith.constant 0 : i32
    %0 = arith.cmpi eq, %arg1, %c0_i32 : i32
    %1 = arith.extui %0 : i1 to i32
    %c0_i32_0 = arith.constant 0 : i32
    %2 = arith.cmpi ne, %1, %c0_i32_0 : i32
    scf.if %2 {
      %cst_9 = arith.constant 0.000000e+00 : f32
      %11 = vector.broadcast %cst_9 : f32 to vector<2x512xf32>
      %c0_10 = arith.constant 0 : index
      %c0_11 = arith.constant 0 : index
      %12 = vector.load %arg6[%c0_10, %c0_11] : memref<2x512xf32, #tpu.memory_space<vmem>>, vector<2x512xf32>
      tpu.vector_store %arg6[%c0_10, %c0_11], %11 {strides = array<i32>} : memref<2x512xf32, #tpu.memory_space<vmem>>, vector<2x512xf32>,
    } else {
    }
    %c0 = arith.constant 0 : index
    %c0_1 = arith.constant 0 : index
    %c0_2 = arith.constant 0 : index
    %3 = vector.load %arg2[%c0, %c0_1, %c0_2] : memref<2x512x32xf32, #tpu.memory_space<vmem>>, vector<2x512x32xf32>
    %c0_3 = arith.constant 0 : index
    %c0_4 = arith.constant 0 : index
    %4 = vector.load %arg6[%c0_3, %c0_4] : memref<2x512xf32, #tpu.memory_space<vmem>>, vector<2x512xf32>
    %cst = arith.constant dense<0.000000e+00> : vector<2x512xf32>
    %5 = vector.multi_reduction <add>, %3, %cst [2] : vector<2x512x32xf32> to vector<2x512xf32>
    %6 = arith.addf %4, %5 : vector<2x512xf32>
    %c0_5 = arith.constant 0 : index
    %c0_6 = arith.constant 0 : index
    %7 = vector.load %arg6[%c0_5, %c0_6] : memref<2x512xf32, #tpu.memory_space<vmem>>, vector<2x512xf32>
    tpu.vector_store %arg6[%c0_5, %c0_6], %6 {strides = array<i32>} : memref<2x512xf32, #tpu.memory_space<vmem>>, vector<2x512xf32>,
    %c0_i32_7 = arith.constant 0 : i32
    %8 = arith.cmpi eq, %arg1, %c0_i32_7 : i32
    %9 = arith.extui %8 : i1 to i32
    %c0_i32_8 = arith.constant 0 : i32
    %10 = arith.cmpi ne, %9, %c0_i32_8 : i32
    scf.if %10 {
      %c0_9 = arith.constant 0 : index
      %c0_10 = arith.constant 0 : index
      %11 = vector.load %arg6[%c0_9, %c0_10] : memref<2x512xf32, #tpu.memory_space<vmem>>, vector<2x512xf32>
      %cst_11 = arith.constant 3.125000e-02 : f32
      %12 = vector.broadcast %cst_11 : f32 to vector<2x512xf32>
      %13 = arith.mulf %11, %12 : vector<2x512xf32>
      %c0_12 = arith.constant 0 : index
      %c0_13 = arith.constant 0 : index
      %14 = vector.load %arg3[%c0_12, %c0_13] : memref<512x128xf32, #tpu.memory_space<vmem>>, vector<512x128xf32>
      %cst_14 = arith.constant dense<0.000000e+00> : vector<2x128xf32>
      %15 = tpu.matmul %13, %14, %cst_14 {dimension_numbers = #tpu.dot_dimension_numbers<[1], [0], [0], [1], [0, 0, 1, 1], [], []>} : vector<2x512xf32>, vector<512x128xf32>, vector<2x128xf32> -> vector<2x128xf32>
      %c0_15 = arith.constant 0 : index
      %c0_16 = arith.constant 0 : index
      %16 = vector.load %arg4[%c0_15, %c0_16] : memref<1x128xf32, #tpu.memory_space<vmem>>, vector<1x128xf32>
      %17 = vector.broadcast %16 : vector<1x128xf32> to vector<2x128xf32>
      %18 = arith.addf %15, %17 : vector<2x128xf32>
      %c0_17 = arith.constant 0 : index
      %c0_18 = arith.constant 0 : index
      %19 = vector.load %arg5[%c0_17, %c0_18] : memref<2x128xf32, #tpu.memory_space<vmem>>, vector<2x128xf32>
      tpu.vector_store %arg5[%c0_17, %c0_18], %18 {strides = array<i32>} : memref<2x128xf32, #tpu.memory_space<vmem>>, vector<2x128xf32>,
    } else {
    }
    return
  }
  func.func @transform_0(%arg0: i32, %arg1: i32) -> (i32, i32, i32) {
    %c0_i32 = arith.constant 0 : i32
    %c0_i32_0 = arith.constant 0 : i32
    return %arg0, %c0_i32, %arg1 : i32, i32, i32
  }
  func.func @transform_1(%arg0: i32, %arg1: i32) -> (i32, i32) {
    %c0_i32 = arith.constant 0 : i32
    %c0_i32_0 = arith.constant 0 : i32
    %c0_i32_1 = arith.constant 0 : i32
    return %c0_i32, %c0_i32_0 : i32, i32
  }
  func.func @transform_2(%arg0: i32, %arg1: i32) -> (i32, i32) {
    %c0_i32 = arith.constant 0 : i32
    %c0_i32_0 = arith.constant 0 : i32
    %c0_i32_1 = arith.constant 0 : i32
    return %c0_i32, %c0_i32_0 : i32, i32
  }
  func.func @transform_3(%arg0: i32, %arg1: i32) -> (i32, i32) {
    %c0_i32 = arith.constant 0 : i32
    %c0_i32_0 = arith.constant 0 : i32
    return %arg0, %c0_i32 : i32, i32
  }
}

</mosaic_0001>

<bundles_post_ra>
// kernel: tpu_custom_call.1
= control target key start
LH: loop header
LB: loop body
LE: loop exit
PB: predicated region body
PF: predicated region fallthrough
CT: control target
= control target key end

     0   :  { %vm149_vm0 = vcmask 261120   ;;  %s11616_s0 = inlined_call_operand.vmem [shape: f32[2,512,32], index: 0, kind: input, shape index: {}]   ;;  %s11617_s1 = inlined_call_operand.vmem [shape: f32[512,128], index: 1, kind: input, shape index: {}]   ;;  %s11618_s2 = inlined_call_operand.vmem [shape: f32[1,128], index: 2, kind: input, shape index: {}]   ;;  %s11619_s3 = inlined_call_operand.hbm [shape: f32[2,128], index: 3, kind: output, shape index: {}]  }
   0x1   :  { %v22_v0 = vld [vmem:[%s11616_s0 + $0x10] sm:$0xff]  ;;  %v20_v1 = vld [vmem:[%s11616_s0] sm:$0xff]  ;;  %v23_v2 = vld [vmem:[%s11616_s0 + $0x18] sm:$0xff] }
   0x2   :  { %v156_v3 = vsel %vm149_vm0, %v22_v0, 0.0  ;;  %v150_v4 = vsel %vm149_vm0, %v20_v1, 0.0  ;;  %v21_v5 = vld [vmem:[%s11616_s0 + $0x8] sm:$0xff]  ;;  %v159_v6 = vsel %vm149_vm0, %v23_v2, 0.0  ;;  %v24_v9 = vld [vmem:[%s11616_s0 + $0x20] sm:$0xff]  ;;  %v27_v12 = vld [vmem:[%s11616_s0 + $0x38] sm:$0xff] }
   0x3   :  { %157 = vadd.xlane.f32.xlu1 %v156_v3  ;;  %151 = vadd.xlane.f32.xlu0 %v150_v4  ;;  %v153_v7 = vsel %vm149_vm0, %v21_v5, 0.0  ;;  %v25_v8 = vld [vmem:[%s11616_s0 + $0x28] sm:$0xff]  ;;  %v162_v11 = vsel %vm149_vm0, %v24_v9, 0.0  ;;  %v26_v13 = vld [vmem:[%s11616_s0 + $0x30] sm:$0xff]  ;;  %v171_v14 = vsel %vm149_vm0, %v27_v12, 0.0  ;;  %v28_v17 = vld [vmem:[%s11616_s0 + $0x40] sm:$0xff] }
   0x4   :  { %v165_v10 = vsel %vm149_vm0, %v25_v8, 0.0  ;;  %v168_v15 = vsel %vm149_vm0, %v26_v13, 0.0  ;;  %v29_v16 = vld [vmem:[%s11616_s0 + $0x48] sm:$0xff]  ;;  %v174_v19 = vsel %vm149_vm0, %v28_v17, 0.0  ;;  %v31_v20 = vld [vmem:[%s11616_s0 + $0x58] sm:$0xff]  ;;  %v30_v21 = vld [vmem:[%s11616_s0 + $0x50] sm:$0xff] }
   0x5   :  { %v177_v18 = vsel %vm149_vm0, %v29_v16, 0.0  ;;  %v183_v22 = vsel %vm149_vm0, %v31_v20, 0.0  ;;  %v180_v23 = vsel %vm149_vm0, %v30_v21, 0.0  ;;  %v33_v24 = vld [vmem:[%s11616_s0 + $0x68] sm:$0xff]  ;;  %v32_v25 = vld [vmem:[%s11616_s0 + $0x60] sm:$0xff]  ;;  %v35_v28 = vld [vmem:[%s11616_s0 + $0x78] sm:$0xff] }
   0x6   :  { %v189_v26 = vsel %vm149_vm0, %v33_v24, 0.0  ;;  %v186_v27 = vsel %vm149_vm0, %v32_v25, 0.0  ;;  %v34_v29 = vld [vmem:[%s11616_s0 + $0x70] sm:$0xff]  ;;  %v195_v30 = vsel %vm149_vm0, %v35_v28, 0.0 }
   0x7   :  { %160 = vadd.xlane.f32.xlu1 %v159_v6  ;;  %154 = vadd.xlane.f32.xlu0 %v153_v7  ;;  %v192_v31 = vsel %vm149_vm0, %v34_v29, 0.0 }
   0xb   :  { %166 = vadd.xlane.f32.xlu1 %v165_v10  ;;  %163 = vadd.xlane.f32.xlu0 %v162_v11 }
   0xf   :  { %172 = vadd.xlane.f32.xlu1 %v171_v14  ;;  %169 = vadd.xlane.f32.xlu0 %v168_v15 }
  0x13   :  { %178 = vadd.xlane.f32.xlu1 %v177_v18  ;;  %175 = vadd.xlane.f32.xlu0 %v174_v19 }
  0x17   :  { %184 = vadd.xlane.f32.xlu1 %v183_v22  ;;  %181 = vadd.xlane.f32.xlu0 %v180_v23 }
  0x1b   :  { %190 = vadd.xlane.f32.xlu1 %v189_v26  ;;  %187 = vadd.xlane.f32.xlu0 %v186_v27 }
  0x1c   :  { %8 = vsyncpa [#allocation4], 0  ;;  %v37_v32 = vld [vmem:[%s11616_s0 + $0x88] sm:$0xff]  ;;  %v36_v33 = vld [vmem:[%s11616_s0 + $0x80] sm:$0xff]  ;;  %vm6817_vm1 = vcmask 130112   ;;  %vm6824_vm2 = vcmask 195712  }
  0x1d   :  { %v201_v34 = vsel %vm149_vm0, %v37_v32, 0.0  ;;  %v198_v35 = vsel %vm149_vm0, %v36_v33, 0.0  ;;  %v39_v36 = vld [vmem:[%s11616_s0 + $0x98] sm:$0xff]  ;;  %v38_v37 = vld [vmem:[%s11616_s0 + $0x90] sm:$0xff]  ;;  %v41_v40 = vld [vmem:[%s11616_s0 + $0xa8] sm:$0xff]  ;;  %vm6831_vm3 = vcmask 261312  }
  0x1e   :  { %v207_v38 = vsel %vm149_vm0, %v39_v36, 0.0  ;;  %v204_v39 = vsel %vm149_vm0, %v38_v37, 0.0  ;;  %v40_v41 = vld [vmem:[%s11616_s0 + $0xa0] sm:$0xff]  ;;  %v213_v42 = vsel %vm149_vm0, %v41_v40, 0.0  ;;  %v43_v44 = vld [vmem:[%s11616_s0 + $0xb8] sm:$0xff]  ;;  %v42_v45 = vld [vmem:[%s11616_s0 + $0xb0] sm:$0xff] }
  0x1f   :  { %196 = vadd.xlane.f32.xlu1 %v195_v30  ;;  %193 = vadd.xlane.f32.xlu0 %v192_v31  ;;  %v210_v43 = vsel %vm149_vm0, %v40_v41, 0.0  ;;  %v219_v46 = vsel %vm149_vm0, %v43_v44, 0.0  ;;  %v216_v47 = vsel %vm149_vm0, %v42_v45, 0.0  ;;  %v45_v48 = vld [vmem:[%s11616_s0 + $0xc8] sm:$0xff]  ;;  %v44_v49 = vld [vmem:[%s11616_s0 + $0xc0] sm:$0xff]  ;;  %v47_v52 = vld [vmem:[%s11616_s0 + $0xd8] sm:$0xff] }
  0x20   :  { %v225_v50 = vsel %vm149_vm0, %v45_v48, 0.0  ;;  %v222_v51 = vsel %vm149_vm0, %v44_v49, 0.0  ;;  %v46_v53 = vld [vmem:[%s11616_s0 + $0xd0] sm:$0xff]  ;;  %v231_v54 = vsel %vm149_vm0, %v47_v52, 0.0  ;;  %v49_v56 = vld [vmem:[%s11616_s0 + $0xe8] sm:$0xff]  ;;  %v48_v57 = vld [vmem:[%s11616_s0 + $0xe0] sm:$0xff] }
  0x21   :  { %v228_v55 = vsel %vm149_vm0, %v46_v53, 0.0  ;;  %v237_v58 = vsel %vm149_vm0, %v49_v56, 0.0  ;;  %v234_v59 = vsel %vm149_vm0, %v48_v57, 0.0  ;;  %v51_v60 = vld [vmem:[%s11616_s0 + $0xf8] sm:$0xff]  ;;  %v50_v61 = vld [vmem:[%s11616_s0 + $0xf0] sm:$0xff]  ;;  %v53_v0 = vld [vmem:[%s11616_s0 + $0x108] sm:$0xff] }
  0x22   :  { %v243_v62 = vsel %vm149_vm0, %v51_v60, 0.0  ;;  %v240_v63 = vsel %vm149_vm0, %v50_v61, 0.0  ;;  %v52_v1 = vld [vmem:[%s11616_s0 + $0x100] sm:$0xff]  ;;  %v249_v2 = vsel %vm149_vm0, %v53_v0, 0.0  ;;  %v55_v4 = vld [vmem:[%s11616_s0 + $0x118] sm:$0xff]  ;;  %v54_v5 = vld [vmem:[%s11616_s0 + $0x110] sm:$0xff] }
  0x23   :  { %202 = vadd.xlane.f32.xlu1 %v201_v34  ;;  %199 = vadd.xlane.f32.xlu0 %v198_v35  ;;  %v246_v3 = vsel %vm149_vm0, %v52_v1, 0.0  ;;  %v255_v6 = vsel %vm149_vm0, %v55_v4, 0.0  ;;  %v252_v7 = vsel %vm149_vm0, %v54_v5, 0.0  ;;  %v57_v8 = vld [vmem:[%s11616_s0 + $0x128] sm:$0xff]  ;;  %v56_v9 = vld [vmem:[%s11616_s0 + $0x120] sm:$0xff]  ;;  %v59_v12 = vld [vmem:[%s11616_s0 + $0x138] sm:$0xff] }
  0x24   :  { %v261_v10 = vsel %vm149_vm0, %v57_v8, 0.0  ;;  %v258_v11 = vsel %vm149_vm0, %v56_v9, 0.0  ;;  %v58_v13 = vld [vmem:[%s11616_s0 + $0x130] sm:$0xff]  ;;  %v267_v14 = vsel %vm149_vm0, %v59_v12, 0.0  ;;  %v61_v16 = vld [vmem:[%s11616_s0 + $0x148] sm:$0xff]  ;;  %v60_v17 = vld [vmem:[%s11616_s0 + $0x140] sm:$0xff] }
  0x25   :  { %v264_v15 = vsel %vm149_vm0, %v58_v13, 0.0  ;;  %v273_v18 = vsel %vm149_vm0, %v61_v16, 0.0  ;;  %v270_v19 = vsel %vm149_vm0, %v60_v17, 0.0  ;;  %v63_v20 = vld [vmem:[%s11616_s0 + $0x158] sm:$0xff]  ;;  %v62_v21 = vld [vmem:[%s11616_s0 + $0x150] sm:$0xff]  ;;  %v65_v24 = vld [vmem:[%s11616_s0 + $0x168] sm:$0xff] }
  0x26   :  { %v279_v22 = vsel %vm149_vm0, %v63_v20, 0.0  ;;  %v276_v23 = vsel %vm149_vm0, %v62_v21, 0.0  ;;  %v64_v25 = vld [vmem:[%s11616_s0 + $0x160] sm:$0xff]  ;;  %v285_v26 = vsel %vm149_vm0, %v65_v24, 0.0  ;;  %v67_v28 = vld [vmem:[%s11616_s0 + $0x178] sm:$0xff]  ;;  %v66_v29 = vld [vmem:[%s11616_s0 + $0x170] sm:$0xff] }
  0x27   :  { %208 = vadd.xlane.f32.xlu1 %v207_v38  ;;  %205 = vadd.xlane.f32.xlu0 %v204_v39  ;;  %v282_v27 = vsel %vm149_vm0, %v64_v25, 0.0  ;;  %v291_v30 = vsel %vm149_vm0, %v67_v28, 0.0  ;;  %v288_v31 = vsel %vm149_vm0, %v66_v29, 0.0  ;;  %v69_v32 = vld [vmem:[%s11616_s0 + $0x188] sm:$0xff]  ;;  %v68_v33 = vld [vmem:[%s11616_s0 + $0x180] sm:$0xff]  ;;  %v71_v36 = vld [vmem:[%s11616_s0 + $0x198] sm:$0xff] }
  0x28   :  { %v297_v34 = vsel %vm149_vm0, %v69_v32, 0.0  ;;  %v294_v35 = vsel %vm149_vm0, %v68_v33, 0.0  ;;  %v70_v37 = vld [vmem:[%s11616_s0 + $0x190] sm:$0xff]  ;;  %v303_v38 = vsel %vm149_vm0, %v71_v36, 0.0  ;;  %v73_v40 = vld [vmem:[%s11616_s0 + $0x1a8] sm:$0xff]  ;;  %v72_v41 = vld [vmem:[%s11616_s0 + $0x1a0] sm:$0xff] }
  0x29   :  { %v300_v39 = vsel %vm149_vm0, %v70_v37, 0.0  ;;  %v75_v44 = vld [vmem:[%s11616_s0 + $0x1b8] sm:$0xff]  ;;  %v74_v45 = vld [vmem:[%s11616_s0 + $0x1b0] sm:$0xff]  ;;  %v77_v48 = vld [vmem:[%s11616_s0 + $0x1c8] sm:$0xff]  ;;  %vm6838_vm4 = vcmask 326912   ;;  %vm6845_vm5 = vcmask 392512  }
  0x2a   :  { %v76_v49 = vld [vmem:[%s11616_s0 + $0x1c0] sm:$0xff]  ;;  %v79_v52 = vld [vmem:[%s11616_s0 + $0x1d8] sm:$0xff]  ;;  %v78_v53 = vld [vmem:[%s11616_s0 + $0x1d0] sm:$0xff]  ;;  %vm6852_vm6 = vcmask 458112   ;;  %vm6859_vm7 = vcmask 523712   ;;  %vm6866_vm8 = vcmask 589312  }
  0x2b   :  { %214 = vadd.xlane.f32.xlu1 %v213_v42  ;;  %211 = vadd.xlane.f32.xlu0 %v210_v43  ;;  %v309_v42 = vsel %vm149_vm0, %v73_v40, 0.0  ;;  %v306_v43 = vsel %vm149_vm0, %v72_v41, 0.0  ;;  %v81_v56 = vld [vmem:[%s11616_s0 + $0x1e8] sm:$0xff]  ;;  %v80_v57 = vld [vmem:[%s11616_s0 + $0x1e0] sm:$0xff]  ;;  %v83_v60 = vld [vmem:[%s11616_s0 + $0x1f8] sm:$0xff]  ;;  %vm6873_vm9 = vcmask 654912  }
  0x2c   :  { %v82_v61 = vld [vmem:[%s11616_s0 + $0x1f0] sm:$0xff]  ;;  %v85_v0 = vld [vmem:[%s11616_s0 + $0x208] sm:$0xff]  ;;  %v84_v1 = vld [vmem:[%s11616_s0 + $0x200] sm:$0xff]  ;;  %vm6880_vm10 = vcmask 720512   ;;  %vm6887_vm11 = vcmask 786112   ;;  %vm6894_vm12 = vcmask 851712  }
  0x2d   :  { %v87_v4 = vld [vmem:[%s11616_s0 + $0x218] sm:$0xff]  ;;  %v86_v5 = vld [vmem:[%s11616_s0 + $0x210] sm:$0xff]  ;;  %v89_v8 = vld [vmem:[%s11616_s0 + $0x228] sm:$0xff]  ;;  %vm6901_vm13 = vcmask 917312   ;;  %vm6908_vm14 = vcmask 982912   ;;  %vm6915_vm15 = vcmask 1048512  }
  0x2e   :  { %v88_v9 = vld [vmem:[%s11616_s0 + $0x220] sm:$0xff]  ;;  %v91_v12 = vld [vmem:[%s11616_s0 + $0x238] sm:$0xff]  ;;  %v90_v13 = vld [vmem:[%s11616_s0 + $0x230] sm:$0xff]  ;;  %s7922_s14 = smov [#allocation3]  }
  0x2f   :  { %220 = vadd.xlane.f32.xlu1 %v219_v46  ;;  %217 = vadd.xlane.f32.xlu0 %v216_v47  ;;  %v315_v46 = vsel %vm149_vm0, %v75_v44, 0.0  ;;  %v312_v47 = vsel %vm149_vm0, %v74_v45, 0.0  ;;  %v93_v16 = vld [vmem:[%s11616_s0 + $0x248] sm:$0xff]  ;;  %v92_v17 = vld [vmem:[%s11616_s0 + $0x240] sm:$0xff]  ;;  %v94_v24 = vld [vmem:[%s11616_s0 + $0x250] sm:$0xff]  ;;  %s7740_s15 = sshll.u32 %s7922_s14, 4  ;;  %s7741_s15 = int_to_ptr.vmem [resolvable:$true] %s7740_s15 }
  0x30   :  { %v366_v20 = vsel %vm149_vm0, %v92_v17, 0.0  ;;  %v97_v29 = vld [vmem:[%s11616_s0 + $0x268] sm:$0xff]  ;;  %v98_v36 = vld [vmem:[%s11616_s0 + $0x270] sm:$0xff]  ;;  %s7892_s16 = scalar_lea.vmem %s7741_s15, 32  ;;  %p7897_p1 = scmp.lt.s32.totalorder %s7741_s15, %s7741_s15 }
  0x31   :  { %v381_v32 = vsel %vm149_vm0, %v97_v29, 0.0  ;;  %v101_v41 = vld [vmem:[%s11616_s0 + $0x288] sm:$0xff]  ;;  %p7893_p0 = scmp.ne.s32.totalorder %s7741_s15, %s7892_s16  ;;  %p7898_p2 = scmp.lt.s32.totalorder %s7892_s16, %s7892_s16 }
  0x32   :  { %v393_v44 = vsel %vm149_vm0, %v101_v41, 0.0  ;;  %v115_v41 = vld [vmem:[%s11616_s0 + $0x2f8] sm:$0xff] }
  0x33   :  { %226 = vadd.xlane.f32.xlu1 %v225_v50  ;;  %223 = vadd.xlane.f32.xlu0 %v222_v51  ;;  %v321_v50 = vsel %vm149_vm0, %v77_v48, 0.0  ;;  %v318_v51 = vsel %vm149_vm0, %v76_v49, 0.0  ;;  %v102_v48 = vld [vmem:[%s11616_s0 + $0x290] sm:$0xff]  ;;  %p7899_p3 = por %p7898_p2, %p7897_p1 }
  0x35   :  { %p7900_p4 = pnand %p7899_p3, %p7893_p0 }
  0x37   :  { %232 = vadd.xlane.f32.xlu1 %v231_v54  ;;  %229 = vadd.xlane.f32.xlu0 %v228_v55  ;;  %v327_v54 = vsel %vm149_vm0, %v79_v52, 0.0  ;;  %v324_v55 = vsel %vm149_vm0, %v78_v53, 0.0  ;;  %v105_v53 = vld [vmem:[%s11616_s0 + $0x2a8] sm:$0xff] }
  0x3b   :  { %238 = vadd.xlane.f32.xlu1 %v237_v58  ;;  %235 = vadd.xlane.f32.xlu0 %v234_v59  ;;  %v333_v58 = vsel %vm149_vm0, %v81_v56, 0.0  ;;  %v330_v59 = vsel %vm149_vm0, %v80_v57, 0.0  ;;  %v405_v56 = vsel %vm149_vm0, %v105_v53, 0.0 }
  0x3f   :  { %244 = vadd.xlane.f32.xlu1 %v243_v62  ;;  %241 = vadd.xlane.f32.xlu0 %v240_v63  ;;  %v339_v62 = vsel %vm149_vm0, %v83_v60, 0.0  ;;  %v336_v63 = vsel %vm149_vm0, %v82_v61, 0.0  ;;  %v106_v60 = vld [vmem:[%s11616_s0 + $0x2b0] sm:$0xff] }
  0x43   :  { %250 = vadd.xlane.f32.xlu1 %v249_v2  ;;  %247 = vadd.xlane.f32.xlu0 %v246_v3  ;;  %v345_v2 = vsel %vm149_vm0, %v85_v0, 0.0  ;;  %v342_v3 = vsel %vm149_vm0, %v84_v1, 0.0  ;;  %v109_v1 = vld [vmem:[%s11616_s0 + $0x2c8] sm:$0xff] }
  0x47   :  { %256 = vadd.xlane.f32.xlu1 %v255_v6  ;;  %253 = vadd.xlane.f32.xlu0 %v252_v7  ;;  %v351_v6 = vsel %vm149_vm0, %v87_v4, 0.0  ;;  %v348_v7 = vsel %vm149_vm0, %v86_v5, 0.0  ;;  %v417_v4 = vsel %vm149_vm0, %v109_v1, 0.0  ;;  %v118_v1 = vld [vmem:[%s11616_s0 + $0x310] sm:$0xff] }
  0x4b   :  { %262 = vadd.xlane.f32.xlu1 %v261_v10  ;;  %259 = vadd.xlane.f32.xlu0 %v258_v11  ;;  %v357_v10 = vsel %vm149_vm0, %v89_v8, 0.0  ;;  %v354_v11 = vsel %vm149_vm0, %v88_v9, 0.0  ;;  %v110_v8 = vld [vmem:[%s11616_s0 + $0x2d0] sm:$0xff]  ;;  %v7917_v9 = vmov 269488144  }
  0x4f   :  { %268 = vadd.xlane.f32.xlu1 %v267_v14  ;;  %265 = vadd.xlane.f32.xlu0 %v264_v15  ;;  %v363_v14 = vsel %vm149_vm0, %v91_v12, 0.0  ;;  %v360_v15 = vsel %vm149_vm0, %v90_v13, 0.0  ;;  %v7918_v12 = vmov 842150450  }
  0x50   :  { %v670_v13 = vunpack.c.l.s4 %v7918_v12 }
  0x53   :  { %274 = vadd.xlane.f32.xlu1 %v273_v18  ;;  %271 = vadd.xlane.f32.xlu0 %v270_v19  ;;  %v369_v19 = vsel %vm149_vm0, %v93_v16, 0.0  ;;  %v7920_v16 = vmov 1987475062  }
  0x54   :  { %v684_v17 = vunpack.c.l.s4 %v7920_v16 }
  0x57   :  { %280 = vadd.xlane.f32.xlu1 %v279_v22  ;;  %277 = vadd.xlane.f32.xlu0 %v276_v23  ;;  %v7916_v22 = vmov 0   ;;  %v95_v23 = vld [vmem:[%s11616_s0 + $0x258] sm:$0xff] }
  0x58   :  { %7891 = vset.pattern.permute.xlu1 %v7916_v22  ;;  %7890 = vset.pattern.permute.xlu0 %v7916_v22  ;;  %v420_v22 = vsel %vm149_vm0, %v110_v8, 0.0  ;;  %v123_v8 = vld [vmem:[%s11616_s0 + $0x338] sm:$0xff] }
  0x5b   :  { %286 = vadd.xlane.f32.xlu1 %v285_v26  ;;  %283 = vadd.xlane.f32.xlu0 %v282_v27  ;;  %v375_v26 = vsel %vm149_vm0, %v95_v23, 0.0  ;;  %v372_v27 = vsel %vm149_vm0, %v94_v24, 0.0  ;;  %v113_v24 = vld [vmem:[%s11616_s0 + $0x2e8] sm:$0xff] }
  0x5f   :  { %292 = vadd.xlane.f32.xlu1 %v291_v30  ;;  %289 = vadd.xlane.f32.xlu0 %v288_v31  ;;  %v96_v30 = vld [vmem:[%s11616_s0 + $0x260] sm:$0xff] }
  0x60   :  { %v378_v33 = vsel %vm149_vm0, %v96_v30, 0.0  ;;  %v671_v30 = vunpack.c.0.s8 %v670_v13 }
  0x63   :  { %298 = vadd.xlane.f32.xlu1 %v297_v34  ;;  %295 = vadd.xlane.f32.xlu0 %v294_v35  ;;  %v99_v35 = vld [vmem:[%s11616_s0 + $0x278] sm:$0xff] }
  0x67   :  { %304 = vadd.xlane.f32.xlu1 %v303_v38  ;;  %301 = vadd.xlane.f32.xlu0 %v300_v39  ;;  %v387_v38 = vsel %vm149_vm0, %v99_v35, 0.0  ;;  %v384_v39 = vsel %vm149_vm0, %v98_v36, 0.0  ;;  %v429_v36 = vsel %vm149_vm0, %v113_v24, 0.0 }
  0x6b   :  { %310 = vadd.xlane.f32.xlu1 %v309_v42  ;;  %307 = vadd.xlane.f32.xlu0 %v306_v43  ;;  %v100_v42 = vld [vmem:[%s11616_s0 + $0x280] sm:$0xff] }
  0x6c   :  { %v390_v45 = vsel %vm149_vm0, %v100_v42, 0.0  ;;  %v114_v42 = vld [vmem:[%s11616_s0 + $0x2f0] sm:$0xff] }
  0x6f   :  { %316 = vadd.xlane.f32.xlu1 %v315_v46  ;;  %313 = vadd.xlane.f32.xlu0 %v312_v47  ;;  %v103_v47 = vld [vmem:[%s11616_s0 + $0x298] sm:$0xff] }
  0x73   :  { %322 = vadd.xlane.f32.xlu1 %v321_v50  ;;  %319 = vadd.xlane.f32.xlu0 %v318_v51  ;;  %v399_v50 = vsel %vm149_vm0, %v103_v47, 0.0  ;;  %v396_v51 = vsel %vm149_vm0, %v102_v48, 0.0 }
  0x77   :  { %328 = vadd.xlane.f32.xlu1 %v327_v54  ;;  %325 = vadd.xlane.f32.xlu0 %v324_v55  ;;  %v104_v54 = vld [vmem:[%s11616_s0 + $0x2a0] sm:$0xff] }
  0x78   :  { %v402_v57 = vsel %vm149_vm0, %v104_v54, 0.0  ;;  %v435_v54 = vsel %vm149_vm0, %v115_v41, 0.0 }
  0x7b   :  { %334 = vadd.xlane.f32.xlu1 %v333_v58  ;;  %331 = vadd.xlane.f32.xlu0 %v330_v59  ;;  %v107_v59 = vld [vmem:[%s11616_s0 + $0x2b8] sm:$0xff] }
  0x7f   :  { %340 = vadd.xlane.f32.xlu1 %v339_v62  ;;  %337 = vadd.xlane.f32.xlu0 %v336_v63  ;;  %v411_v62 = vsel %vm149_vm0, %v107_v59, 0.0  ;;  %v408_v63 = vsel %vm149_vm0, %v106_v60, 0.0  ;;  %v117_v59 = vld [vmem:[%s11616_s0 + $0x308] sm:$0xff]  ;;  %v116_v60 = vld [vmem:[%s11616_s0 + $0x300] sm:$0xff] }
  0x83   :  { %346 = vadd.xlane.f32.xlu1 %v345_v2  ;;  %343 = vadd.xlane.f32.xlu0 %v342_v3  ;;  %v108_v2 = vld [vmem:[%s11616_s0 + $0x2c0] sm:$0xff] }
  0x84   :  { %v414_v5 = vsel %vm149_vm0, %v108_v2, 0.0  ;;  %v121_v2 = vld [vmem:[%s11616_s0 + $0x328] sm:$0xff] }
  0x87   :  { %352 = vadd.xlane.f32.xlu1 %v351_v6  ;;  %349 = vadd.xlane.f32.xlu0 %v348_v7  ;;  %v111_v7 = vld [vmem:[%s11616_s0 + $0x2d8] sm:$0xff] }
  0x8b   :  { %358 = vadd.xlane.f32.xlu1 %v357_v10  ;;  %355 = vadd.xlane.f32.xlu0 %v354_v11  ;;  %v663_v10 = vunpack.c.l.s4 %v7917_v9  ;;  %v11620_v11 = vlaneseq  ;;  %v122_v9 = vld [vmem:[%s11616_s0 + $0x330] sm:$0xff] }
  0x8d   :  { %v8358_v29 = vshrl.u32 %v11620_v11, 7 }
  0x8f   :  { %364 = vadd.xlane.f32.xlu1 %v363_v14  ;;  %361 = vadd.xlane.f32.xlu0 %v360_v15  ;;  %v7919_v14 = vmov 1414812756   ;;  %11685 = vst [vmem:[#allocation7_spill] sm:$0xff] %v8358_v29  ;;  %v8376_v48 = vsub.s32 %v671_v30, %v8358_v29 }
  0x90   :  { %v8237_v18 = vpop.xlane.xlu1 %157  ;;  %v8241_v21 = vpop.xlane.xlu0 %151  ;;  %v677_v15 = vunpack.c.l.s4 %v7919_v14 }
  0x91   :  { %v731_v13 = vrot.slane %v8237_v18, %v8376_v48  ;;  %v675_v41 = vrot.slane %v8241_v21, %v8376_v48 }
  0x93   :  { %370 = vadd.xlane.f32.xlu1 %v369_v19  ;;  %367 = vadd.xlane.f32.xlu0 %v366_v20  ;;  %v423_v20 = vsel %vm149_vm0, %v111_v7, 0.0  ;;  %v438_v7 = vsel %vm149_vm0, %v116_v60, 0.0 }
  0x94   :  { %v8249_v25 = vpop.xlane.xlu1 %160  ;;  %v8253_v28 = vpop.xlane.xlu0 %154 }
  0x97   :  { %376 = vadd.xlane.f32.xlu1 %v375_v26  ;;  %373 = vadd.xlane.f32.xlu0 %v372_v27  ;;  %v112_v26 = vld [vmem:[%s11616_s0 + $0x2e0] sm:$0xff]  ;;  %v664_v27 = vunpack.c.0.s8 %v663_v10  ;;  %v125_v10 = vld [vmem:[%s11616_s0 + $0x348] sm:$0xff] }
  0x98   :  { %v8261_v31 = vpop.xlane.xlu1 %166  ;;  %v8265_v34 = vpop.xlane.xlu0 %163 }
  0x99   :  { %v8373_v47 = vsub.s32 %v664_v27, %v8358_v29  ;;  %v453_v27 = vsel %vm149_vm0, %v121_v2, 0.0  ;;  %v128_v2 = vld [vmem:[%s11616_s0 + $0x360] sm:$0xff] }
  0x9b   :  { %382 = vadd.xlane.f32.xlu1 %v381_v32  ;;  %379 = vadd.xlane.f32.xlu0 %v378_v33  ;;  %v678_v32 = vunpack.c.0.s8 %v677_v15  ;;  %v685_v33 = vunpack.c.0.s8 %v684_v17  ;;  %v724_v12 = vrot.slane %v8237_v18, %v8373_v47 }
  0x9c   :  { %v8273_v37 = vpop.xlane.xlu1 %172  ;;  %v8277_v40 = vpop.xlane.xlu0 %169 }
  0x9f   :  { %388 = vadd.xlane.f32.xlu1 %v387_v38  ;;  %385 = vadd.xlane.f32.xlu0 %v384_v39  ;;  %v426_v38 = vsel %vm149_vm0, %v112_v26, 0.0  ;;  %v444_v26 = vsel %vm149_vm0, %v118_v1, 0.0 }
  0xa0   :  { %v8285_v43 = vpop.xlane.xlu1 %178  ;;  %v8289_v46 = vpop.xlane.xlu0 %175 }
  0xa3   :  { %394 = vadd.xlane.f32.xlu1 %v393_v44  ;;  %391 = vadd.xlane.f32.xlu0 %v390_v45  ;;  %v7921_v44 = vmov 1983009808  }
  0xa4   :  { %v8297_v49 = vpop.xlane.xlu1 %184  ;;  %v8301_v52 = vpop.xlane.xlu0 %181  ;;  %v4249_v45 = vunpack.c.l.s4 %v7921_v44 }
  0xa7   :  { %400 = vadd.xlane.f32.xlu1 %v399_v50  ;;  %397 = vadd.xlane.f32.xlu0 %v396_v51  ;;  %v8379_v50 = vsub.s32 %v678_v32, %v8358_v29  ;;  %v8382_v51 = vsub.s32 %v685_v33, %v8358_v29  ;;  %v8445_v32 = vsel %vm149_vm0, %v123_v8, 0.0  ;;  %v8448_v33 = vsel %vm149_vm0, %v122_v9, 0.0 }
  0xa8   :  { %v8309_v55 = vpop.xlane.xlu1 %190  ;;  %v8313_v58 = vpop.xlane.xlu0 %187 }
  0xa9   :  { %v738_v14 = vrot.slane %v8237_v18, %v8379_v50  ;;  %v745_v15 = vrot.slane %v8237_v18, %v8382_v51  ;;  %v682_v60 = vrot.slane %v8241_v21, %v8379_v50  ;;  %v710_v8 = vrot.slane %v8253_v28, %v8379_v50 }
  0xaa   :  { %v717_v9 = vrot.slane %v8253_v28, %v8382_v51 }
  0xab   :  { %406 = vadd.xlane.f32.xlu1 %v405_v56  ;;  %403 = vadd.xlane.f32.xlu0 %v402_v57  ;;  %v432_v56 = vsel %vm149_vm0, %v114_v42, 0.0 }
  0xac   :  { %v8321_v61 = vpop.xlane.xlu1 %196  ;;  %v8325_v0 = vpop.xlane.xlu0 %193 }
  0xaf   :  { %412 = vadd.xlane.f32.xlu1 %v411_v62  ;;  %409 = vadd.xlane.f32.xlu0 %v408_v63  ;;  %v119_v62 = vld [vmem:[%s11616_s0 + $0x318] sm:$0xff]  ;;  %v4250_v63 = vunpack.c.0.s8 %v4249_v45  ;;  %v126_v45 = vld [vmem:[%s11616_s0 + $0x350] sm:$0xff] }
  0xb0   :  { %v8333_v3 = vpop.xlane.xlu1 %202  ;;  %v8337_v6 = vpop.xlane.xlu0 %199  ;;  %v447_v24 = vsel %vm149_vm0, %v119_v62, 0.0  ;;  %v689_v62 = vrot.slane %v8241_v21, %v8382_v51 }
  0xb1   :  { %v8441_v18 = vsub.s32 %v4250_v63, %v8358_v29  ;;  %v8522_v29 = vsel %vm149_vm0, %v128_v2, 0.0 }
  0xb3   :  { %418 = vadd.xlane.f32.xlu1 %v417_v4  ;;  %415 = vadd.xlane.f32.xlu0 %v414_v5  ;;  %v120_v4 = vld [vmem:[%s11616_s0 + $0x320] sm:$0xff]  ;;  %v441_v5 = vsel %vm149_vm0, %v117_v59, 0.0  ;;  %v8471_v59 = vcombine.low %v738_v14, %v745_v15  ;;  %v752_v14 = vrot.slane %v8249_v25, %v8373_v47  ;;  %v759_v15 = vrot.slane %v8249_v25, %v8376_v48 }
  0xb4   :  { %v8345_v19 = vpop.xlane.xlu1 %208  ;;  %v8349_v23 = vpop.xlane.xlu0 %205  ;;  %v450_v30 = vsel %vm149_vm0, %v120_v4, 0.0  ;;  %v131_v4 = vld [vmem:[%s11616_s0 + $0x378] sm:$0xff] }
  0xb5   :  { %11684 = vst [vmem:[#allocation6_spill] sm:$0xff] %v8349_v23 }
  0xb7   :  { %424 = vadd.xlane.f32.xlu1 %v423_v20  ;;  %421 = vadd.xlane.f32.xlu0 %v420_v22  ;;  %v124_v20 = vld [vmem:[%s11616_s0 + $0x340] sm:$0xff]  ;;  %v127_v22 = vld [vmem:[%s11616_s0 + $0x358] sm:$0xff] }
  0xb8   :  { %v8360_v35 = vpop.xlane.xlu1 %214  ;;  %v8364_v39 = vpop.xlane.xlu0 %211  ;;  %v8458_v42 = vsel %vm149_vm0, %v124_v20, 0.0  ;;  %v8461_v44 = vsel %vm149_vm0, %v127_v22, 0.0  ;;  %v773_v20 = vrot.slane %v8249_v25, %v8382_v51  ;;  %v8516_v22 = vsel %vm149_vm0, %v126_v45, 0.0 }
  0xb9   :  { %11686 = vst [vmem:[#allocation8_spill] sm:$0xff] %v8360_v35  ;;  %11687 = vst [vmem:[#allocation9_spill] sm:$0xff] %v8364_v39 }
  0xbb   :  { %430 = vadd.xlane.f32.xlu1 %v429_v36  ;;  %427 = vadd.xlane.f32.xlu0 %v426_v38  ;;  %v8451_v36 = vsel %vm149_vm0, %v125_v10, 0.0  ;;  %v668_v38 = vrot.slane %v8241_v21, %v8373_v47  ;;  %v703_v21 = vrot.slane %v8253_v28, %v8376_v48  ;;  %v133_v10 = vld [vmem:[%s11616_s0 + $0x388] sm:$0xff] }
  0xbc   :  { %v8384_v53 = vpop.xlane.xlu1 %220  ;;  %v8388_v57 = vpop.xlane.xlu0 %217 }
  0xbd   :  { %11688 = vst [vmem:[#allocation10_spill] sm:$0xff] %v8384_v53  ;;  %11689 = vst [vmem:[#allocation11_spill] sm:$0xff] %v8388_v57  ;;  %v8546_v2 = vcombine.low %v668_v38, %v675_v41  ;;  %v815_v38 = vrot.slane %v8261_v31, %v8376_v48  ;;  %v822_v41 = vrot.slane %v8261_v31, %v8379_v50 }
  0xbe   :  { %v934_v57 = vrot.slane %v8285_v43, %v8379_v50  ;;  %v941_v53 = vrot.slane %v8285_v43, %v8382_v51 }
  0xbf   :  { %436 = vadd.xlane.f32.xlu1 %v435_v54  ;;  %433 = vadd.xlane.f32.xlu0 %v432_v56  ;;  %v129_v54 = vld [vmem:[%s11616_s0 + $0x368] sm:$0xff]  ;;  %v8469_v56 = vcombine.low %v724_v12, %v731_v13  ;;  %v132_v12 = vld [vmem:[%s11616_s0 + $0x380] sm:$0xff]  ;;  %v135_v13 = vld [vmem:[%s11616_s0 + $0x398] sm:$0xff]  ;;  %v4254_v35 = vrot.slane %v8546_v2, %v8441_v18 }
  0xc0   :  { %v8427_v16 = vpop.xlane.xlu1 %226  ;;  %v8429_v17 = vpop.xlane.xlu0 %223  ;;  %v8519_v11 = vsel %vm149_vm0, %v129_v54, 0.0  ;;  %v8541_v45 = vsel %vm149_vm0, %v135_v13, 0.0  ;;  %v134_v54 = vld [vmem:[%s11616_s0 + $0x390] sm:$0xff]  ;;  %v4295_v13 = vrot.slane %v8471_v59, %v8441_v18  ;;  %v780_v59 = vrot.slane %v8265_v34, %v8373_v47 }
  0xc1   :  { %11690 = vst [vmem:[#allocation12_spill] sm:$0xff] %v8427_v16  ;;  %11691 = vst [vmem:[#allocation13_spill] sm:$0xff] %v8429_v17  ;;  %v808_v16 = vrot.slane %v8261_v31, %v8373_v47 }
  0xc2   :  { %11696 = vst [vmem:[#allocation18_spill] sm:$0xff] %v8541_v45 }
  0xc3   :  { %442 = vadd.xlane.f32.xlu1 %v441_v5  ;;  %439 = vadd.xlane.f32.xlu0 %v438_v7  ;;  %v130_v5 = vld [vmem:[%s11616_s0 + $0x370] sm:$0xff]  ;;  %v696_v7 = vrot.slane %v8253_v28, %v8373_v47  ;;  %v766_v28 = vrot.slane %v8249_v25, %v8379_v50 }
  0xc4   :  { %v8477_v63 = vpop.xlane.xlu1 %232  ;;  %v8479_v1 = vpop.xlane.xlu0 %229  ;;  %v8532_v25 = vsel %vm149_vm0, %v130_v5, 0.0  ;;  %v4264_v5 = vcombine.low %v710_v8, %v717_v9 }
  0xc5   :  { %11692 = vst [vmem:[#allocation14_spill] sm:$0xff] %v8477_v63  ;;  %11693 = vst [vmem:[#allocation15_spill] sm:$0xff] %v8479_v1  ;;  %v8525_v1 = vsel %vm149_vm0, %v131_v4, 0.0  ;;  %v8548_v4 = vcombine.low %v682_v60, %v689_v62  ;;  %v8565_v60 = vsel %vm149_vm0, %v134_v54, 0.0  ;;  %v787_v62 = vrot.slane %v8265_v34, %v8376_v48 }
  0xc6   :  { %11697 = vst [vmem:[#allocation19_spill] sm:$0xff] %v8565_v60  ;;  %v836_v54 = vrot.slane %v8277_v40, %v8373_v47 }
  0xc7   :  { %448 = vadd.xlane.f32.xlu1 %v447_v24  ;;  %445 = vadd.xlane.f32.xlu0 %v444_v26  ;;  %v8535_v24 = vsel %vm149_vm0, %v133_v10, 0.0  ;;  %v8538_v26 = vsel %vm149_vm0, %v132_v12, 0.0  ;;  %v8552_v10 = vcombine.low %v766_v28, %v773_v20  ;;  %v4288_v12 = vrot.slane %v8469_v56, %v8441_v18 }
  0xc8   :  { %v8527_v63 = vpop.xlane.xlu1 %238  ;;  %v8529_v17 = vpop.xlane.xlu0 %235  ;;  %v829_v56 = vrot.slane %v8261_v31, %v8382_v51  ;;  %v864_v31 = vrot.slane %v8273_v37, %v8373_v47  ;;  %v878_v28 = vrot.slane %v8273_v37, %v8379_v50  ;;  %v885_v20 = vrot.slane %v8273_v37, %v8382_v51 }
  0xc9   :  { %11694 = vst [vmem:[#allocation16_spill] sm:$0xff] %v8527_v63  ;;  %11695 = vst [vmem:[#allocation17_spill] sm:$0xff] %v8529_v17  ;;  %v4263_v17 = vcombine.low %v696_v7, %v703_v21  ;;  %v8550_v63 = vcombine.low %v752_v14, %v759_v15  ;;  %v794_v7 = vrot.slane %v8265_v34, %v8379_v50 }
  0xca   :  { %v4278_v14 = vrot.slane %v4264_v5, %v8441_v18  ;;  %v871_v15 = vrot.slane %v8273_v37, %v8376_v48  ;;  %v920_v37 = vrot.slane %v8285_v43, %v8373_v47  ;;  %v8626_v39 = vcombine.low %v780_v59, %v787_v62 }
  0xcb   :  { %454 = vadd.xlane.f32.xlu1 %v453_v27  ;;  %451 = vadd.xlane.f32.xlu0 %v450_v30  ;;  %v137_v27 = vld [vmem:[%s11616_s0 + $0x3a8] sm:$0xff]  ;;  %v801_v30 = vrot.slane %v8265_v34, %v8382_v51  ;;  %v4271_v9 = vrot.slane %v4263_v17, %v8441_v18  ;;  %v850_v34 = vrot.slane %v8277_v40, %v8379_v50 }
  0xcc   :  { %v8575_v21 = vpop.xlane.xlu1 %244  ;;  %v8577_v8 = vpop.xlane.xlu0 %241  ;;  %v857_v17 = vrot.slane %v8277_v40, %v8382_v51  ;;  %v8605_v5 = vsel %vm149_vm0, %v137_v27, 0.0  ;;  %v8622_v27 = vcombine.low %v808_v16, %v815_v38  ;;  %v8630_v23 = vcombine.low %v864_v31, %v871_v15  ;;  %v138_v15 = vld [vmem:[%s11616_s0 + $0x3b0] sm:$0xff] }
  0xcd   :  { %11698 = vst [vmem:[#allocation20_spill] sm:$0xff] %v8575_v21  ;;  %11699 = vst [vmem:[#allocation21_spill] sm:$0xff] %v8577_v8  ;;  %v843_v8 = vrot.slane %v8277_v40, %v8376_v48  ;;  %v927_v21 = vrot.slane %v8285_v43, %v8376_v48  ;;  %v8632_v43 = vcombine.low %v878_v28, %v885_v20 }
  0xce   :  { %11700 = vst [vmem:[#allocation22_spill] sm:$0xff] %v8605_v5  ;;  %v8624_v5 = vcombine.low %v822_v41, %v829_v56  ;;  %v8640_v45 = vcombine.low %v850_v34, %v857_v17  ;;  %v8647_v2 = vcombine.low %v4271_v9, %v4278_v14  ;;  %v4400_v41 = vcombine.low %v934_v57, %v941_v53 }
  0xcf   :  { %460 = vadd.xlane.f32.xlu1 %v8445_v32  ;;  %457 = vadd.xlane.f32.xlu0 %v8448_v33  ;;  %v136_v33 = vld [vmem:[%s11616_s0 + $0x3a0] sm:$0xff]  ;;  %v8638_v60 = vcombine.low %v836_v54, %v843_v8  ;;  %v4399_v38 = vcombine.low %v920_v37, %v927_v21  ;;  %v899_v53 = vrot.slane %v8289_v46, %v8376_v48 }
  0xd0   :  { %v8615_v40 = vpop.xlane.xlu1 %250  ;;  %v8617_v32 = vpop.xlane.xlu0 %247  ;;  %v8645_v16 = vsel %vm149_vm0, %v136_v33, 0.0  ;;  %11704 = vst [vmem:[#allocation26_spill] sm:$0xff] %v8647_v2  ;;  %v906_v57 = vrot.slane %v8289_v46, %v8379_v50  ;;  %v913_v62 = vrot.slane %v8289_v46, %v8382_v51  ;;  %v4312_v21 = vrot.slane %v8552_v10, %v8441_v18 }
  0xd1   :  { %11701 = vst [vmem:[#allocation23_spill] sm:$0xff] %v8615_v40  ;;  %11702 = vst [vmem:[#allocation24_spill] sm:$0xff] %v8617_v32  ;;  %v8634_v40 = vcombine.low %v794_v7, %v801_v30  ;;  %v8636_v32 = vcombine.low %v4288_v12, %v4295_v13  ;;  %v139_v12 = vld [vmem:[%s11616_s0 + $0x3b8] sm:$0xff]  ;;  %v892_v13 = vrot.slane %v8289_v46, %v8373_v47 }
  0xd2   :  { %v976_v7 = vrot.slane %v8297_v49, %v8373_v47  ;;  %v997_v8 = vrot.slane %v8297_v49, %v8382_v51  ;;  %v948_v31 = vrot.slane %v8301_v52, %v8373_v47  ;;  %v955_v46 = vrot.slane %v8301_v52, %v8376_v48 }
  0xd3   :  { %11703 = vst [vmem:[#allocation25_spill] sm:$0xff] %v8636_v32  ;;  %466 = vadd.xlane.f32.xlu1 %v8451_v36  ;;  %463 = vadd.xlane.f32.xlu0 %v8458_v42  ;;  %v4261_v36 = vrot.slane %v8548_v4, %v8441_v18  ;;  %v4305_v42 = vrot.slane %v8550_v63, %v8441_v18  ;;  %v8685_v30 = vsel %vm149_vm0, %v139_v12, 0.0 }
  0xd4   :  { %v8649_v56 = vpop.xlane.xlu1 %256  ;;  %v8651_v59 = vpop.xlane.xlu0 %253  ;;  %v983_v4 = vrot.slane %v8297_v49, %v8376_v48  ;;  %v990_v63 = vrot.slane %v8297_v49, %v8379_v50  ;;  %v962_v9 = vrot.slane %v8301_v52, %v8379_v50  ;;  %v969_v10 = vrot.slane %v8301_v52, %v8382_v51 }
  0xd5   :  { %v1032_v28 = vrot.slane %v8309_v55, %v8373_v47  ;;  %v1039_v20 = vrot.slane %v8309_v55, %v8376_v48  ;;  %v1046_v52 = vrot.slane %v8309_v55, %v8379_v50  ;;  %v1053_v54 = vrot.slane %v8309_v55, %v8382_v51 }
  0xd6   :  { %v1004_v34 = vrot.slane %v8313_v58, %v8373_v47  ;;  %v1011_v17 = vrot.slane %v8313_v58, %v8376_v48  ;;  %v1018_v37 = vrot.slane %v8313_v58, %v8379_v50  ;;  %v1025_v33 = vrot.slane %v8313_v58, %v8382_v51 }
  0xd7   :  { %472 = vadd.xlane.f32.xlu1 %v8461_v44  ;;  %469 = vadd.xlane.f32.xlu0 %v8516_v22  ;;  %v4407_v44 = vrot.slane %v4399_v38, %v8441_v18  ;;  %v4414_v22 = vrot.slane %v4400_v41, %v8441_v18  ;;  %v8716_v38 = vcombine.low %v976_v7, %v983_v4  ;;  %v8723_v55 = vsel %vm149_vm0, %v138_v15, 0.0 }
  0xd8   :  { %v8691_v49 = vpop.xlane.xlu1 %262  ;;  %v8693_v14 = vpop.xlane.xlu0 %259  ;;  %v8718_v41 = vcombine.low %v892_v13, %v899_v53  ;;  %v8725_v12 = vcombine.low %v4254_v35, %v4261_v36  ;;  %v8727_v32 = vcombine.low %v990_v63, %v997_v8  ;;  %v8729_v2 = vcombine.low %v906_v57, %v913_v62  ;;  %v141_v13 = vld [vmem:[%s11616_s0 + $0x3c8] sm:$0xff] }
  0xd9   :  { %11705 = vst [vmem:[#allocation27_spill] sm:$0xff] %v8693_v14  ;;  %v8742_v53 = vcombine.low %v1032_v28, %v1039_v20  ;;  %v8744_v35 = vcombine.low %v1046_v52, %v1053_v54  ;;  %v8746_v36 = vcombine.low %v948_v31, %v955_v46  ;;  %v8748_v57 = vcombine.low %v962_v9, %v969_v10  ;;  %v140_v10 = vld [vmem:[%s11616_s0 + $0x3c0] sm:$0xff] }
  0xda   :  { %11706 = vst [vmem:[#allocation28_spill] sm:$0xff] %v8725_v12  ;;  %v8750_v62 = vcombine.low %v1004_v34, %v1011_v17  ;;  %v8752_v7 = vcombine.low %v1018_v37, %v1025_v33  ;;  %v8754_v4 = vcombine.low %v4407_v44, %v4414_v22  ;;  %v1095_v63 = vrot.slane %v8321_v61, %v8376_v48 }
  0xdb   :  { %478 = vadd.xlane.f32.xlu1 %v8519_v11  ;;  %475 = vadd.xlane.f32.xlu0 %v8522_v29  ;;  %v8738_v11 = vcombine.low %v4305_v42, %v4312_v21  ;;  %v4322_v29 = vrot.slane %v8626_v39, %v8441_v18  ;;  %v4329_v42 = vrot.slane %v8634_v40, %v8441_v18  ;;  %v8765_v21 = vsel %vm149_vm0, %v141_v13, 0.0 }
  0xdc   :  { %v8731_v14 = vpop.xlane.xlu1 %268  ;;  %v8733_v58 = vpop.xlane.xlu0 %265  ;;  %11710 = vst [vmem:[#allocation32_spill] sm:$0xff] %v8754_v4  ;;  %v1088_v39 = vrot.slane %v8321_v61, %v8373_v47  ;;  %v4441_v8 = vrot.slane %v8716_v38, %v8441_v18  ;;  %v1102_v31 = vrot.slane %v8321_v61, %v8379_v50  ;;  %v1109_v40 = vrot.slane %v8321_v61, %v8382_v51  ;;  %v11721_v4 = vld [vmem:[#allocation19_spill] sm:$0xff] }
  0xdd   :  { %11707 = vst [vmem:[#allocation29_spill] sm:$0xff] %v8731_v14  ;;  %11708 = vst [vmem:[#allocation30_spill] sm:$0xff] %v8733_v58  ;;  %v1060_v46 = vrot.slane %v8325_v0, %v8373_v47  ;;  %v1144_v15 = vrot.slane %v8333_v3, %v8373_v47  ;;  %v1074_v61 = vrot.slane %v8325_v0, %v8379_v50  ;;  %v8809_v17 = vsel %vm149_vm0, %v140_v10, 0.0 }
  0xde   :  { %11709 = vst [vmem:[#allocation31_spill] sm:$0xff] %v8738_v11  ;;  %v1081_v44 = vrot.slane %v8325_v0, %v8382_v51  ;;  %v4448_v22 = vrot.slane %v8727_v32, %v8441_v18  ;;  %v1151_v28 = vrot.slane %v8333_v3, %v8376_v48  ;;  %v1158_v20 = vrot.slane %v8333_v3, %v8379_v50 }
  0xdf   :  { %484 = vadd.xlane.f32.xlu1 %v8525_v1  ;;  %481 = vadd.xlane.f32.xlu0 %v8532_v25  ;;  %v1067_v1 = vrot.slane %v8325_v0, %v8376_v48  ;;  %v1165_v52 = vrot.slane %v8333_v3, %v8382_v51  ;;  %v1116_v54 = vrot.slane %v8337_v6, %v8373_v47 }
  0xe0   :  { %v8777_v9 = vpop.xlane.xlu1 %274  ;;  %v8779_v25 = vpop.xlane.xlu0 %271  ;;  %v1123_v34 = vrot.slane %v8337_v6, %v8376_v48  ;;  %v1130_v0 = vrot.slane %v8337_v6, %v8379_v50  ;;  %v1137_v32 = vrot.slane %v8337_v6, %v8382_v51  ;;  %v8811_v3 = vcombine.low %v1088_v39, %v1095_v63  ;;  %v143_v6 = vld [vmem:[%s11616_s0 + $0x3d8] sm:$0xff] }
  0xe1   :  { %11711 = vst [vmem:[#allocation33_spill] sm:$0xff] %v8777_v9  ;;  %11712 = vst [vmem:[#allocation34_spill] sm:$0xff] %v8779_v25  ;;  %v8813_v37 = vcombine.low %v1102_v31, %v1109_v40  ;;  %v8815_v33 = vcombine.low %v1060_v46, %v1067_v1  ;;  %v1207_v39 = vrot.slane %v8345_v19, %v8376_v48  ;;  %v8849_v11 = vsel %vm149_vm0, %v143_v6, 0.0 }
  0xe2   :  { %v1214_v63 = vrot.slane %v8345_v19, %v8379_v50  ;;  %v1221_v31 = vrot.slane %v8345_v19, %v8382_v51  ;;  %v8834_v40 = vcombine.low %v1144_v15, %v1151_v28  ;;  %v8836_v46 = vcombine.low %v1158_v20, %v1165_v52  ;;  %v11723_v15 = vld [vmem:[#allocation6_spill] sm:$0xff]  ;;  %v142_v20 = vld [vmem:[%s11616_s0 + $0x3d0] sm:$0xff] }
  0xe3   :  { %490 = vadd.xlane.f32.xlu1 %v8535_v24  ;;  %487 = vadd.xlane.f32.xlu0 %v8538_v26  ;;  %11713 = vst [vmem:[#allocation35_spill] sm:$0xff] %v8815_v33  ;;  %v8824_v24 = vcombine.low %v4322_v29, %v4329_v42  ;;  %v1200_v26 = vrot.slane %v8345_v19, %v8373_v47 }
  0xe4   :  { %v8817_v38 = vpop.xlane.xlu1 %280  ;;  %v8819_v13 = vpop.xlane.xlu0 %277  ;;  %v8838_v1 = vcombine.low %v1074_v61, %v1081_v44  ;;  %v4339_v29 = vrot.slane %v8622_v27, %v8441_v18  ;;  %v8842_v42 = vcombine.low %v1116_v54, %v1123_v34  ;;  %v8844_v10 = vcombine.low %v1130_v0, %v1137_v32  ;;  %v11726_v0 = vld [vmem:[#allocation8_spill] sm:$0xff] }
  0xe5   :  { %11714 = vst [vmem:[#allocation36_spill] sm:$0xff] %v8817_v38  ;;  %11715 = vst [vmem:[#allocation37_spill] sm:$0xff] %v8819_v13  ;;  %v8851_v19 = vcombine.low %v4441_v8, %v4448_v22  ;;  %v1172_v61 = vrot.slane %v11723_v15, %v8373_v47  ;;  %v1179_v44 = vrot.slane %v11723_v15, %v8376_v48 }
  0xe6   :  { %11716 = vst [vmem:[#allocation38_spill] sm:$0xff] %v8824_v24  ;;  %11717 = vst [vmem:[#allocation39_spill] sm:$0xff] %v8838_v1  ;;  %v11720_v24 = vld [vmem:[#allocation18_spill] sm:$0xff]  ;;  %v4475_v8 = vrot.slane %v8742_v53, %v8441_v18  ;;  %v8868_v22 = vcombine.low %v1200_v26, %v1207_v39  ;;  %v8870_v52 = vcombine.low %v1214_v63, %v1221_v31  ;;  %v11727_v39 = vld [vmem:[#allocation9_spill] sm:$0xff] }
  0xe7   :  { %11718 = vst [vmem:[#allocation40_spill] sm:$0xff] %v8842_v42  ;;  %11719 = vst [vmem:[#allocation41_spill] sm:$0xff] %v8844_v10  ;;  %496 = vadd.xlane.f32.xlu1 %v11720_v24  ;;  %493 = vadd.xlane.f32.xlu0 %v11721_v4  ;;  %v4346_v4 = vrot.slane %v8624_v5, %v8441_v18  ;;  %v1186_v54 = vrot.slane %v11723_v15, %v8379_v50  ;;  %v11728_v31 = vld [vmem:[#allocation22_spill] sm:$0xff] }
  0xe8   :  { %11722 = vst [vmem:[#allocation18_spill] sm:$0xff] %v8851_v19  ;;  %v8857_v27 = vpop.xlane.xlu1 %286  ;;  %v8859_v28 = vpop.xlane.xlu0 %283  ;;  %v1193_v34 = vrot.slane %v11723_v15, %v8382_v51  ;;  %v1256_v32 = vrot.slane %v11726_v0, %v8373_v47  ;;  %v1263_v6 = vrot.slane %v11726_v0, %v8376_v48  ;;  %v4482_v5 = vrot.slane %v8744_v35, %v8441_v18 }
  0xe9   :  { %11724 = vst [vmem:[#allocation19_spill] sm:$0xff] %v8857_v27  ;;  %11725 = vst [vmem:[#allocation6_spill] sm:$0xff] %v8859_v28  ;;  %v4356_v53 = vrot.slane %v8638_v60, %v8441_v18  ;;  %v1270_v24 = vrot.slane %v11726_v0, %v8379_v50  ;;  %v1277_v26 = vrot.slane %v11726_v0, %v8382_v51  ;;  %v516_v15 = vsel %vm149_vm0, %v142_v20, 0.0  ;;  %v11731_v20 = vld [vmem:[#allocation10_spill] sm:$0xff] }
  0xea   :  { %v1228_v63 = vrot.slane %v11727_v39, %v8373_v47  ;;  %v1235_v35 = vrot.slane %v11727_v39, %v8376_v48  ;;  %v1242_v60 = vrot.slane %v11727_v39, %v8379_v50  ;;  %v1249_v19 = vrot.slane %v11727_v39, %v8382_v51 }
  0xeb   :  { %502 = vadd.xlane.f32.xlu1 %v11728_v31  ;;  %499 = vadd.xlane.f32.xlu0 %v8645_v16  ;;  %v145_v31 = vld [vmem:[%s11616_s0 + $0x3e8] sm:$0xff]  ;;  %v4363_v16 = vrot.slane %v8640_v45, %v8441_v18  ;;  %v1312_v42 = vrot.slane %v11731_v20, %v8373_v47  ;;  %v1319_v28 = vrot.slane %v11731_v20, %v8376_v48 }
  0xec   :  { %v8899_v10 = vpop.xlane.xlu1 %292  ;;  %v8901_v0 = vpop.xlane.xlu0 %289  ;;  %v1326_v39 = vrot.slane %v11731_v20, %v8379_v50  ;;  %v8924_v1 = vcombine.low %v1172_v61, %v1179_v44  ;;  %v8926_v38 = vcombine.low %v1186_v54, %v1193_v34  ;;  %v8931_v33 = vcombine.low %v4339_v29, %v4346_v4 }
  0xed   :  { %11729 = vst [vmem:[#allocation8_spill] sm:$0xff] %v8899_v10  ;;  %11730 = vst [vmem:[#allocation9_spill] sm:$0xff] %v8901_v0  ;;  %v1333_v10 = vrot.slane %v11731_v20, %v8382_v51  ;;  %v11732_v0 = vld [vmem:[#allocation11_spill] sm:$0xff]  ;;  %v525_v20 = vsel %vm149_vm0, %v145_v31, 0.0  ;;  %v8933_v25 = vcombine.low %v1256_v32, %v1263_v6  ;;  %v8935_v9 = vcombine.low %v1270_v24, %v1277_v26 }
  0xee   :  { %v1284_v27 = vrot.slane %v11732_v0, %v8373_v47  ;;  %v1291_v12 = vrot.slane %v11732_v0, %v8376_v48  ;;  %v1298_v45 = vrot.slane %v11732_v0, %v8379_v50  ;;  %v1305_v13 = vrot.slane %v11732_v0, %v8382_v51  ;;  %11733 = vst [vmem:[#allocation22_spill] sm:$0xff] %v8926_v38 }
  0xef   :  { %508 = vadd.xlane.f32.xlu1 %v8685_v30  ;;  %505 = vadd.xlane.f32.xlu0 %v8723_v55  ;;  %v8937_v58 = vcombine.low %v1228_v63, %v1235_v35  ;;  %v144_v30 = vld [vmem:[%s11616_s0 + $0x3e0] sm:$0xff]  ;;  %v8946_v44 = vcombine.low %v4475_v8, %v4482_v5  ;;  %v8948_v55 = vcombine.low %v1312_v42, %v1319_v28  ;;  %v11738_v8 = vld [vmem:[#allocation12_spill] sm:$0xff] }
  0xf0   :  { %v8939_v14 = vpop.xlane.xlu1 %298  ;;  %v8941_v61 = vpop.xlane.xlu0 %295  ;;  %v8950_v29 = vcombine.low %v1326_v39, %v1333_v10  ;;  %v8952_v4 = vcombine.low %v1242_v60, %v1249_v19  ;;  %v4509_v54 = vrot.slane %v8811_v3, %v8441_v18  ;;  %v8956_v34 = vcombine.low %v1284_v27, %v1291_v12  ;;  %v11739_v19 = vld [vmem:[#allocation13_spill] sm:$0xff]  ;;  %v11741_v5 = vld [vmem:[#allocation14_spill] sm:$0xff] }
  0xf1   :  { %11734 = vst [vmem:[#allocation10_spill] sm:$0xff] %v8937_v58  ;;  %v8958_v32 = vcombine.low %v1298_v45, %v1305_v13  ;;  %v8960_v6 = vcombine.low %v4356_v53, %v4363_v16  ;;  %v4516_v24 = vrot.slane %v8813_v37, %v8441_v18  ;;  %v1368_v42 = vrot.slane %v11738_v8, %v8373_v47  ;;  %v11742_v16 = vld [vmem:[#allocation15_spill] sm:$0xff] }
  0xf2   :  { %11735 = vst [vmem:[#allocation11_spill] sm:$0xff] %v8952_v4  ;;  %11736 = vst [vmem:[#allocation42_spill] sm:$0xff] %v8956_v34  ;;  %v1375_v10 = vrot.slane %v11738_v8, %v8376_v48  ;;  %v522_v12 = vsel %vm149_vm0, %v144_v30, 0.0  ;;  %v4373_v3 = vrot.slane %v8630_v23, %v8441_v18  ;;  %v1382_v13 = vrot.slane %v11738_v8, %v8379_v50  ;;  %v147_v23 = vld [vmem:[%s11616_s0 + $0x3f8] sm:$0xff]  ;;  %v146_v58 = vld [vmem:[%s11616_s0 + $0x3f0] sm:$0xff] }
  0xf3   :  { %11737 = vst [vmem:[#allocation43_spill] sm:$0xff] %v8958_v32  ;;  %514 = vadd.xlane.f32.xlu1 %v8765_v21  ;;  %511 = vadd.xlane.f32.xlu0 %v8809_v17  ;;  %v1389_v37 = vrot.slane %v11738_v8, %v8382_v51  ;;  %v1340_v27 = vrot.slane %v11739_v19, %v8373_v47  ;;  %v531_v8 = vsel %vm149_vm0, %v147_v23, 0.0 }
  0xf4   :  { %v1347_v28 = vrot.slane %v11739_v19, %v8376_v48  ;;  %v8981_v21 = vpop.xlane.xlu1 %304  ;;  %v8983_v17 = vpop.xlane.xlu0 %301  ;;  %v1424_v53 = vrot.slane %v11741_v5, %v8373_v47  ;;  %v1354_v26 = vrot.slane %v11739_v19, %v8379_v50  ;;  %v1361_v63 = vrot.slane %v11739_v19, %v8382_v51 }
  0xf5   :  { %11740 = vst [vmem:[#allocation12_spill] sm:$0xff] %v8983_v17  ;;  %v4380_v35 = vrot.slane %v8632_v43, %v8441_v18  ;;  %v1431_v60 = vrot.slane %v11741_v5, %v8376_v48  ;;  %v1438_v0 = vrot.slane %v11741_v5, %v8379_v50  ;;  %v1445_v31 = vrot.slane %v11741_v5, %v8382_v51 }
  0xf6   :  { %v1396_v39 = vrot.slane %v11742_v16, %v8373_v47  ;;  %v1403_v45 = vrot.slane %v11742_v16, %v8376_v48  ;;  %v1410_v30 = vrot.slane %v11742_v16, %v8379_v50  ;;  %v1417_v43 = vrot.slane %v11742_v16, %v8382_v51 }
  0xf7   :  { %520 = vadd.xlane.f32.xlu1 %v8849_v11  ;;  %517 = vadd.xlane.f32.xlu0 %v516_v15  ;;  %v9012_v19 = vcombine.low %v1368_v42, %v1375_v10  ;;  %v9014_v5 = vcombine.low %v1382_v13, %v1389_v37  ;;  %v9016_v32 = vcombine.low %v1340_v27, %v1347_v28  ;;  %v11747_v11 = vld [vmem:[#allocation16_spill] sm:$0xff] }
  0xf8   :  { %v9018_v34 = vpop.xlane.xlu1 %310  ;;  %v9020_v4 = vpop.xlane.xlu0 %307  ;;  %v9025_v16 = vcombine.low %v4509_v54, %v4516_v24  ;;  %v1480_v15 = vrot.slane %v11747_v11, %v8373_v47  ;;  %v1487_v42 = vrot.slane %v11747_v11, %v8376_v48  ;;  %v1494_v10 = vrot.slane %v11747_v11, %v8379_v50 }
  0xf9   :  { %11743 = vst [vmem:[#allocation13_spill] sm:$0xff] %v9016_v32  ;;  %11744 = vst [vmem:[#allocation14_spill] sm:$0xff] %v9018_v34  ;;  %v1501_v13 = vrot.slane %v11747_v11, %v8382_v51  ;;  %v9035_v37 = vcombine.low %v1424_v53, %v1431_v60  ;;  %v9037_v27 = vcombine.low %v1438_v0, %v1445_v31  ;;  %v528_v32 = vsel %vm149_vm0, %v146_v58, 0.0  ;;  %v11752_v53 = vld [vmem:[#allocation17_spill] sm:$0xff]  ;;  %v11757_v31 = vld [vmem:[#allocation20_spill] sm:$0xff] }
  0xfa   :  { %11745 = vst [vmem:[#allocation15_spill] sm:$0xff] %v9020_v4  ;;  %11746 = vst [vmem:[#allocation44_spill] sm:$0xff] %v9025_v16  ;;  %v9039_v28 = vcombine.low %v1354_v26, %v1361_v63  ;;  %v4543_v54 = vrot.slane %v8834_v40, %v8441_v18  ;;  %v9043_v24 = vcombine.low %v1396_v39, %v1403_v45  ;;  %v11758_v11 = vld [vmem:[#allocation21_spill] sm:$0xff]  ;;  %vm7470_vm0 = vcmask 1041409  }
  0xfb   :  { %v9045_v23 = vcombine.low %v1410_v30, %v1417_v43  ;;  %526 = vadd.xlane.f32.xlu1 %v525_v20  ;;  %523 = vadd.xlane.f32.xlu0 %v522_v12  ;;  %v9048_v4 = vcombine.low %v4373_v3, %v4380_v35  ;;  %v1452_v60 = vrot.slane %v11752_v53, %v8373_v47 }
  0xfc   :  { %11748 = vst [vmem:[#allocation16_spill] sm:$0xff] %v9039_v28  ;;  %11749 = vst [vmem:[#allocation45_spill] sm:$0xff] %v9043_v24  ;;  %v1459_v26 = vrot.slane %v11752_v53, %v8376_v48  ;;  %v9054_v63 = vpop.xlane.xlu1 %316  ;;  %v9056_v0 = vpop.xlane.xlu0 %313  ;;  %v4550_v40 = vrot.slane %v8836_v46, %v8441_v18  ;;  %v4390_v20 = vrot.slane %v8718_v41, %v8441_v18 }
  0xfd   :  { %11750 = vst [vmem:[#allocation46_spill] sm:$0xff] %v9045_v23  ;;  %11751 = vst [vmem:[#allocation47_spill] sm:$0xff] %v9048_v4  ;;  %v9062_v12 = vcombine.low %v1480_v15, %v1487_v42  ;;  %v9064_v58 = vcombine.low %v1494_v10, %v1501_v13  ;;  %v1466_v3 = vrot.slane %v11752_v53, %v8379_v50 }
  0xfe   :  { %11753 = vst [vmem:[#allocation17_spill] sm:$0xff] %v9054_v63  ;;  %11754 = vst [vmem:[#allocation48_spill] sm:$0xff] %v9056_v0  ;;  %v1473_v35 = vrot.slane %v11752_v53, %v8382_v51  ;;  %v1536_v39 = vrot.slane %v11757_v31, %v8373_v47  ;;  %v1543_v45 = vrot.slane %v11757_v31, %v8376_v48 }
  0xff   :  { %11755 = vst [vmem:[#allocation49_spill] sm:$0xff] %v9062_v12  ;;  %11756 = vst [vmem:[#allocation50_spill] sm:$0xff] %v9064_v58  ;;  %v4397_v46 = vrot.slane %v8729_v2, %v8441_v18  ;;  %v4577_v41 = vrot.slane %v8868_v22, %v8441_v18  ;;  %v1550_v30 = vrot.slane %v11757_v31, %v8379_v50  ;;  %532 = vadd.xlane.f32.xlu1 %v531_v8 }
 0x100   :  { %v1557_v43 = vrot.slane %v11757_v31, %v8382_v51  ;;  %v1508_v15 = vrot.slane %v11758_v11, %v8373_v47  ;;  %529 = vadd.xlane.f32.xlu0 %v528_v32  ;;  %v1515_v42 = vrot.slane %v11758_v11, %v8376_v48  ;;  %v1522_v2 = vrot.slane %v11758_v11, %v8379_v50  ;;  %v9090_v10 = vpop.xlane.xlu1 %322  ;;  %v9092_v13 = vpop.xlane.xlu0 %319  ;;  %v11761_v31 = vld [vmem:[#allocation23_spill] sm:$0xff] }
 0x101   :  { %v1529_v22 = vrot.slane %v11758_v11, %v8382_v51  ;;  %11759 = vst [vmem:[#allocation20_spill] sm:$0xff] %v9090_v10  ;;  %11760 = vst [vmem:[#allocation21_spill] sm:$0xff] %v9092_v13  ;;  %v4584_v53 = vrot.slane %v8870_v52, %v8441_v18  ;;  %v1592_v8 = vrot.slane %v11761_v31, %v8373_v47  ;;  %v11762_v11 = vld [vmem:[#allocation24_spill] sm:$0xff] }
 0x102   :  { %v1599_v32 = vrot.slane %v11761_v31, %v8376_v48  ;;  %v1606_v23 = vrot.slane %v11761_v31, %v8379_v50  ;;  %v1613_v24 = vrot.slane %v11761_v31, %v8382_v51  ;;  %v1564_v28 = vrot.slane %v11762_v11, %v8373_v47 }
 0x103   :  { %v1571_v13 = vrot.slane %v11762_v11, %v8376_v48  ;;  %v1578_v52 = vrot.slane %v11762_v11, %v8379_v50  ;;  %v1585_v10 = vrot.slane %v11762_v11, %v8382_v51  ;;  %v9112_v0 = vcombine.low %v1536_v39, %v1543_v45 }
 0x104   :  { %v9114_v63 = vcombine.low %v1452_v60, %v1459_v26  ;;  %v9116_v4 = vcombine.low %v1466_v3, %v1473_v35  ;;  %v9118_v58 = vcombine.low %v4543_v54, %v4550_v40  ;;  %v9120_v31 = vcombine.low %v1550_v30, %v1557_v43  ;;  %v9126_v12 = vpop.xlane.xlu1 %328  ;;  %v9128_v38 = vpop.xlane.xlu0 %325 }
 0x105   :  { %v9122_v34 = vcombine.low %v1508_v15, %v1515_v42  ;;  %v9124_v17 = vcombine.low %v1522_v2, %v1529_v22  ;;  %v9130_v16 = vcombine.low %v4390_v20, %v4397_v46  ;;  %v9132_v39 = vcombine.low %v1592_v8, %v1599_v32  ;;  %v11775_v32 = vld [vmem:[#allocation29_spill] sm:$0xff] }
 0x106   :  { %11763 = vst [vmem:[#allocation23_spill] sm:$0xff] %v9114_v63  ;;  %11764 = vst [vmem:[#allocation24_spill] sm:$0xff] %v9116_v4  ;;  %v1648_v60 = vrot.slane %v8649_v56, %v8373_v47  ;;  %v1655_v54 = vrot.slane %v8649_v56, %v8376_v48  ;;  %v4424_v26 = vrot.slane %v8746_v36, %v8441_v18 }
 0x107   :  { %11765 = vst [vmem:[#allocation51_spill] sm:$0xff] %v9122_v34  ;;  %11766 = vst [vmem:[#allocation52_spill] sm:$0xff] %v9124_v17  ;;  %v9140_v40 = vcombine.low %v1606_v23, %v1613_v24  ;;  %v9142_v3 = vcombine.low %v1564_v28, %v1571_v13  ;;  %v9144_v35 = vcombine.low %v1578_v52, %v1585_v10  ;;  %v11774_v10 = vld [vmem:[#allocation27_spill] sm:$0xff] }
 0x108   :  { %11767 = vst [vmem:[#allocation53_spill] sm:$0xff] %v9132_v39  ;;  %v9146_v45 = vcombine.low %v4577_v41, %v4584_v53  ;;  %v1662_v20 = vrot.slane %v8649_v56, %v8379_v50  ;;  %v1669_v46 = vrot.slane %v8649_v56, %v8382_v51  ;;  %v4431_v30 = vrot.slane %v8748_v57, %v8441_v18  ;;  %v9164_v43 = vpop.xlane.xlu1 %334  ;;  %v9166_v56 = vpop.xlane.xlu0 %331 }
 0x109   :  { %11768 = vst [vmem:[#allocation54_spill] sm:$0xff] %v9140_v40  ;;  %11769 = vst [vmem:[#allocation55_spill] sm:$0xff] %v9142_v3  ;;  %v4611_v36 = vrot.slane %v8933_v25, %v8441_v18  ;;  %v1620_v28 = vrot.slane %v8651_v59, %v8373_v47  ;;  %v1627_v24 = vrot.slane %v8651_v59, %v8376_v48 }
 0x10a   :  { %11770 = vst [vmem:[#allocation56_spill] sm:$0xff] %v9144_v35  ;;  %v1634_v23 = vrot.slane %v8651_v59, %v8379_v50  ;;  %v1641_v41 = vrot.slane %v8651_v59, %v8382_v51  ;;  %11771 = vst [vmem:[#allocation57_spill] sm:$0xff] %v9164_v43  ;;  %v9168_v57 = vcombine.low %v1648_v60, %v1655_v54 }
 0x10b   :  { %11772 = vst [vmem:[#allocation58_spill] sm:$0xff] %v9166_v56  ;;  %v1704_v25 = vrot.slane %v8691_v49, %v8373_v47  ;;  %v4618_v15 = vrot.slane %v8935_v9, %v8441_v18  ;;  %v4458_v42 = vrot.slane %v8750_v62, %v8441_v18  ;;  %v1711_v2 = vrot.slane %v8691_v49, %v8376_v48 }
 0x10c   :  { %11773 = vst [vmem:[#allocation59_spill] sm:$0xff] %v9168_v57  ;;  %v1718_v59 = vrot.slane %v8691_v49, %v8379_v50  ;;  %v1725_v22 = vrot.slane %v8691_v49, %v8382_v51  ;;  %v1676_v13 = vrot.slane %v11774_v10, %v8373_v47  ;;  %v1683_v53 = vrot.slane %v11774_v10, %v8376_v48  ;;  %v9200_v54 = vpop.xlane.xlu1 %340  ;;  %v9202_v35 = vpop.xlane.xlu0 %337 }
 0x10d   :  { %v1690_v9 = vrot.slane %v11774_v10, %v8379_v50  ;;  %v1697_v62 = vrot.slane %v11774_v10, %v8382_v51  ;;  %v4465_v8 = vrot.slane %v8752_v7, %v8441_v18  ;;  %v1760_v11 = vrot.slane %v11775_v32, %v8373_v47  ;;  %11776 = vst [vmem:[#allocation27_spill] sm:$0xff] %v9200_v54  ;;  %v11778_v10 = vld [vmem:[#allocation30_spill] sm:$0xff] }
 0x10e   :  { %v1767_v49 = vrot.slane %v11775_v32, %v8376_v48  ;;  %v1774_v52 = vrot.slane %v11775_v32, %v8379_v50  ;;  %v1781_v60 = vrot.slane %v11775_v32, %v8382_v51  ;;  %11777 = vst [vmem:[#allocation29_spill] sm:$0xff] %v9202_v35  ;;  %v1732_v3 = vrot.slane %v11778_v10, %v8373_v47 }
 0x10f   :  { %v1739_v7 = vrot.slane %v11778_v10, %v8376_v48  ;;  %v1746_v17 = vrot.slane %v11778_v10, %v8379_v50  ;;  %v1753_v34 = vrot.slane %v11778_v10, %v8382_v51  ;;  %v9212_v4 = vcombine.low %v1662_v20, %v1669_v46 }
 0x110   :  { %v9214_v63 = vcombine.low %v1620_v28, %v1627_v24  ;;  %v9216_v32 = vcombine.low %v1634_v23, %v1641_v41  ;;  %v9218_v57 = vcombine.low %v4424_v26, %v4431_v30  ;;  %v9220_v35 = vcombine.low %v1704_v25, %v1711_v2  ;;  %v9234_v46 = vpop.xlane.xlu1 %346  ;;  %v11785_v28 = vld [vmem:[#allocation26_spill] sm:$0xff]  ;;  %v9237_v26 = vpop.xlane.xlu0 %343  ;;  %v11788_v25 = vld [vmem:[#allocation33_spill] sm:$0xff] }
 0x111   :  { %v9222_v54 = vcombine.low %v1718_v59, %v1725_v22  ;;  %v9224_v56 = vcombine.low %v1676_v13, %v1683_v53  ;;  %v9226_v43 = vcombine.low %v4611_v36, %v4618_v15  ;;  %v9228_v40 = vcombine.low %v1760_v11, %v1767_v49  ;;  %6426 = vperm.xlu1 %7891, %v11785_v28   ;;  %v11791_v13 = vld [vmem:[#allocation36_spill] sm:$0xff]  ;;  %v11792_v11 = vld [vmem:[#allocation25_spill] sm:$0xff] }
 0x112   :  { %11779 = vst [vmem:[#allocation30_spill] sm:$0xff] %v9214_v63  ;;  %11780 = vst [vmem:[#allocation60_spill] sm:$0xff] %v9216_v32  ;;  %v9230_v39 = vcombine.low %v1774_v52, %v1781_v60  ;;  %v9232_v20 = vcombine.low %v1690_v9, %v1697_v62  ;;  %v4645_v30 = vrot.slane %v8948_v55, %v8441_v18  ;;  %v11793_v52 = vld [vmem:[#allocation39_spill] sm:$0xff]  ;;  %v11794_v28 = vld [vmem:[#allocation37_spill] sm:$0xff] }
 0x113   :  { %11781 = vst [vmem:[#allocation61_spill] sm:$0xff] %v9224_v56  ;;  %11782 = vst [vmem:[#allocation62_spill] sm:$0xff] %v9228_v40  ;;  %v9241_v24 = vcombine.low %v1732_v3, %v1739_v7  ;;  %v9243_v23 = vcombine.low %v1746_v17, %v1753_v34  ;;  %v9245_v36 = vcombine.low %v4458_v42, %v4465_v8  ;;  %v11789_v34 = vld [vmem:[#allocation34_spill] sm:$0xff]  ;;  %v11790_v42 = vld [vmem:[#allocation35_spill] sm:$0xff] }
 0x114   :  { %11783 = vst [vmem:[#allocation63_spill] sm:$0xff] %v9230_v39  ;;  %11784 = vst [vmem:[#allocation64_spill] sm:$0xff] %v9232_v20  ;;  %v4652_v41 = vrot.slane %v8950_v29, %v8441_v18  ;;  %v1816_v15 = vrot.slane %v11788_v25, %v8373_v47  ;;  %v1823_v2 = vrot.slane %v11788_v25, %v8376_v48  ;;  %v9271_v8 = vpop.xlane.xlu1 %352  ;;  %v9274_v49 = vpop.xlane.xlu0 %349 }
 0x115   :  { %11786 = vst [vmem:[#allocation26_spill] sm:$0xff] %v9241_v24  ;;  %11787 = vst [vmem:[#allocation65_spill] sm:$0xff] %v9243_v23  ;;  %v1830_v59 = vrot.slane %v11788_v25, %v8379_v50  ;;  %v1837_v55 = vrot.slane %v11788_v25, %v8382_v51  ;;  %v1788_v17 = vrot.slane %v11789_v34, %v8373_v47  ;;  %6429 = vperm.xlu1 %7891, %v11792_v11  }
 0x116   :  { %v1795_v3 = vrot.slane %v11789_v34, %v8376_v48  ;;  %v1802_v29 = vrot.slane %v11789_v34, %v8379_v50  ;;  %v4492_v22 = vrot.slane %v11790_v42, %v8441_v18  ;;  %v1872_v53 = vrot.slane %v11791_v13, %v8373_v47  ;;  %v11795_v42 = vld [vmem:[#allocation28_spill] sm:$0xff] }
 0x117   :  { %v1879_v9 = vrot.slane %v11791_v13, %v8376_v48  ;;  %v1809_v62 = vrot.slane %v11789_v34, %v8382_v51  ;;  %v4499_v60 = vrot.slane %v11793_v52, %v8441_v18  ;;  %v1886_v10 = vrot.slane %v11791_v13, %v8379_v50  ;;  %6423 = vperm.xlu0 %7890, %v11795_v42  }
 0x118   :  { %v1893_v7 = vrot.slane %v11791_v13, %v8382_v51  ;;  %v1844_v25 = vrot.slane %v11794_v28, %v8373_v47  ;;  %v1851_v34 = vrot.slane %v11794_v28, %v8376_v48  ;;  %v9287_v11 = vcombine.low %v1816_v15, %v1823_v2  ;;  %v11799_v13 = vld [vmem:[#allocation19_spill] sm:$0xff] }
 0x119   :  { %v9289_v23 = vcombine.low %v1830_v59, %v1837_v55  ;;  %v1858_v52 = vrot.slane %v11794_v28, %v8379_v50  ;;  %v1865_v24 = vrot.slane %v11794_v28, %v8382_v51  ;;  %v9295_v20 = vcombine.low %v1788_v17, %v1795_v3  ;;  %v9309_v55 = vpop.xlane.xlu1 %358  ;;  %v11802_v17 = vld [vmem:[#allocation31_spill] sm:$0xff]  ;;  %v9312_v3 = vpop.xlane.xlu0 %355 }
 0x11a   :  { %11796 = vst [vmem:[#allocation33_spill] sm:$0xff] %v9287_v11  ;;  %v1928_v56 = vrot.slane %v11799_v13, %v8373_v47  ;;  %v1935_v32 = vrot.slane %v11799_v13, %v8376_v48  ;;  %v9301_v63 = vcombine.low %v4645_v30, %v4652_v41  ;;  %v9303_v15 = vcombine.low %v1802_v29, %v1809_v62  ;;  %v11807_v29 = vld [vmem:[#allocation32_spill] sm:$0xff] }
 0x11b   :  { %11797 = vst [vmem:[#allocation34_spill] sm:$0xff] %v9289_v23  ;;  %11798 = vst [vmem:[#allocation35_spill] sm:$0xff] %v9295_v20  ;;  %v1942_v2 = vrot.slane %v11799_v13, %v8379_v50  ;;  %v1949_v59 = vrot.slane %v11799_v13, %v8382_v51  ;;  %6432 = vperm.xlu1 %7891, %v11802_v17   ;;  %v4679_v28 = vrot.slane %v9012_v19, %v8441_v18  ;;  %v11810_v19 = vld [vmem:[#allocation40_spill] sm:$0xff] }
 0x11c   :  { %11800 = vst [vmem:[#allocation36_spill] sm:$0xff] %v9303_v15  ;;  %11801 = vst [vmem:[#allocation25_spill] sm:$0xff] %v9309_v55  ;;  %v9316_v42 = vcombine.low %v1872_v53, %v1879_v9  ;;  %v9318_v30 = vcombine.low %v1886_v10, %v1893_v7  ;;  %v9320_v41 = vcombine.low %v1844_v25, %v1851_v34  ;;  %6450 = vperm.xlu0 %7890, %v11807_v29   ;;  %v11809_v15 = vld [vmem:[#allocation6_spill] sm:$0xff]  ;;  %v11813_v7 = vld [vmem:[#allocation8_spill] sm:$0xff] }
 0x11d   :  { %11803 = vst [vmem:[#allocation39_spill] sm:$0xff] %v9312_v3  ;;  %v9323_v62 = vcombine.low %v4492_v22, %v4499_v60  ;;  %v9325_v13 = vcombine.low %v1858_v52, %v1865_v24  ;;  %v1900_v17 = vrot.slane %v11809_v15, %v8373_v47  ;;  %v4686_v20 = vrot.slane %v9014_v5, %v8441_v18  ;;  %v9345_v5 = vpop.xlane.xlu1 %364  ;;  %v11815_v34 = vld [vmem:[#allocation38_spill] sm:$0xff] }
 0x11e   :  { %11804 = vst [vmem:[#allocation37_spill] sm:$0xff] %v9316_v42  ;;  %11805 = vst [vmem:[#allocation28_spill] sm:$0xff] %v9318_v30  ;;  %v4526_v53 = vrot.slane %v11810_v19, %v8441_v18  ;;  %v9333_v9 = vcombine.low %v1928_v56, %v1935_v32  ;;  %v1907_v10 = vrot.slane %v11809_v15, %v8376_v48  ;;  %v9348_v56 = vpop.xlane.xlu0 %361  ;;  %v11817_v32 = vld [vmem:[#allocation41_spill] sm:$0xff] }
 0x11f   :  { %11806 = vst [vmem:[#allocation19_spill] sm:$0xff] %v9320_v41  ;;  %11808 = vst [vmem:[#allocation31_spill] sm:$0xff] %v9325_v13  ;;  %v1914_v22 = vrot.slane %v11809_v15, %v8379_v50  ;;  %v1921_v24 = vrot.slane %v11809_v15, %v8382_v51  ;;  %v9341_v60 = vcombine.low %v1942_v2, %v1949_v59  ;;  %6435 = vperm.xlu1 %7891, %v11815_v34   ;;  %v11818_v19 = vld [vmem:[#allocation9_spill] sm:$0xff]  ;;  %v11819_v13 = vld [vmem:[#allocation18_spill] sm:$0xff] }
 0x120   :  { %11811 = vst [vmem:[#allocation32_spill] sm:$0xff] %v9333_v9  ;;  %v1984_v25 = vrot.slane %v11813_v7, %v8373_v47  ;;  %11814 = vst [vmem:[#allocation40_spill] sm:$0xff] %v9345_v5  ;;  %v4533_v52 = vrot.slane %v11817_v32, %v8441_v18  ;;  %v4713_v29 = vrot.slane %v9035_v37, %v8441_v18  ;;  %6456 = vperm.xlu0 %7890, %v11819_v13  }
 0x121   :  { %11812 = vst [vmem:[#allocation6_spill] sm:$0xff] %v9341_v60  ;;  %11816 = vst [vmem:[#allocation8_spill] sm:$0xff] %v9348_v56  ;;  %v1991_v15 = vrot.slane %v11813_v7, %v8376_v48  ;;  %v1998_v2 = vrot.slane %v11813_v7, %v8379_v50  ;;  %v2005_v59 = vrot.slane %v11813_v7, %v8382_v51  ;;  %v9387_v23 = vpop.xlane.xlu1 %370 }
 0x122   :  { %v1956_v34 = vrot.slane %v11818_v19, %v8373_v47  ;;  %v1963_v32 = vrot.slane %v11818_v19, %v8376_v48  ;;  %v1970_v37 = vrot.slane %v11818_v19, %v8379_v50  ;;  %v1977_v41 = vrot.slane %v11818_v19, %v8382_v51  ;;  %11820 = vst [vmem:[#allocation38_spill] sm:$0xff] %v9387_v23  ;;  %v9390_v11 = vpop.xlane.xlu0 %367 }
 0x123   :  { %v4720_v60 = vrot.slane %v9037_v27, %v8441_v18  ;;  %v2040_v7 = vrot.slane %v8939_v14, %v8373_v47  ;;  %v2047_v9 = vrot.slane %v8939_v14, %v8376_v48  ;;  %v2054_v13 = vrot.slane %v8939_v14, %v8379_v50  ;;  %6438 = vperm.xlu1 %7891, %v8931_v33  }
 0x124   :  { %v2061_v30 = vrot.slane %v8939_v14, %v8382_v51  ;;  %v2012_v42 = vrot.slane %v8941_v61, %v8373_v47  ;;  %v2019_v19 = vrot.slane %v8941_v61, %v8376_v48  ;;  %v2026_v27 = vrot.slane %v8941_v61, %v8379_v50  ;;  %6462 = vperm.xlu0 %7890, %v8946_v44  }
 0x125   :  { %v2033_v56 = vrot.slane %v8941_v61, %v8382_v51  ;;  %v9392_v5 = vcombine.low %v1984_v25, %v1991_v15  ;;  %v9394_v14 = vcombine.low %v1900_v17, %v1907_v10  ;;  %v9396_v3 = vcombine.low %v1914_v22, %v1921_v24 }
 0x126   :  { %v9399_v39 = vcombine.low %v4679_v28, %v4686_v20  ;;  %v9401_v40 = vcombine.low %v1998_v2, %v2005_v59  ;;  %v9403_v55 = vcombine.low %v1956_v34, %v1963_v32  ;;  %v9405_v61 = vcombine.low %v1970_v37, %v1977_v41  ;;  %v9423_v41 = vpop.xlane.xlu1 %376  ;;  %v11834_v59 = vld [vmem:[#allocation14_spill] sm:$0xff] }
 0x127   :  { %11821 = vst [vmem:[#allocation41_spill] sm:$0xff] %v9394_v14  ;;  %11822 = vst [vmem:[#allocation9_spill] sm:$0xff] %v9396_v3  ;;  %v9407_v23 = vcombine.low %v4526_v53, %v4533_v52  ;;  %v9409_v33 = vcombine.low %v2040_v7, %v2047_v9  ;;  %v2096_v17 = vrot.slane %v8981_v21, %v8373_v47  ;;  %6441 = vperm.xlu1 %7891, %v8960_v6   ;;  %v9426_v53 = vpop.xlane.xlu0 %373  ;;  %v11832_v6 = vld [vmem:[#allocation12_spill] sm:$0xff]  ;;  %v11835_v37 = vld [vmem:[#allocation50_spill] sm:$0xff] }
 0x128   :  { %11823 = vst [vmem:[#allocation18_spill] sm:$0xff] %v9403_v55  ;;  %11824 = vst [vmem:[#allocation66_spill] sm:$0xff] %v9405_v61  ;;  %v2103_v10 = vrot.slane %v8981_v21, %v8376_v48  ;;  %v4560_v44 = vrot.slane %v8924_v1, %v8441_v18  ;;  %v9417_v20 = vcombine.low %v2054_v13, %v2061_v30  ;;  %v11829_v30 = vld [vmem:[#allocation44_spill] sm:$0xff] }
 0x129   :  { %11825 = vst [vmem:[#allocation67_spill] sm:$0xff] %v9409_v33  ;;  %v9419_v28 = vcombine.low %v2012_v42, %v2019_v19  ;;  %v9421_v22 = vcombine.low %v2026_v27, %v2033_v56  ;;  %v9428_v9 = vcombine.low %v4713_v29, %v4720_v60  ;;  %v2110_v24 = vrot.slane %v8981_v21, %v8379_v50  ;;  %v11830_v42 = vld [vmem:[#allocation22_spill] sm:$0xff]  ;;  %v11831_v56 = vld [vmem:[#allocation49_spill] sm:$0xff]  ;;  %v11836_v27 = vld [vmem:[#allocation15_spill] sm:$0xff] }
 0x12a   :  { %11826 = vst [vmem:[#allocation68_spill] sm:$0xff] %v9417_v20  ;;  %v2117_v1 = vrot.slane %v8981_v21, %v8382_v51  ;;  %6468 = vperm.xlu0 %7890, %v11829_v30   ;;  %v4567_v25 = vrot.slane %v11830_v42, %v8441_v18  ;;  %v4747_v52 = vrot.slane %v11831_v56, %v8441_v18  ;;  %v11837_v42 = vld [vmem:[#allocation47_spill] sm:$0xff] }
 0x12b   :  { %11827 = vst [vmem:[#allocation69_spill] sm:$0xff] %v9419_v28  ;;  %11828 = vst [vmem:[#allocation70_spill] sm:$0xff] %v9421_v22  ;;  %v2068_v15 = vrot.slane %v11832_v6, %v8373_v47  ;;  %v2075_v60 = vrot.slane %v11832_v6, %v8376_v48  ;;  %v2082_v29 = vrot.slane %v11832_v6, %v8379_v50  ;;  %6444 = vperm.xlu1 %7891, %v11837_v42   ;;  %v9466_v56 = vpop.xlane.xlu0 %379  ;;  %v11839_v22 = vld [vmem:[#allocation17_spill] sm:$0xff] }
 0x12c   :  { %v2089_v21 = vrot.slane %v11832_v6, %v8382_v51  ;;  %v9447_v2 = vcombine.low %v2096_v17, %v2103_v10  ;;  %v2152_v34 = vrot.slane %v11834_v59, %v8373_v47  ;;  %v2159_v32 = vrot.slane %v11834_v59, %v8376_v48  ;;  %v9463_v10 = vpop.xlane.xlu1 %382 }
 0x12d   :  { %v4754_v7 = vrot.slane %v11835_v37, %v8441_v18  ;;  %v2166_v13 = vrot.slane %v11834_v59, %v8379_v50  ;;  %v2173_v19 = vrot.slane %v11834_v59, %v8382_v51  ;;  %v2124_v30 = vrot.slane %v11836_v27, %v8373_v47 }
 0x12e   :  { %11833 = vst [vmem:[#allocation44_spill] sm:$0xff] %v9447_v2  ;;  %v2131_v17 = vrot.slane %v11836_v27, %v8376_v48  ;;  %v9468_v6 = vcombine.low %v2110_v24, %v2117_v1  ;;  %v2138_v37 = vrot.slane %v11836_v27, %v8379_v50  ;;  %v2145_v59 = vrot.slane %v11836_v27, %v8382_v51 }
 0x12f   :  { %6474 = vperm.xlu0 %7890, %v9118_v58   ;;  %v9475_v2 = vcombine.low %v4560_v44, %v4567_v25  ;;  %v2208_v28 = vrot.slane %v11839_v22, %v8373_v47  ;;  %v2215_v42 = vrot.slane %v11839_v22, %v8376_v48  ;;  %v2222_v24 = vrot.slane %v11839_v22, %v8379_v50  ;;  %v11842_v58 = vld [vmem:[#allocation10_spill] sm:$0xff]  ;;  %v11843_v25 = vld [vmem:[#allocation11_spill] sm:$0xff] }
 0x130   :  { %11838 = vst [vmem:[#allocation22_spill] sm:$0xff] %v9468_v6  ;;  %v2229_v1 = vrot.slane %v11839_v22, %v8382_v51  ;;  %v9485_v6 = vcombine.low %v2068_v15, %v2075_v60  ;;  %v9487_v61 = vcombine.low %v2082_v29, %v2089_v21  ;;  %v4594_v44 = vrot.slane %v11842_v58, %v8441_v18  ;;  %v9499_v20 = vpop.xlane.xlu1 %388  ;;  %v9502_v22 = vpop.xlane.xlu0 %385  ;;  %v11849_v29 = vld [vmem:[#allocation48_spill] sm:$0xff] }
 0x131   :  { %v4601_v27 = vrot.slane %v11843_v25, %v8441_v18  ;;  %v9493_v55 = vcombine.low %v2152_v34, %v2159_v32  ;;  %v9495_v3 = vcombine.low %v2166_v13, %v2173_v19  ;;  %v9497_v14 = vcombine.low %v2124_v30, %v2131_v17  ;;  %11847 = vst [vmem:[#allocation47_spill] sm:$0xff] %v9499_v20  ;;  %v11852_v19 = vld [vmem:[#allocation20_spill] sm:$0xff] }
 0x132   :  { %11840 = vst [vmem:[#allocation49_spill] sm:$0xff] %v9485_v6  ;;  %11841 = vst [vmem:[#allocation12_spill] sm:$0xff] %v9487_v61  ;;  %6447 = vperm.xlu1 %7891, %v9130_v16   ;;  %v9504_v15 = vcombine.low %v4747_v52, %v4754_v7  ;;  %v9506_v60 = vcombine.low %v2138_v37, %v2145_v59  ;;  %v2180_v21 = vrot.slane %v11849_v29, %v8373_v47 }
 0x133   :  { %11844 = vst [vmem:[#allocation14_spill] sm:$0xff] %v9493_v55  ;;  %11845 = vst [vmem:[#allocation50_spill] sm:$0xff] %v9495_v3  ;;  %v2187_v34 = vrot.slane %v11849_v29, %v8376_v48  ;;  %6480 = vperm.xlu0 %7890, %v9146_v45   ;;  %v4781_v32 = vrot.slane %v9112_v0, %v8441_v18  ;;  %v9515_v13 = vcombine.low %v2208_v28, %v2215_v42  ;;  %v11853_v0 = vld [vmem:[#allocation42_spill] sm:$0xff] }
 0x134   :  { %11846 = vst [vmem:[#allocation15_spill] sm:$0xff] %v9497_v14  ;;  %11848 = vst [vmem:[#allocation17_spill] sm:$0xff] %v9506_v60  ;;  %v9517_v16 = vcombine.low %v2222_v24, %v2229_v1  ;;  %v2194_v52 = vrot.slane %v11849_v29, %v8379_v50  ;;  %v2201_v7 = vrot.slane %v11849_v29, %v8382_v51  ;;  %v11854_v24 = vld [vmem:[#allocation21_spill] sm:$0xff]  ;;  %v9539_v58 = vpop.xlane.xlu1 %394  ;;  %v11856_v29 = vld [vmem:[#allocation43_spill] sm:$0xff] }
 0x135   :  { %11850 = vst [vmem:[#allocation10_spill] sm:$0xff] %v9515_v13  ;;  %v2264_v30 = vrot.slane %v11852_v19, %v8373_v47  ;;  %v9525_v17 = vcombine.low %v4594_v44, %v4601_v27  ;;  %v4788_v45 = vrot.slane %v9120_v31, %v8441_v18  ;;  %v4628_v28 = vrot.slane %v11853_v0, %v8441_v18  ;;  %v9542_v31 = vpop.xlane.xlu0 %391  ;;  %v11858_v60 = vld [vmem:[#allocation54_spill] sm:$0xff] }
 0x136   :  { %11851 = vst [vmem:[#allocation11_spill] sm:$0xff] %v9517_v16  ;;  %v2271_v37 = vrot.slane %v11852_v19, %v8376_v48  ;;  %v2278_v59 = vrot.slane %v11852_v19, %v8379_v50  ;;  %v2285_v42 = vrot.slane %v11852_v19, %v8382_v51  ;;  %v2236_v1 = vrot.slane %v11854_v24, %v8373_v47 }
 0x137   :  { %6453 = vperm.xlu1 %7891, %v9218_v57   ;;  %11855 = vst [vmem:[#allocation48_spill] sm:$0xff] %v9542_v31  ;;  %v2243_v44 = vrot.slane %v11854_v24, %v8376_v48  ;;  %v2250_v25 = vrot.slane %v11854_v24, %v8379_v50  ;;  %v2257_v27 = vrot.slane %v11854_v24, %v8382_v51 }
 0x138   :  { %6486 = vperm.xlu0 %7890, %v9226_v43   ;;  %v4635_v19 = vrot.slane %v11856_v29, %v8441_v18  ;;  %v2320_v0 = vrot.slane %v9126_v12, %v8373_v47  ;;  %v2327_v57 = vrot.slane %v9126_v12, %v8376_v48  ;;  %v2334_v20 = vrot.slane %v9126_v12, %v8379_v50  ;;  %v11857_v29 = vld [vmem:[#allocation53_spill] sm:$0xff] }
 0x139   :  { %v2341_v16 = vrot.slane %v9126_v12, %v8382_v51  ;;  %v2292_v24 = vrot.slane %v9128_v38, %v8373_v47  ;;  %v2299_v43 = vrot.slane %v9128_v38, %v8376_v48  ;;  %v4815_v13 = vrot.slane %v11857_v29, %v8441_v18  ;;  %v9577_v12 = vpop.xlane.xlu1 %400  ;;  %v9580_v33 = vpop.xlane.xlu0 %397 }
 0x13a   :  { %v4822_v14 = vrot.slane %v11858_v60, %v8441_v18  ;;  %v9569_v3 = vcombine.low %v2264_v30, %v2271_v37  ;;  %v9571_v55 = vcombine.low %v2278_v59, %v2285_v42  ;;  %v9573_v61 = vcombine.low %v2180_v21, %v2187_v34  ;;  %v11868_v59 = vld [vmem:[#allocation13_spill] sm:$0xff] }
 0x13b   :  { %v9575_v6 = vcombine.low %v2194_v52, %v2201_v7  ;;  %6459 = vperm.xlu1 %7891, %v9245_v36   ;;  %v9582_v31 = vcombine.low %v2236_v1, %v2243_v44  ;;  %v9584_v29 = vcombine.low %v2250_v25, %v2257_v27  ;;  %v2306_v60 = vrot.slane %v9128_v38, %v8379_v50 }
 0x13c   :  { %11859 = vst [vmem:[#allocation20_spill] sm:$0xff] %v9569_v3  ;;  %11860 = vst [vmem:[#allocation42_spill] sm:$0xff] %v9571_v55  ;;  %6492 = vperm.xlu0 %7890, %v9301_v63   ;;  %v9589_v30 = vcombine.low %v4781_v32, %v4788_v45  ;;  %v9591_v21 = vcombine.low %v2320_v0, %v2327_v57  ;;  %v9593_v34 = vcombine.low %v2334_v20, %v2341_v16  ;;  %v11869_v63 = vld [vmem:[#allocation16_spill] sm:$0xff]  ;;  %v11870_v45 = vld [vmem:[#allocation57_spill] sm:$0xff] }
 0x13d   :  { %11861 = vst [vmem:[#allocation21_spill] sm:$0xff] %v9573_v61  ;;  %11862 = vst [vmem:[#allocation43_spill] sm:$0xff] %v9575_v6  ;;  %v2313_v36 = vrot.slane %v9128_v38, %v8382_v51  ;;  %v9597_v52 = vcombine.low %v4628_v28, %v4635_v19  ;;  %v9599_v7 = vcombine.low %v2292_v24, %v2299_v43  ;;  %v11871_v28 = vld [vmem:[#allocation58_spill] sm:$0xff]  ;;  %v11872_v0 = vld [vmem:[#allocation27_spill] sm:$0xff] }
 0x13e   :  { %11863 = vst [vmem:[#allocation53_spill] sm:$0xff] %v9582_v31  ;;  %11864 = vst [vmem:[#allocation54_spill] sm:$0xff] %v9584_v29  ;;  %v9601_v37 = vcombine.low %v4815_v13, %v4822_v14  ;;  %v4662_v42 = vrot.slane %v11868_v59, %v8441_v18  ;;  %v4669_v32 = vrot.slane %v11869_v63, %v8441_v18  ;;  %v9615_v14 = vpop.xlane.xlu1 %406  ;;  %v9618_v13 = vpop.xlane.xlu0 %403  ;;  %v11873_v24 = vld [vmem:[#allocation59_spill] sm:$0xff] }
 0x13f   :  { %11865 = vst [vmem:[#allocation71_spill] sm:$0xff] %v9591_v21  ;;  %11866 = vst [vmem:[#allocation72_spill] sm:$0xff] %v9593_v34  ;;  %v2376_v1 = vrot.slane %v11870_v45, %v8373_v47  ;;  %v2383_v20 = vrot.slane %v11870_v45, %v8376_v48  ;;  %v2390_v38 = vrot.slane %v11870_v45, %v8379_v50  ;;  %6465 = vperm.xlu1 %7891, %v9323_v62  }
 0x140   :  { %11867 = vst [vmem:[#allocation73_spill] sm:$0xff] %v9599_v7  ;;  %v2397_v16 = vrot.slane %v11870_v45, %v8382_v51  ;;  %v2348_v44 = vrot.slane %v11871_v28, %v8373_v47  ;;  %v2355_v25 = vrot.slane %v11871_v28, %v8376_v48  ;;  %v2362_v27 = vrot.slane %v11871_v28, %v8379_v50 }
 0x141   :  { %v2369_v19 = vrot.slane %v11871_v28, %v8382_v51  ;;  %6498 = vperm.xlu0 %7890, %v9399_v39   ;;  %v2432_v57 = vrot.slane %v11872_v0, %v8373_v47  ;;  %v2439_v62 = vrot.slane %v11872_v0, %v8376_v48  ;;  %v4849_v43 = vrot.slane %v11873_v24, %v8441_v18  ;;  %v11874_v39 = vld [vmem:[#allocation29_spill] sm:$0xff] }
 0x142   :  { %v4856_v59 = vrot.slane %v9212_v4, %v8441_v18  ;;  %v2446_v63 = vrot.slane %v11872_v0, %v8379_v50  ;;  %v2453_v45 = vrot.slane %v11872_v0, %v8382_v51  ;;  %v2404_v28 = vrot.slane %v11874_v39, %v8373_v47  ;;  %v9653_v29 = vpop.xlane.xlu1 %412  ;;  %v9656_v0 = vpop.xlane.xlu0 %409 }
 0x143   :  { %v2411_v7 = vrot.slane %v11874_v39, %v8376_v48  ;;  %v9645_v34 = vcombine.low %v2376_v1, %v2383_v20  ;;  %v9647_v21 = vcombine.low %v2306_v60, %v2313_v36  ;;  %v2418_v24 = vrot.slane %v11874_v39, %v8379_v50  ;;  %6471 = vperm.xlu1 %7891, %v9407_v23  }
 0x144   :  { %v2425_v4 = vrot.slane %v11874_v39, %v8382_v51  ;;  %v9658_v31 = vcombine.low %v2390_v38, %v2397_v16  ;;  %v9660_v55 = vcombine.low %v2348_v44, %v2355_v25  ;;  %v9662_v1 = vcombine.low %v2362_v27, %v2369_v19  ;;  %v11881_v39 = vld [vmem:[#allocation45_spill] sm:$0xff] }
 0x145   :  { %11875 = vst [vmem:[#allocation13_spill] sm:$0xff] %v9645_v34  ;;  %11876 = vst [vmem:[#allocation16_spill] sm:$0xff] %v9647_v21  ;;  %6504 = vperm.xlu0 %7890, %v9428_v9   ;;  %v9665_v60 = vcombine.low %v4662_v42, %v4669_v32  ;;  %v9667_v36 = vcombine.low %v2432_v57, %v2439_v62  ;;  %v2488_v20 = vrot.slane %v9234_v46, %v8373_v47  ;;  %v11884_v9 = vld [vmem:[#allocation46_spill] sm:$0xff] }
 0x146   :  { %11877 = vst [vmem:[#allocation57_spill] sm:$0xff] %v9658_v31  ;;  %11878 = vst [vmem:[#allocation58_spill] sm:$0xff] %v9660_v55  ;;  %v2495_v23 = vrot.slane %v9234_v46, %v8376_v48  ;;  %v4696_v38 = vrot.slane %v11881_v39, %v8441_v18  ;;  %v9675_v16 = vcombine.low %v2446_v63, %v2453_v45  ;;  %v9687_v19 = vpop.xlane.xlu1 %418  ;;  %v9690_v57 = vpop.xlane.xlu0 %415 }
 0x147   :  { %11879 = vst [vmem:[#allocation27_spill] sm:$0xff] %v9662_v1  ;;  %11880 = vst [vmem:[#allocation59_spill] sm:$0xff] %v9667_v36  ;;  %v9677_v44 = vcombine.low %v2404_v28, %v2411_v7  ;;  %v9679_v25 = vcombine.low %v4849_v43, %v4856_v59  ;;  %v4703_v42 = vrot.slane %v11884_v9, %v8441_v18  ;;  %6477 = vperm.xlu1 %7891, %v9475_v2   ;;  %v11891_v1 = vld [vmem:[#allocation25_spill] sm:$0xff] }
 0x148   :  { %11882 = vst [vmem:[#allocation29_spill] sm:$0xff] %v9675_v16  ;;  %v2502_v32 = vrot.slane %v9234_v46, %v8379_v50  ;;  %v9685_v27 = vcombine.low %v2418_v24, %v2425_v4  ;;  %v4883_v7 = vrot.slane %v9220_v35, %v8441_v18  ;;  %v4890_v62 = vrot.slane %v9222_v54, %v8441_v18  ;;  %v11886_v54 = vld [vmem:[#allocation23_spill] sm:$0xff] }
 0x149   :  { %11883 = vst [vmem:[#allocation45_spill] sm:$0xff] %v9677_v44  ;;  %v2509_v43 = vrot.slane %v9234_v46, %v8382_v51  ;;  %v2460_v59 = vrot.slane %v9237_v26, %v8373_v47  ;;  %v2467_v63 = vrot.slane %v9237_v26, %v8376_v48  ;;  %v2474_v2 = vrot.slane %v9237_v26, %v8379_v50  ;;  %v11887_v46 = vld [vmem:[#allocation24_spill] sm:$0xff] }
 0x14a   :  { %11885 = vst [vmem:[#allocation46_spill] sm:$0xff] %v9685_v27  ;;  %6510 = vperm.xlu0 %7890, %v9504_v15   ;;  %v9705_v45 = vcombine.low %v2488_v20, %v2495_v23  ;;  %v2481_v35 = vrot.slane %v9237_v26, %v8382_v51  ;;  %v4730_v28 = vrot.slane %v11886_v54, %v8441_v18  ;;  %v9732_v27 = vpop.xlane.xlu0 %421 }
 0x14b   :  { %v4737_v24 = vrot.slane %v11887_v46, %v8441_v18  ;;  %v2544_v4 = vrot.slane %v9271_v8, %v8373_v47  ;;  %v2551_v39 = vrot.slane %v9271_v8, %v8376_v48  ;;  %v2558_v15 = vrot.slane %v9271_v8, %v8379_v50  ;;  %v9729_v46 = vpop.xlane.xlu1 %424  ;;  %6483 = vperm.xlu1 %7891, %v9525_v17  }
 0x14c   :  { %v2565_v20 = vrot.slane %v9271_v8, %v8382_v51  ;;  %v2516_v26 = vrot.slane %v9274_v49, %v8373_v47  ;;  %v2523_v23 = vrot.slane %v9274_v49, %v8376_v48  ;;  %v2530_v9 = vrot.slane %v9274_v49, %v8379_v50  ;;  %11888 = vst [vmem:[#allocation23_spill] sm:$0xff] %v9729_v46 }
 0x14d   :  { %v2537_v54 = vrot.slane %v9274_v49, %v8382_v51  ;;  %11889 = vst [vmem:[#allocation24_spill] sm:$0xff] %v9732_v27  ;;  %v9734_v44 = vcombine.low %v2502_v32, %v2509_v43  ;;  %v9736_v8 = vcombine.low %v2460_v59, %v2467_v63  ;;  %v4704_v16 = vcombine.low %v4696_v38, %v4703_v42 }
 0x14e   :  { %6516 = vperm.xlu0 %7890, %v9589_v30   ;;  %v4891_v36 = vcombine.low %v4883_v7, %v4890_v62  ;;  %v2600_v55 = vrot.slane %v11891_v1, %v8373_v47  ;;  %v2607_v49 = vrot.slane %v11891_v1, %v8376_v48  ;;  %v2614_v31 = vrot.slane %v11891_v1, %v8379_v50  ;;  %v9762_v62 = vpop.xlane.xlu0 %427 }
 0x14f   :  { %11890 = vst [vmem:[#allocation74_spill] sm:$0xff] %v9736_v8  ;;  %v2621_v17 = vrot.slane %v11891_v1, %v8382_v51  ;;  %v9747_v32 = vcombine.low %v2544_v4, %v2551_v39  ;;  %v9749_v43 = vcombine.low %v2558_v15, %v2565_v20  ;;  %v9751_v59 = vcombine.low %v2474_v2, %v2481_v35  ;;  %v9759_v7 = vpop.xlane.xlu1 %430  ;;  %v11898_v1 = vld [vmem:[#allocation62_spill] sm:$0xff]  ;;  %v11899_v4 = vld [vmem:[#allocation63_spill] sm:$0xff] }
 0x150   :  { %v9753_v30 = vcombine.low %v4730_v28, %v4737_v24  ;;  %v9755_v38 = vcombine.low %v2516_v26, %v2523_v23  ;;  %v9757_v42 = vcombine.low %v2530_v9, %v2537_v54  ;;  %11896 = vst [vmem:[#allocation78_spill] sm:$0xff] %v9759_v7  ;;  %6489 = vperm.xlu1 %7891, %v9597_v52   ;;  %11897 = vst [vmem:[#allocation79_spill] sm:$0xff] %v9762_v62  ;;  %v11900_v2 = vld [vmem:[#allocation39_spill] sm:$0xff]  ;;  %v11904_v9 = vld [vmem:[#allocation52_spill] sm:$0xff] }
 0x151   :  { %11892 = vst [vmem:[#allocation25_spill] sm:$0xff] %v9747_v32  ;;  %11893 = vst [vmem:[#allocation75_spill] sm:$0xff] %v9749_v43  ;;  %v4917_v63 = vrot.slane %v11898_v1, %v8441_v18  ;;  %v4924_v39 = vrot.slane %v11899_v4, %v8441_v18  ;;  %v2572_v35 = vrot.slane %v11900_v2, %v8373_v47  ;;  %v11901_v52 = vld [vmem:[#allocation51_spill] sm:$0xff]  ;;  %v11905_v1 = vld [vmem:[#allocation40_spill] sm:$0xff] }
 0x152   :  { %11894 = vst [vmem:[#allocation76_spill] sm:$0xff] %v9751_v59  ;;  %11895 = vst [vmem:[#allocation77_spill] sm:$0xff] %v9757_v42  ;;  %v2579_v28 = vrot.slane %v11900_v2, %v8376_v48  ;;  %v2586_v24 = vrot.slane %v11900_v2, %v8379_v50  ;;  %6522 = vperm.xlu0 %7890, %v9601_v37   ;;  %v4764_v15 = vrot.slane %v11901_v52, %v8441_v18  ;;  %v11906_v37 = vld [vmem:[#allocation33_spill] sm:$0xff] }
 0x153   :  { %v9777_v20 = vcombine.low %v2600_v55, %v2607_v49  ;;  %v9779_v26 = vcombine.low %v2614_v31, %v2621_v17  ;;  %v2593_v23 = vrot.slane %v11900_v2, %v8382_v51  ;;  %v4771_v54 = vrot.slane %v11904_v9, %v8441_v18  ;;  %v11907_v55 = vld [vmem:[#allocation34_spill] sm:$0xff]  ;;  %v11908_v2 = vld [vmem:[#allocation8_spill] sm:$0xff]  ;;  %v9801_v3 = vpop.xlane.xlu1 %436 }
 0x154   :  { %v2656_v4 = vrot.slane %v11905_v1, %v8373_v47  ;;  %v2663_v34 = vrot.slane %v11905_v1, %v8376_v48  ;;  %v4951_v21 = vrot.slane %v11906_v37, %v8441_v18  ;;  %v4958_v49 = vrot.slane %v11907_v55, %v8441_v18  ;;  %11909 = vst [vmem:[#allocation39_spill] sm:$0xff] %v9801_v3  ;;  %v9804_v37 = vpop.xlane.xlu0 %433  ;;  %v11913_v3 = vld [vmem:[#allocation38_spill] sm:$0xff] }
 0x155   :  { %11902 = vst [vmem:[#allocation62_spill] sm:$0xff] %v9777_v20  ;;  %11903 = vst [vmem:[#allocation63_spill] sm:$0xff] %v9779_v26  ;;  %v2670_v31 = vrot.slane %v11905_v1, %v8379_v50  ;;  %v2677_v17 = vrot.slane %v11905_v1, %v8382_v51  ;;  %v2628_v52 = vrot.slane %v11908_v2, %v8373_v47  ;;  %6495 = vperm.xlu1 %7891, %v9665_v60   ;;  %v11911_v1 = vld [vmem:[#allocation55_spill] sm:$0xff]  ;;  %v11912_v26 = vld [vmem:[#allocation56_spill] sm:$0xff] }
 0x156   :  { %v2635_v9 = vrot.slane %v11908_v2, %v8376_v48  ;;  %11910 = vst [vmem:[#allocation51_spill] sm:$0xff] %v9804_v37  ;;  %v2642_v55 = vrot.slane %v11908_v2, %v8379_v50  ;;  %v2649_v6 = vrot.slane %v11908_v2, %v8382_v51  ;;  %6528 = vperm.xlu0 %7890, %v9679_v25  }
 0x157   :  { %v4798_v61 = vrot.slane %v11911_v1, %v8441_v18  ;;  %v4805_v20 = vrot.slane %v11912_v26, %v8441_v18  ;;  %v2712_v43 = vrot.slane %v11913_v3, %v8373_v47  ;;  %v2719_v60 = vrot.slane %v11913_v3, %v8376_v48  ;;  %v9833_v27 = vpop.xlane.xlu1 %442 }
 0x158   :  { %v2726_v37 = vrot.slane %v11913_v3, %v8379_v50  ;;  %v2733_v2 = vrot.slane %v11913_v3, %v8382_v51  ;;  %v9823_v32 = vcombine.low %v2656_v4, %v2663_v34  ;;  %v9825_v25 = vcombine.low %v2572_v35, %v2579_v28  ;;  %v9835_v46 = vpop.xlane.xlu0 %439  ;;  %v11920_v28 = vld [vmem:[#allocation37_spill] sm:$0xff] }
 0x159   :  { %v9827_v1 = vcombine.low %v2586_v24, %v2593_v23  ;;  %v4925_v62 = vcombine.low %v4917_v63, %v4924_v39  ;;  %v9829_v26 = vcombine.low %v2670_v31, %v2677_v17  ;;  %v9831_v7 = vcombine.low %v2628_v52, %v2635_v9  ;;  %6501 = vperm.xlu1 %7891, %v4704_v16  }
 0x15a   :  { %11914 = vst [vmem:[#allocation52_spill] sm:$0xff] %v9823_v32  ;;  %v4772_v59 = vcombine.low %v4764_v15, %v4771_v54  ;;  %v4959_v8 = vcombine.low %v4951_v21, %v4958_v49  ;;  %v9837_v42 = vcombine.low %v2642_v55, %v2649_v6  ;;  %v2684_v3 = vrot.slane %v9390_v11, %v8373_v47  ;;  %v11921_v15 = vld [vmem:[#allocation28_spill] sm:$0xff]  ;;  %v11922_v54 = vld [vmem:[#allocation30_spill] sm:$0xff] }
 0x15b   :  { %11915 = vst [vmem:[#allocation40_spill] sm:$0xff] %v9829_v26  ;;  %11916 = vst [vmem:[#allocation33_spill] sm:$0xff] %v9831_v7  ;;  %v2691_v34 = vrot.slane %v9390_v11, %v8376_v48  ;;  %v2698_v63 = vrot.slane %v9390_v11, %v8379_v50  ;;  %6534 = vperm.xlu0 %7890, %v4891_v36   ;;  %v9845_v39 = vcombine.low %v2712_v43, %v2719_v60 }
 0x15c   :  { %11917 = vst [vmem:[#allocation34_spill] sm:$0xff] %v9837_v42  ;;  %v9847_v35 = vcombine.low %v2726_v37, %v2733_v2  ;;  %v2705_v16 = vrot.slane %v9390_v11, %v8382_v51  ;;  %v4806_v21 = vcombine.low %v4798_v61, %v4805_v20  ;;  %v2768_v6 = vrot.slane %v9423_v41, %v8373_v47  ;;  %v9867_v20 = vpop.xlane.xlu1 %448  ;;  %v9870_v49 = vpop.xlane.xlu0 %445 }
 0x15d   :  { %11918 = vst [vmem:[#allocation8_spill] sm:$0xff] %v9845_v39  ;;  %v4985_v24 = vrot.slane %v11920_v28, %v8441_v18  ;;  %v4992_v23 = vrot.slane %v11921_v15, %v8441_v18  ;;  %v4832_v36 = vrot.slane %v11922_v54, %v8441_v18  ;;  %v2775_v43 = vrot.slane %v9423_v41, %v8376_v48  ;;  %v11925_v15 = vld [vmem:[#allocation6_spill] sm:$0xff] }
 0x15e   :  { %11919 = vst [vmem:[#allocation55_spill] sm:$0xff] %v9847_v35  ;;  %v2782_v4 = vrot.slane %v9423_v41, %v8379_v50  ;;  %v2789_v11 = vrot.slane %v9423_v41, %v8382_v51  ;;  %v2740_v61 = vrot.slane %v9426_v53, %v8373_v47  ;;  %6507 = vperm.xlu1 %7891, %v9753_v30   ;;  %v11923_v41 = vld [vmem:[#allocation60_spill] sm:$0xff] }
 0x15f   :  { %v2747_v31 = vrot.slane %v9426_v53, %v8376_v48  ;;  %v2754_v17 = vrot.slane %v9426_v53, %v8379_v50  ;;  %v2761_v52 = vrot.slane %v9426_v53, %v8382_v51  ;;  %6540 = vperm.xlu0 %7890, %v4925_v62   ;;  %v4839_v9 = vrot.slane %v11923_v41, %v8441_v18  ;;  %v11924_v62 = vld [vmem:[#allocation32_spill] sm:$0xff] }
 0x160   :  { %v2824_v37 = vrot.slane %v9463_v10, %v8373_v47  ;;  %v2831_v30 = vrot.slane %v9463_v10, %v8376_v48  ;;  %v2838_v55 = vrot.slane %v9463_v10, %v8379_v50  ;;  %v2845_v60 = vrot.slane %v9463_v10, %v8382_v51  ;;  %v9904_v10 = vpop.xlane.xlu1 %454  ;;  %v9906_v32 = vpop.xlane.xlu0 %451 }
 0x161   :  { %v2796_v2 = vrot.slane %v9466_v56, %v8373_v47  ;;  %v2803_v53 = vrot.slane %v9466_v56, %v8376_v48  ;;  %v5019_v28 = vrot.slane %v11924_v62, %v8441_v18  ;;  %v5026_v54 = vrot.slane %v11925_v15, %v8441_v18  ;;  %v11940_v15 = vld [vmem:[#allocation65_spill] sm:$0xff] }
 0x162   :  { %v9896_v41 = vcombine.low %v2768_v6, %v2775_v43  ;;  %v9898_v35 = vcombine.low %v2782_v4, %v2789_v11  ;;  %v9900_v39 = vcombine.low %v2684_v3, %v2691_v34  ;;  %v9902_v26 = vcombine.low %v2698_v63, %v2705_v16  ;;  %6513 = vperm.xlu1 %7891, %v4772_v59   ;;  %v11935_v4 = vld [vmem:[#allocation61_spill] sm:$0xff] }
 0x163   :  { %v9908_v42 = vcombine.low %v2740_v61, %v2747_v31  ;;  %v9910_v7 = vcombine.low %v2754_v17, %v2761_v52  ;;  %v2810_v62 = vrot.slane %v9466_v56, %v8379_v50  ;;  %6546 = vperm.xlu0 %7890, %v4959_v8   ;;  %v4993_v6 = vcombine.low %v4985_v24, %v4992_v23  ;;  %v11936_v61 = vld [vmem:[#allocation64_spill] sm:$0xff] }
 0x164   :  { %11926 = vst [vmem:[#allocation56_spill] sm:$0xff] %v9896_v41  ;;  %11927 = vst [vmem:[#allocation38_spill] sm:$0xff] %v9898_v35  ;;  %v9914_v43 = vcombine.low %v2824_v37, %v2831_v30  ;;  %v9916_v3 = vcombine.low %v2838_v55, %v2845_v60  ;;  %v2817_v34 = vrot.slane %v9466_v56, %v8382_v51  ;;  %v9936_v17 = vpop.xlane.xlu0 %457  ;;  %v11938_v30 = vld [vmem:[#allocation26_spill] sm:$0xff] }
 0x165   :  { %11928 = vst [vmem:[#allocation37_spill] sm:$0xff] %v9900_v39  ;;  %11929 = vst [vmem:[#allocation28_spill] sm:$0xff] %v9902_v26  ;;  %v4840_v63 = vcombine.low %v4832_v36, %v4839_v9  ;;  %v9920_v59 = vcombine.low %v2796_v2, %v2803_v53  ;;  %v5027_v16 = vcombine.low %v5019_v28, %v5026_v54  ;;  %v9934_v36 = vpop.xlane.xlu1 %460  ;;  %v11939_v2 = vld [vmem:[#allocation48_spill] sm:$0xff] }
 0x166   :  { %11930 = vst [vmem:[#allocation30_spill] sm:$0xff] %v9908_v42  ;;  %11931 = vst [vmem:[#allocation60_spill] sm:$0xff] %v9910_v7  ;;  %v4866_v11 = vrot.slane %v11935_v4, %v8441_v18  ;;  %v4873_v31 = vrot.slane %v11936_v61, %v8441_v18  ;;  %v2852_v8 = vrot.slane %v9502_v22, %v8373_v47  ;;  %6519 = vperm.xlu1 %7891, %v4806_v21  }
 0x167   :  { %11932 = vst [vmem:[#allocation32_spill] sm:$0xff] %v9914_v43  ;;  %11933 = vst [vmem:[#allocation6_spill] sm:$0xff] %v9916_v3  ;;  %v2859_v24 = vrot.slane %v9502_v22, %v8376_v48  ;;  %v2866_v23 = vrot.slane %v9502_v22, %v8379_v50  ;;  %v2873_v56 = vrot.slane %v9502_v22, %v8382_v51  ;;  %6552 = vperm.xlu0 %7890, %v4993_v6   ;;  %v11944_v43 = vld [vmem:[#allocation68_spill] sm:$0xff] }
 0x168   :  { %11934 = vst [vmem:[#allocation80_spill] sm:$0xff] %v9920_v59  ;;  %11937 = vst [vmem:[#allocation61_spill] sm:$0xff] %v9934_v36  ;;  %v2936_v52 = vrot.slane %v9539_v58, %v8373_v47  ;;  %v5053_v9 = vrot.slane %v9392_v5, %v8441_v18  ;;  %v5060_v37 = vrot.slane %v9401_v40, %v8441_v18  ;;  %v9968_v61 = vpop.xlane.xlu0 %463 }
 0x169   :  { %v4900_v55 = vrot.slane %v11938_v30, %v8441_v18  ;;  %v2943_v22 = vrot.slane %v9539_v58, %v8376_v48  ;;  %v2950_v21 = vrot.slane %v9539_v58, %v8379_v50  ;;  %v2957_v60 = vrot.slane %v9539_v58, %v8382_v51  ;;  %v9966_v4 = vpop.xlane.xlu1 %466  ;;  %11942 = vst [vmem:[#allocation26_spill] sm:$0xff] %v9968_v61  ;;  %v11943_v30 = vld [vmem:[#allocation67_spill] sm:$0xff] }
 0x16a   :  { %v2908_v53 = vrot.slane %v11939_v2, %v8373_v47  ;;  %v2915_v5 = vrot.slane %v11939_v2, %v8376_v48  ;;  %v2922_v40 = vrot.slane %v11939_v2, %v8379_v50  ;;  %v2929_v28 = vrot.slane %v11939_v2, %v8382_v51  ;;  %11941 = vst [vmem:[#allocation64_spill] sm:$0xff] %v9966_v4 }
 0x16b   :  { %v4907_v54 = vrot.slane %v11940_v15, %v8441_v18  ;;  %v2992_v6 = vrot.slane %v9577_v12, %v8373_v47  ;;  %v2999_v58 = vrot.slane %v9577_v12, %v8376_v48  ;;  %6525 = vperm.xlu1 %7891, %v4840_v63   ;;  %v5087_v3 = vrot.slane %v11943_v30, %v8441_v18 }
 0x16c   :  { %v5094_v2 = vrot.slane %v11944_v43, %v8441_v18  ;;  %v3006_v15 = vrot.slane %v9577_v12, %v8379_v50  ;;  %v3013_v35 = vrot.slane %v9577_v12, %v8382_v51  ;;  %v2964_v41 = vrot.slane %v9580_v33, %v8373_v47  ;;  %6558 = vperm.xlu0 %7890, %v5027_v16   ;;  %v10000_v16 = vpop.xlane.xlu0 %469 }
 0x16d   :  { %v2971_v63 = vrot.slane %v9580_v33, %v8376_v48  ;;  %v9982_v59 = vcombine.low %v2810_v62, %v2817_v34  ;;  %v9984_v7 = vcombine.low %v2852_v8, %v2859_v24  ;;  %v9986_v30 = vcombine.low %v2866_v23, %v2873_v56  ;;  %v9998_v34 = vpop.xlane.xlu1 %472  ;;  %v11948_v23 = vld [vmem:[#allocation35_spill] sm:$0xff] }
 0x16e   :  { %v4874_v43 = vcombine.low %v4866_v11, %v4873_v31  ;;  %v5623_v42 = vcombine.low %v2936_v52, %v2943_v22  ;;  %v5624_v26 = vcombine.low %v2950_v21, %v2957_v60  ;;  %v9988_v39 = vcombine.low %v2908_v53, %v2915_v5  ;;  %v11949_v52 = vld [vmem:[#allocation36_spill] sm:$0xff] }
 0x16f   :  { %11945 = vst [vmem:[#allocation48_spill] sm:$0xff] %v9982_v59  ;;  %11946 = vst [vmem:[#allocation65_spill] sm:$0xff] %v9984_v7  ;;  %v5061_v61 = vcombine.low %v5053_v9, %v5060_v37  ;;  %v9990_v12 = vcombine.low %v2992_v6, %v2999_v58  ;;  %v9992_v4 = vcombine.low %v2922_v40, %v2929_v28  ;;  %v11952_v6 = vld [vmem:[#allocation19_spill] sm:$0xff] }
 0x170   :  { %11947 = vst [vmem:[#allocation67_spill] sm:$0xff] %v9986_v30  ;;  %v2978_v36 = vrot.slane %v9580_v33, %v8379_v50  ;;  %v2985_v62 = vrot.slane %v9580_v33, %v8382_v51  ;;  %6531 = vperm.xlu1 %7891, %v4874_v43   ;;  %v10002_v11 = vcombine.low %v3006_v15, %v3013_v35  ;;  %v10032_v53 = vpop.xlane.xlu0 %475 }
 0x171   :  { %v10004_v31 = vcombine.low %v2964_v41, %v2971_v63  ;;  %6564 = vperm.xlu0 %7890, %v5061_v61   ;;  %v4908_v8 = vcombine.low %v4900_v55, %v4907_v54  ;;  %v5095_v24 = vcombine.low %v5087_v3, %v5094_v2  ;;  %v4934_v56 = vrot.slane %v11948_v23, %v8441_v18  ;;  %v10030_v60 = vpop.xlane.xlu1 %478  ;;  %v11953_v61 = vld [vmem:[#allocation31_spill] sm:$0xff] }
 0x172   :  { %v4941_v9 = vrot.slane %v11949_v52, %v8441_v18  ;;  %v5359_v33 = vrot.slane %v9705_v45, %v8441_v18  ;;  %v5366_v37 = vrot.slane %v9734_v44, %v8441_v18  ;;  %v3384_v35 = vrot.slane %v9833_v27, %v8373_v47  ;;  %11950 = vst [vmem:[#allocation68_spill] sm:$0xff] %v10030_v60 }
 0x173   :  { %v3391_v41 = vrot.slane %v9833_v27, %v8376_v48  ;;  %v3398_v3 = vrot.slane %v9833_v27, %v8379_v50  ;;  %v3405_v55 = vrot.slane %v9833_v27, %v8382_v51  ;;  %v3048_v22 = vrot.slane %v9615_v14, %v8373_v47  ;;  %11951 = vst [vmem:[#allocation35_spill] sm:$0xff] %v10032_v53 }
 0x174   :  { %v3055_v45 = vrot.slane %v9615_v14, %v8376_v48  ;;  %v3062_v44 = vrot.slane %v9615_v14, %v8379_v50  ;;  %v10028_v21 = vcombine.low %v2978_v36, %v2985_v62  ;;  %6537 = vperm.xlu1 %7891, %v4908_v8   ;;  %v3069_v5 = vrot.slane %v9615_v14, %v8382_v51  ;;  %v10058_v52 = vpop.xlane.xlu0 %481 }
 0x175   :  { %v3020_v27 = vrot.slane %v9618_v13, %v8373_v47  ;;  %v3027_v40 = vrot.slane %v9618_v13, %v8376_v48  ;;  %v3034_v28 = vrot.slane %v9618_v13, %v8379_v50  ;;  %6570 = vperm.xlu0 %7890, %v5095_v24   ;;  %v4942_v36 = vcombine.low %v4934_v56, %v4941_v9  ;;  %v10056_v56 = vpop.xlane.xlu1 %484 }
 0x176   :  { %v5367_v54 = vcombine.low %v5359_v33, %v5366_v37  ;;  %v4968_v58 = vrot.slane %v11952_v6, %v8441_v18  ;;  %v4975_v2 = vrot.slane %v11953_v61, %v8441_v18  ;;  %v5895_v15 = vcombine.low %v3384_v35, %v3391_v41  ;;  %11954 = vst [vmem:[#allocation36_spill] sm:$0xff] %v10056_v56  ;;  %v11956_v35 = vld [vmem:[#allocation41_spill] sm:$0xff] }
 0x177   :  { %v5896_v14 = vcombine.low %v3398_v3, %v3405_v55  ;;  %v5631_v63 = vrot.slane %v5623_v42, %v8441_v18  ;;  %v5638_v43 = vrot.slane %v5624_v26, %v8441_v18  ;;  %v10048_v62 = vcombine.low %v3048_v22, %v3055_v45  ;;  %11955 = vst [vmem:[#allocation19_spill] sm:$0xff] %v10058_v52  ;;  %v11957_v3 = vld [vmem:[#allocation9_spill] sm:$0xff] }
 0x178   :  { %v3104_v8 = vrot.slane %v9653_v29, %v8373_v47  ;;  %v3111_v24 = vrot.slane %v9653_v29, %v8376_v48  ;;  %v3041_v23 = vrot.slane %v9618_v13, %v8382_v51  ;;  %6543 = vperm.xlu1 %7891, %v4942_v36   ;;  %v10060_v9 = vcombine.low %v3062_v44, %v3069_v5  ;;  %v10086_v6 = vpop.xlane.xlu0 %487  ;;  %v11964_v36 = vld [vmem:[#allocation77_spill] sm:$0xff] }
 0x179   :  { %v3118_v42 = vrot.slane %v9653_v29, %v8379_v50  ;;  %v3125_v26 = vrot.slane %v9653_v29, %v8382_v51  ;;  %v10066_v33 = vcombine.low %v3020_v27, %v3027_v40  ;;  %6618 = vperm.xlu0 %7890, %v5367_v54   ;;  %v3076_v37 = vrot.slane %v9656_v0, %v8373_v47  ;;  %v491_v54 = vpop.xlane.xlu1 %490 }
 0x17a   :  { %v4976_v13 = vcombine.low %v4968_v58, %v4975_v2  ;;  %v5002_v41 = vrot.slane %v11956_v35, %v8441_v18  ;;  %v5009_v55 = vrot.slane %v11957_v3, %v8441_v18  ;;  %v3083_v22 = vrot.slane %v9656_v0, %v8376_v48 }
 0x17b   :  { %v5639_v45 = vcombine.low %v5631_v63, %v5638_v43  ;;  %v5903_v44 = vrot.slane %v5895_v15, %v8441_v18  ;;  %v5910_v29 = vrot.slane %v5896_v14, %v8441_v18  ;;  %v10078_v5 = vcombine.low %v3104_v8, %v3111_v24  ;;  %v11959_v63 = vld [vmem:[#allocation18_spill] sm:$0xff] }
 0x17c   :  { %v10080_v27 = vcombine.low %v3034_v28, %v3041_v23  ;;  %6549 = vperm.xlu1 %7891, %v4976_v13   ;;  %v3832_v58 = vrot.slane %v491_v54, %v8373_v47  ;;  %v3839_v61 = vrot.slane %v491_v54, %v8376_v48  ;;  %v3846_v2 = vrot.slane %v491_v54, %v8379_v50  ;;  %v11960_v8 = vld [vmem:[#allocation66_spill] sm:$0xff] }
 0x17d   :  { %v3853_v15 = vrot.slane %v491_v54, %v8382_v51  ;;  %6666 = vperm.xlu0 %7890, %v5639_v45   ;;  %v10092_v28 = vcombine.low %v3118_v42, %v3125_v26  ;;  %v5010_v14 = vcombine.low %v5002_v41, %v5009_v55  ;;  %v5036_v43 = vrot.slane %v11959_v63, %v8441_v18  ;;  %v10108_v41 = vpop.xlane.xlu1 %496 }
 0x17e   :  { %v5043_v24 = vrot.slane %v11960_v8, %v8441_v18  ;;  %v10098_v23 = vcombine.low %v3076_v37, %v3083_v22  ;;  %v6167_v13 = vcombine.low %v3832_v58, %v3839_v61  ;;  %v5911_v3 = vcombine.low %v5903_v44, %v5910_v29  ;;  %v10110_v37 = vpop.xlane.xlu0 %493  ;;  %v11962_v58 = vld [vmem:[#allocation69_spill] sm:$0xff] }
 0x17f   :  { %11958 = vst [vmem:[#allocation31_spill] sm:$0xff] %v10092_v28  ;;  %v6168_v35 = vcombine.low %v3846_v2, %v3853_v15  ;;  %v3160_v40 = vrot.slane %v9687_v19, %v8373_v47  ;;  %v3167_v45 = vrot.slane %v9687_v19, %v8376_v48  ;;  %v3174_v42 = vrot.slane %v9687_v19, %v8379_v50  ;;  %v11963_v2 = vld [vmem:[#allocation70_spill] sm:$0xff] }
 0x180   :  { %11961 = vst [vmem:[#allocation41_spill] sm:$0xff] %v10098_v23  ;;  %v3181_v26 = vrot.slane %v9687_v19, %v8382_v51  ;;  %6555 = vperm.xlu1 %7891, %v5010_v14   ;;  %v3412_v55 = vrot.slane %v9870_v49, %v8373_v47  ;;  %v3419_v22 = vrot.slane %v9870_v49, %v8376_v48  ;;  %v11966_v23 = vld [vmem:[#allocation76_spill] sm:$0xff] }
 0x181   :  { %v3426_v44 = vrot.slane %v9870_v49, %v8379_v50  ;;  %v3433_v29 = vrot.slane %v9870_v49, %v8382_v51  ;;  %6714 = vperm.xlu0 %7890, %v5911_v3   ;;  %v3132_v19 = vrot.slane %v9690_v57, %v8373_v47  ;;  %v5044_v54 = vcombine.low %v5036_v43, %v5043_v24  ;;  %v10136_v24 = vpop.xlane.xlu1 %502 }
 0x182   :  { %v5070_v61 = vrot.slane %v11962_v58, %v8441_v18  ;;  %v5077_v15 = vrot.slane %v11963_v2, %v8441_v18  ;;  %v3139_v14 = vrot.slane %v9690_v57, %v8376_v48  ;;  %v3146_v63 = vrot.slane %v9690_v57, %v8379_v50  ;;  %v10138_v58 = vpop.xlane.xlu0 %499 }
 0x183   :  { %v6175_v8 = vrot.slane %v6167_v13, %v8441_v18  ;;  %v6182_v49 = vrot.slane %v6168_v35, %v8441_v18  ;;  %v3356_v3 = vrot.slane %v9835_v46, %v8373_v47  ;;  %v3363_v43 = vrot.slane %v9835_v46, %v8376_v48 }
 0x184   :  { %6561 = vperm.xlu1 %7891, %v5044_v54   ;;  %v5376_v2 = vrot.slane %v9755_v38, %v8441_v18  ;;  %v5383_v56 = vrot.slane %v11964_v36, %v8441_v18  ;;  %v3370_v13 = vrot.slane %v9835_v46, %v8379_v50  ;;  %v3377_v35 = vrot.slane %v9835_v46, %v8382_v51  ;;  %v11965_v54 = vld [vmem:[#allocation74_spill] sm:$0xff] }
 0x185   :  { %v5912_v30 = vcombine.low %v3412_v55, %v3419_v22  ;;  %v5913_v7 = vcombine.low %v3426_v44, %v3433_v29  ;;  %v6183_v52 = vcombine.low %v6175_v8, %v6182_v49  ;;  %v5078_v60 = vcombine.low %v5070_v61, %v5077_v15 }
 0x186   :  { %v5342_v59 = vrot.slane %v11965_v54, %v8441_v18  ;;  %v5349_v53 = vrot.slane %v11966_v23, %v8441_v18  ;;  %v3153_v38 = vrot.slane %v9690_v57, %v8382_v51  ;;  %v3804_v36 = vrot.slane %v10086_v6, %v8373_v47  ;;  %v10166_v57 = vpop.xlane.xlu1 %508  ;;  %v10168_v44 = vpop.xlane.xlu0 %505 }
 0x187   :  { %v5614_v28 = vrot.slane %v9988_v39, %v8441_v18  ;;  %v5621_v46 = vrot.slane %v9992_v4, %v8441_v18  ;;  %v3811_v55 = vrot.slane %v10086_v6, %v8376_v48  ;;  %v3818_v22 = vrot.slane %v10086_v6, %v8379_v50  ;;  %6762 = vperm.xlu0 %7890, %v6183_v52  }
 0x188   :  { %v3825_v23 = vrot.slane %v10086_v6, %v8382_v51  ;;  %6567 = vperm.xlu1 %7891, %v5078_v60   ;;  %v5878_v29 = vcombine.low %v3356_v3, %v3363_v43  ;;  %v5879_v39 = vcombine.low %v3370_v13, %v3377_v35  ;;  %v5920_v61 = vrot.slane %v5912_v30, %v8441_v18 }
 0x189   :  { %v5927_v4 = vrot.slane %v5913_v7, %v8441_v18  ;;  %v10172_v15 = vcombine.low %v3160_v40, %v3167_v45  ;;  %v11967_v8 = vrot.slane %v9656_v0, %v8382_v51  ;;  %v11968_v6 = vrot.slane %v9656_v0, %v8379_v50  ;;  %v11971_v7 = vld [vmem:[#allocation44_spill] sm:$0xff] }
 0x18a   :  { %v5384_v49 = vcombine.low %v5376_v2, %v5383_v56  ;;  %v5350_v60 = vcombine.low %v5342_v59, %v5349_v53  ;;  %v10182_v54 = vcombine.low %v3174_v42, %v3181_v26  ;;  %v10184_v3 = vcombine.low %v3132_v19, %v3139_v14  ;;  %v10190_v13 = vpop.xlane.xlu1 %514  ;;  %v10192_v35 = vpop.xlane.xlu0 %511  ;;  %v11972_v59 = vld [vmem:[#allocation22_spill] sm:$0xff]  ;;  %v11973_v2 = vld [vmem:[#allocation23_spill] sm:$0xff] }
 0x18b   :  { %v10180_v52 = vcombine.low %v11968_v6, %v11967_v8  ;;  %v10186_v43 = vcombine.low %v3146_v63, %v3153_v38  ;;  %v5121_v30 = vrot.slane %v11971_v7, %v8441_v18  ;;  %v6150_v40 = vcombine.low %v3804_v36, %v3811_v55 }
 0x18c   :  { %11969 = vst [vmem:[#allocation9_spill] sm:$0xff] %v10184_v3  ;;  %v6151_v45 = vcombine.low %v3818_v22, %v3825_v23  ;;  %6621 = vperm.xlu0 %7890, %v5384_v49   ;;  %6615 = vperm.xlu1 %7891, %v5350_v60   ;;  %v5622_v0 = vcombine.low %v5614_v28, %v5621_v46  ;;  %v11974_v22 = vld [vmem:[#allocation24_spill] sm:$0xff] }
 0x18d   :  { %11970 = vst [vmem:[#allocation18_spill] sm:$0xff] %v10186_v43  ;;  %v5928_v56 = vcombine.low %v5920_v61, %v5927_v4  ;;  %v5128_v53 = vrot.slane %v11972_v59, %v8441_v18  ;;  %v5886_v42 = vrot.slane %v5878_v29, %v8441_v18  ;;  %v5893_v26 = vrot.slane %v5879_v39, %v8441_v18 }
 0x18e   :  { %v3888_v19 = vrot.slane %v10108_v41, %v8373_v47  ;;  %v3895_v14 = vrot.slane %v10108_v41, %v8376_v48  ;;  %v3902_v63 = vrot.slane %v10108_v41, %v8379_v50  ;;  %v3909_v28 = vrot.slane %v10108_v41, %v8382_v51  ;;  %v10216_v29 = vpop.xlane.xlu1 %520  ;;  %v10218_v41 = vpop.xlane.xlu0 %517 }
 0x18f   :  { %v3216_v38 = vrot.slane %v11973_v2, %v8373_v47  ;;  %v3223_v36 = vrot.slane %v11973_v2, %v8376_v48  ;;  %v3230_v46 = vrot.slane %v11973_v2, %v8379_v50  ;;  %v3237_v55 = vrot.slane %v11973_v2, %v8382_v51 }
 0x190   :  { %v3188_v23 = vrot.slane %v11974_v22, %v8373_v47  ;;  %6717 = vperm.xlu0 %7890, %v5928_v56   ;;  %6663 = vperm.xlu1 %7891, %v5622_v0   ;;  %v6158_v39 = vrot.slane %v6150_v40, %v8441_v18  ;;  %v6165_v61 = vrot.slane %v6151_v45, %v8441_v18 }
 0x191   :  { %v3195_v4 = vrot.slane %v11974_v22, %v8376_v48  ;;  %v3202_v8 = vrot.slane %v11974_v22, %v8379_v50  ;;  %v5665_v6 = vrot.slane %v9990_v12, %v8441_v18  ;;  %v5672_v49 = vrot.slane %v10002_v11, %v8441_v18 }
 0x192   :  { %v6201_v60 = vcombine.low %v3888_v19, %v3895_v14  ;;  %v6202_v7 = vcombine.low %v3902_v63, %v3909_v28  ;;  %v5129_v0 = vcombine.low %v5121_v30, %v5128_v53  ;;  %v5894_v56 = vcombine.low %v5886_v42, %v5893_v26  ;;  %v10240_v11 = vpop.xlane.xlu1 %526  ;;  %v10242_v53 = vpop.xlane.xlu0 %523  ;;  %v11977_v42 = vld [vmem:[#allocation49_spill] sm:$0xff]  ;;  %v11978_v28 = vld [vmem:[#allocation12_spill] sm:$0xff] }
 0x193   :  { %v3209_v40 = vrot.slane %v11974_v22, %v8382_v51  ;;  %v3468_v45 = vrot.slane %v9906_v32, %v8373_v47  ;;  %v3475_v59 = vrot.slane %v9906_v32, %v8376_v48  ;;  %v3482_v2 = vrot.slane %v9906_v32, %v8379_v50  ;;  %11975 = vst [vmem:[#allocation66_spill] sm:$0xff] %v10240_v11 }
 0x194   :  { %v3489_v12 = vrot.slane %v9906_v32, %v8382_v51  ;;  %6576 = vperm.xlu0 %7890, %v5129_v0   ;;  %6711 = vperm.xlu1 %7891, %v5894_v56   ;;  %v6166_v30 = vcombine.low %v6158_v39, %v6165_v61  ;;  %11976 = vst [vmem:[#allocation69_spill] sm:$0xff] %v10242_v53 }
 0x195   :  { %v5104_v26 = vrot.slane %v11977_v42, %v8441_v18  ;;  %v3860_v19 = vrot.slane %v10110_v37, %v8373_v47  ;;  %v3867_v14 = vrot.slane %v10110_v37, %v8376_v48  ;;  %v5673_v63 = vcombine.low %v5665_v6, %v5672_v49  ;;  %v11979_v49 = vld [vmem:[#allocation78_spill] sm:$0xff] }
 0x196   :  { %v5111_v32 = vrot.slane %v11978_v28, %v8441_v18  ;;  %v3874_v22 = vrot.slane %v10110_v37, %v8379_v50  ;;  %v3881_v39 = vrot.slane %v10110_v37, %v8382_v51  ;;  %v6209_v61 = vrot.slane %v6201_v60, %v8441_v18  ;;  %v10268_v3 = vpop.xlane.xlu1 %532  ;;  %v10278_v60 = vpop.xlane.xlu0 %529 }
 0x197   :  { %v6216_v0 = vrot.slane %v6202_v7, %v8441_v18  ;;  %v10258_v56 = vcombine.low %v3216_v38, %v3223_v36  ;;  %v10260_v42 = vcombine.low %v3230_v46, %v3237_v55  ;;  %v10262_v53 = vcombine.low %v3188_v23, %v3195_v4  ;;  %11980 = vst [vmem:[#allocation70_spill] sm:$0xff] %v10268_v3 }
 0x198   :  { %v10264_v6 = vcombine.low %v3202_v8, %v3209_v40  ;;  %v3272_v28 = vrot.slane %v11979_v49, %v8373_v47  ;;  %v5946_v11 = vcombine.low %v3468_v45, %v3475_v59  ;;  %v5947_v43 = vcombine.low %v3482_v2, %v3489_v12  ;;  %6672 = vperm.xlu0 %7890, %v5673_v63   ;;  %v11983_v2 = vld [vmem:[#allocation79_spill] sm:$0xff] }
 0x199   :  { %6759 = vperm.xlu1 %7891, %v6166_v30   ;;  %v5410_v37 = vrot.slane %v9825_v25, %v8441_v18  ;;  %v5417_v38 = vrot.slane %v9827_v1, %v8441_v18  ;;  %v5648_v36 = vrot.slane %v10004_v31, %v8441_v18  ;;  %v5655_v46 = vrot.slane %v10028_v21, %v8441_v18 }
 0x19a   :  { %v6184_v55 = vcombine.low %v3860_v19, %v3867_v14  ;;  %v6185_v23 = vcombine.low %v3874_v22, %v3881_v39  ;;  %v6217_v4 = vcombine.low %v6209_v61, %v6216_v0  ;;  %v5112_v8 = vcombine.low %v5104_v26, %v5111_v32  ;;  %11981 = vst [vmem:[#allocation77_spill] sm:$0xff] %v10278_v60  ;;  %v10294_v59 = vpop.permute.xlu1 %6426 }
 0x19b   :  { %v3279_v7 = vrot.slane %v11979_v49, %v8376_v48  ;;  %v3286_v25 = vrot.slane %v11979_v49, %v8379_v50  ;;  %v3440_v1 = vrot.slane %v9867_v20, %v8373_v47  ;;  %v3447_v31 = vrot.slane %v9867_v20, %v8376_v48  ;;  %11982 = vst [vmem:[#allocation74_spill] sm:$0xff] %v10294_v59 }
 0x19c   :  { %v3293_v21 = vrot.slane %v11979_v49, %v8382_v51  ;;  %v3454_v40 = vrot.slane %v9867_v20, %v8379_v50  ;;  %v3461_v45 = vrot.slane %v9867_v20, %v8382_v51  ;;  %6768 = vperm.xlu0 %7890, %v6217_v4   ;;  %v3244_v12 = vrot.slane %v11983_v2, %v8373_v47 }
 0x19d   :  { %6573 = vperm.xlu1 %7891, %v5112_v8   ;;  %v3251_v30 = vrot.slane %v11983_v2, %v8376_v48  ;;  %v5418_v26 = vcombine.low %v5410_v37, %v5417_v38  ;;  %v5656_v19 = vcombine.low %v5648_v36, %v5655_v46  ;;  %v5954_v14 = vrot.slane %v5946_v11, %v8441_v18  ;;  %v11986_v46 = vld [vmem:[#allocation14_spill] sm:$0xff] }
 0x19e   :  { %v5961_v63 = vrot.slane %v5947_v43, %v8441_v18  ;;  %v6192_v32 = vrot.slane %v6184_v55, %v8441_v18  ;;  %v6199_v20 = vrot.slane %v6185_v23, %v8441_v18  ;;  %v10304_v22 = vcombine.low %v3272_v28, %v3279_v7  ;;  %v10314_v11 = vpop.permute.xlu1 %6429  ;;  %v10316_v28 = vpop.permute.xlu0 %6423  ;;  %v11987_v23 = vld [vmem:[#allocation50_spill] sm:$0xff] }
 0x19f   :  { %v3258_v39 = vrot.slane %v11983_v2, %v8379_v50  ;;  %v3265_v61 = vrot.slane %v11983_v2, %v8382_v51  ;;  %v5929_v0 = vcombine.low %v3440_v1, %v3447_v31  ;;  %v5930_v49 = vcombine.low %v3454_v40, %v3461_v45  ;;  %11984 = vst [vmem:[#allocation76_spill] sm:$0xff] %v10314_v11  ;;  %v11988_v1 = vld [vmem:[#allocation25_spill] sm:$0xff]  ;;  %v11989_v40 = vld [vmem:[#allocation75_spill] sm:$0xff] }
 0x1a0   :  { %v3944_v37 = vrot.slane %v10136_v24, %v8373_v47  ;;  %v3951_v43 = vrot.slane %v10136_v24, %v8376_v48  ;;  %6627 = vperm.xlu0 %7890, %v5418_v26   ;;  %11985 = vst [vmem:[#allocation44_spill] sm:$0xff] %v10316_v28  ;;  %v3958_v38 = vrot.slane %v10136_v24, %v8379_v50  ;;  %v11990_v26 = vld [vmem:[#allocation39_spill] sm:$0xff]  ;;  %v12003_v28 = vld [vmem:[#allocation34_spill] sm:$0xff] }
 0x1a1   :  { %6669 = vperm.xlu1 %7891, %v5656_v19   ;;  %v3965_v36 = vrot.slane %v10136_v24, %v8382_v51  ;;  %v5155_v55 = vrot.slane %v11986_v46, %v8441_v18  ;;  %v5162_v4 = vrot.slane %v11987_v23, %v8441_v18  ;;  %v5962_v8 = vcombine.low %v5954_v14, %v5961_v63  ;;  %v11998_v19 = vld [vmem:[#allocation17_spill] sm:$0xff] }
 0x1a2   :  { %v6200_v7 = vcombine.low %v6192_v32, %v6199_v20  ;;  %v5393_v31 = vrot.slane %v11988_v1, %v8441_v18  ;;  %v5400_v45 = vrot.slane %v11989_v40, %v8441_v18  ;;  %v10330_v2 = vcombine.low %v3286_v25, %v3293_v21  ;;  %v10344_v32 = vpop.permute.xlu1 %6432  ;;  %v10346_v25 = vpop.permute.xlu0 %6450 }
 0x1a3   :  { %v10334_v24 = vcombine.low %v3244_v12, %v3251_v30  ;;  %v10336_v11 = vcombine.low %v3258_v39, %v3265_v61  ;;  %v3496_v14 = vrot.slane %v9904_v10, %v8373_v47  ;;  %v3503_v63 = vrot.slane %v9904_v10, %v8376_v48  ;;  %11993 = vst [vmem:[#allocation24_spill] sm:$0xff] %v10344_v32 }
 0x1a4   :  { %6723 = vperm.xlu0 %7890, %v5962_v8   ;;  %11994 = vst [vmem:[#allocation49_spill] sm:$0xff] %v10346_v25  ;;  %v6235_v21 = vcombine.low %v3944_v37, %v3951_v43  ;;  %v6236_v12 = vcombine.low %v3958_v38, %v3965_v36  ;;  %v5163_v30 = vcombine.low %v5155_v55, %v5162_v4 }
 0x1a5   :  { %11991 = vst [vmem:[#allocation22_spill] sm:$0xff] %v10334_v24  ;;  %11992 = vst [vmem:[#allocation23_spill] sm:$0xff] %v10336_v11  ;;  %6765 = vperm.xlu1 %7891, %v6200_v7   ;;  %v5699_v20 = vrot.slane %v10048_v62, %v8441_v18  ;;  %v5401_v39 = vcombine.low %v5393_v31, %v5400_v45  ;;  %v5706_v61 = vrot.slane %v10060_v9, %v8441_v18  ;;  %v11997_v45 = vld [vmem:[#allocation15_spill] sm:$0xff] }
 0x1a6   :  { %v5937_v23 = vrot.slane %v5929_v0, %v8441_v18  ;;  %v5944_v1 = vrot.slane %v5930_v49, %v8441_v18  ;;  %v3510_v8 = vrot.slane %v9904_v10, %v8379_v50  ;;  %v3524_v7 = vrot.slane %v9936_v17, %v8373_v47  ;;  %v10368_v49 = vpop.permute.xlu1 %6435  ;;  %v10370_v38 = vpop.permute.xlu0 %6456 }
 0x1a7   :  { %v3531_v37 = vrot.slane %v9936_v17, %v8376_v48  ;;  %v3538_v62 = vrot.slane %v9936_v17, %v8379_v50  ;;  %v3545_v43 = vrot.slane %v9936_v17, %v8382_v51  ;;  %v3916_v9 = vrot.slane %v10138_v58, %v8373_v47  ;;  %11995 = vst [vmem:[#allocation12_spill] sm:$0xff] %v10368_v49  ;;  %v12002_v49 = vld [vmem:[#allocation33_spill] sm:$0xff] }
 0x1a8   :  { %v3923_v0 = vrot.slane %v10138_v58, %v8376_v48  ;;  %6582 = vperm.xlu0 %7890, %v5163_v30   ;;  %11996 = vst [vmem:[#allocation78_spill] sm:$0xff] %v10370_v38  ;;  %v3930_v36 = vrot.slane %v10138_v58, %v8379_v50  ;;  %v3937_v55 = vrot.slane %v10138_v58, %v8382_v51  ;;  %v11999_v38 = vld [vmem:[#allocation61_spill] sm:$0xff] }
 0x1a9   :  { %6624 = vperm.xlu1 %7891, %v5401_v39   ;;  %v6243_v17 = vrot.slane %v6235_v21, %v8441_v18  ;;  %v6250_v4 = vrot.slane %v6236_v12, %v8441_v18  ;;  %v5707_v31 = vcombine.low %v5699_v20, %v5706_v61  ;;  %v5945_v40 = vcombine.low %v5937_v23, %v5944_v1 }
 0x1aa   :  { %v5138_v30 = vrot.slane %v11997_v45, %v8441_v18  ;;  %v5145_v39 = vrot.slane %v11998_v19, %v8441_v18  ;;  %v3517_v46 = vrot.slane %v9904_v10, %v8382_v51  ;;  %v3552_v25 = vrot.slane %v11999_v38, %v8373_v47  ;;  %v10392_v23 = vpop.permute.xlu1 %6438  ;;  %v10394_v19 = vpop.permute.xlu0 %6462 }
 0x1ab   :  { %v3559_v58 = vrot.slane %v11999_v38, %v8376_v48  ;;  %v3566_v21 = vrot.slane %v11999_v38, %v8379_v50  ;;  %v3573_v12 = vrot.slane %v11999_v38, %v8382_v51  ;;  %v5980_v20 = vcombine.low %v3524_v7, %v3531_v37  ;;  %12000 = vst [vmem:[#allocation79_spill] sm:$0xff] %v10392_v23 }
 0x1ac   :  { %v5981_v61 = vcombine.low %v3538_v62, %v3545_v43  ;;  %6678 = vperm.xlu0 %7890, %v5707_v31   ;;  %12001 = vst [vmem:[#allocation14_spill] sm:$0xff] %v10394_v19  ;;  %v6218_v10 = vcombine.low %v3916_v9, %v3923_v0  ;;  %v6219_v1 = vcombine.low %v3930_v36, %v3937_v55  ;;  %v12004_v9 = vld [vmem:[#allocation64_spill] sm:$0xff]  ;;  %v12007_v55 = vld [vmem:[#allocation26_spill] sm:$0xff] }
 0x1ad   :  { %6720 = vperm.xlu1 %7891, %v5945_v40   ;;  %v6251_v45 = vcombine.low %v6243_v17, %v6250_v4  ;;  %v5444_v32 = vrot.slane %v12002_v49, %v8441_v18  ;;  %v5146_v59 = vcombine.low %v5138_v30, %v5145_v39  ;;  %v5451_v60 = vrot.slane %v12003_v28, %v8441_v18 }
 0x1ae   :  { %v5682_v7 = vrot.slane %v10066_v33, %v8441_v18  ;;  %v5689_v37 = vrot.slane %v10080_v27, %v8441_v18  ;;  %v10404_v62 = vcombine.low %v3496_v14, %v3503_v63  ;;  %v10406_v43 = vcombine.low %v3510_v8, %v3517_v46  ;;  %v10418_v27 = vpop.permute.xlu1 %6441  ;;  %v10420_v46 = vpop.permute.xlu0 %6468 }
 0x1af   :  { %v3608_v0 = vrot.slane %v12004_v9, %v8373_v47  ;;  %v3615_v49 = vrot.slane %v12004_v9, %v8376_v48  ;;  %v10412_v38 = vcombine.low %v3552_v25, %v3559_v58  ;;  %v3622_v28 = vrot.slane %v12004_v9, %v8379_v50  ;;  %12005 = vst [vmem:[#allocation50_spill] sm:$0xff] %v10418_v27 }
 0x1b0   :  { %v3629_v33 = vrot.slane %v12004_v9, %v8382_v51  ;;  %6774 = vperm.xlu0 %7890, %v6251_v45   ;;  %12006 = vst [vmem:[#allocation25_spill] sm:$0xff] %v10420_v46  ;;  %v5988_v14 = vrot.slane %v5980_v20, %v8441_v18  ;;  %v5995_v63 = vrot.slane %v5981_v61, %v8441_v18  ;;  %v12009_v45 = vld [vmem:[#allocation10_spill] sm:$0xff] }
 0x1b1   :  { %6579 = vperm.xlu1 %7891, %v5146_v59   ;;  %v6226_v8 = vrot.slane %v6218_v10, %v8441_v18  ;;  %v6233_v25 = vrot.slane %v6219_v1, %v8441_v18  ;;  %v10426_v36 = vcombine.low %v3566_v21, %v3573_v12  ;;  %v3580_v17 = vrot.slane %v12007_v55, %v8373_v47 }
 0x1b2   :  { %v5452_v4 = vcombine.low %v5444_v32, %v5451_v60  ;;  %v5690_v31 = vcombine.low %v5682_v7, %v5689_v37  ;;  %v10430_v40 = vcombine.low %v3608_v0, %v3615_v49  ;;  %v3587_v59 = vrot.slane %v12007_v55, %v8376_v48  ;;  %v10444_v32 = vpop.permute.xlu1 %6444  ;;  %v10446_v12 = vpop.permute.xlu0 %6474  ;;  %v12010_v37 = vld [vmem:[#allocation11_spill] sm:$0xff]  ;;  %v12011_v0 = vld [vmem:[#allocation62_spill] sm:$0xff] }
 0x1b3   :  { %v3594_v30 = vrot.slane %v12007_v55, %v8379_v50  ;;  %v3601_v39 = vrot.slane %v12007_v55, %v8382_v51  ;;  %v10438_v58 = vcombine.low %v3622_v28, %v3629_v33  ;;  %v4000_v21 = vrot.slane %v10166_v57, %v8373_v47  ;;  %12008 = vst [vmem:[#allocation75_spill] sm:$0xff] %v10444_v32  ;;  %v12012_v28 = vld [vmem:[#allocation63_spill] sm:$0xff] }
 0x1b4   :  { %v4007_v60 = vrot.slane %v10166_v57, %v8376_v48  ;;  %6633 = vperm.xlu0 %7890, %v5452_v4   ;;  %v4014_v20 = vrot.slane %v10166_v57, %v8379_v50  ;;  %v4021_v61 = vrot.slane %v10166_v57, %v8382_v51  ;;  %v5996_v10 = vcombine.low %v5988_v14, %v5995_v63 }
 0x1b5   :  { %6675 = vperm.xlu1 %7891, %v5690_v31   ;;  %v6234_v1 = vcombine.low %v6226_v8, %v6233_v25  ;;  %v5189_v7 = vrot.slane %v12009_v45, %v8441_v18  ;;  %v5196_v9 = vrot.slane %v12010_v37, %v8441_v18  ;;  %v5427_v49 = vrot.slane %v12011_v0, %v8441_v18  ;;  %v12015_v0 = vld [vmem:[#allocation31_spill] sm:$0xff] }
 0x1b6   :  { %v5434_v33 = vrot.slane %v12012_v28, %v8441_v18  ;;  %v10460_v55 = vcombine.low %v3580_v17, %v3587_v59  ;;  %v10462_v4 = vcombine.low %v3594_v30, %v3601_v39  ;;  %v3636_v57 = vrot.slane %v10000_v16, %v8373_v47  ;;  %v10477_v59 = vpop.permute.xlu1 %6447  ;;  %v10479_v30 = vpop.permute.xlu0 %6480 }
 0x1b7   :  { %v3643_v14 = vrot.slane %v10000_v16, %v8376_v48  ;;  %v3650_v8 = vrot.slane %v10000_v16, %v8379_v50  ;;  %v3657_v25 = vrot.slane %v10000_v16, %v8382_v51  ;;  %v12013_v31 = vlaneseq  ;;  %12014 = vst [vmem:[#allocation39_spill] sm:$0xff] %v10477_v59 }
 0x1b8   :  { %6729 = vperm.xlu0 %7890, %v5996_v10   ;;  %v6269_v39 = vcombine.low %v4000_v21, %v4007_v60  ;;  %v6270_v45 = vcombine.low %v4014_v20, %v4021_v61  ;;  %v5733_v37 = vrot.slane %v10078_v5, %v8441_v18  ;;  %v5740_v28 = vrot.slane %v12015_v0, %v8441_v18  ;;  %v12018_v0 = vld [vmem:[#allocation43_spill] sm:$0xff] }
 0x1b9   :  { %v10475_v17 = vand.u32 127, %v12013_v31  ;;  %6771 = vperm.xlu1 %7891, %v6234_v1   ;;  %v5197_v63 = vcombine.low %v5189_v7, %v5196_v9  ;;  %v5435_v46 = vcombine.low %v5427_v49, %v5434_v33  ;;  %v5971_v16 = vrot.slane %v10404_v62, %v8441_v18  ;;  %v12017_v31 = vld [vmem:[#allocation21_spill] sm:$0xff]  ;;  %v12019_v21 = vld [vmem:[#allocation35_spill] sm:$0xff]  ;;  %v12022_v1 = vld [vmem:[#allocation28_spill] sm:$0xff] }
 0x1ba   :  { %v5978_v10 = vrot.slane %v10406_v43, %v8441_v18  ;;  %v10495_v60 = vcombine.low %v3636_v57, %v3643_v14  ;;  %v10497_v20 = vcombine.low %v3650_v8, %v3657_v25  ;;  %v3972_v61 = vrot.slane %v10168_v44, %v8373_v47  ;;  %v10504_v7 = vpop.permute.xlu1 %6453  ;;  %v10506_v9 = vpop.permute.xlu0 %6486 }
 0x1bb   :  { %v3979_v62 = vrot.slane %v10168_v44, %v8376_v48  ;;  %v6812_v43 = vadd.s32 4294967288, %v10475_v17  ;;  %12016 = vst [vmem:[#allocation15_spill] sm:$0xff] %v10504_v7  ;;  %v3986_v49 = vrot.slane %v10168_v44, %v8379_v50  ;;  %v3993_v33 = vrot.slane %v10168_v44, %v8382_v51  ;;  %v12023_v7 = vld [vmem:[#allocation41_spill] sm:$0xff] }
 0x1bc   :  { %6588 = vperm.xlu0 %7890, %v5197_v63   ;;  %v5741_v57 = vcombine.low %v5733_v37, %v5740_v28  ;;  %v6277_v14 = vrot.slane %v6269_v39, %v8441_v18  ;;  %v5979_v8 = vcombine.low %v5971_v16, %v5978_v10  ;;  %v6284_v25 = vrot.slane %v6270_v45, %v8441_v18  ;;  %v12021_v39 = vld [vmem:[#allocation37_spill] sm:$0xff] }
 0x1bd   :  { %6630 = vperm.xlu1 %7891, %v5435_v46   ;;  %v5172_v63 = vrot.slane %v12017_v31, %v8441_v18  ;;  %v5179_v46 = vrot.slane %v12018_v0, %v8441_v18  ;;  %v4056_v45 = vrot.slane %v10190_v13, %v8373_v47  ;;  %v6252_v37 = vcombine.low %v3972_v61, %v3979_v62 }
 0x1be   :  { %v6819_v28 = vadd.s32 4294967280, %v10475_v17  ;;  %v6826_v16 = vadd.s32 4294967272, %v10475_v17  ;;  %v10530_v10 = vpop.permute.xlu1 %6459  ;;  %v10532_v31 = vpop.permute.xlu0 %6492  ;;  %v4063_v0 = vrot.slane %v10190_v13, %v8376_v48  ;;  %v6253_v44 = vcombine.low %v3986_v49, %v3993_v33 }
 0x1bf   :  { %12020 = vst [vmem:[#allocation17_spill] sm:$0xff] %v10530_v10  ;;  %v5478_v5 = vrot.slane %v12021_v39, %v8441_v18  ;;  %v5485_v61 = vrot.slane %v12022_v1, %v8441_v18  ;;  %v6285_v62 = vcombine.low %v6277_v14, %v6284_v25  ;;  %v5180_v19 = vcombine.low %v5172_v63, %v5179_v46  ;;  %v12024_v14 = vld [vmem:[#allocation7_spill] sm:$0xff] }
 0x1c0   :  { %6684 = vperm.xlu0 %7890, %v5741_v57   ;;  %v5716_v57 = vrot.slane %v12023_v7, %v8441_v18  ;;  %v4070_v10 = vrot.slane %v10190_v13, %v8379_v50  ;;  %v4077_v49 = vrot.slane %v10190_v13, %v8382_v51  ;;  %v4028_v33 = vrot.slane %v10192_v35, %v8373_v47 }
 0x1c1   :  { %6726 = vperm.xlu1 %7891, %v5979_v8   ;;  %v5723_v8 = vrot.slane %v10180_v52, %v8441_v18  ;;  %v4035_v1 = vrot.slane %v10192_v35, %v8376_v48  ;;  %v10553_v25 = vsub.s32 %v6812_v43, %v12024_v14  ;;  %v10556_v7 = vsub.s32 %v6819_v28, %v12024_v14 }
 0x1c2   :  { %v10560_v52 = vsub.s32 %v10475_v17, %v12024_v14  ;;  %v10562_v63 = vpop.permute.xlu1 %6465  ;;  %v10564_v13 = vpop.permute.xlu0 %6498  ;;  %v10566_v46 = vcombine.low %v4056_v45, %v4063_v0  ;;  %v4042_v39 = vrot.slane %v10192_v35, %v8379_v50  ;;  %v5486_v43 = vcombine.low %v5478_v5, %v5485_v61 }
 0x1c3   :  { %12025 = vst [vmem:[#allocation61_spill] sm:$0xff] %v10562_v63  ;;  %v6022_v28 = vrot.slane %v10460_v55, %v8441_v18  ;;  %v5724_v59 = vcombine.low %v5716_v57, %v5723_v8  ;;  %v6260_v63 = vrot.slane %v6252_v37, %v8441_v18  ;;  %v10576_v32 = vcombine.low %v4070_v10, %v4077_v49  ;;  %v12027_v57 = vld [vmem:[#allocation42_spill] sm:$0xff]  ;;  %v12028_v49 = vld [vmem:[#allocation52_spill] sm:$0xff] }
 0x1c4   :  { %6780 = vperm.xlu0 %7890, %v6285_v62   ;;  %v6029_v62 = vrot.slane %v10462_v4, %v8441_v18  ;;  %v4049_v45 = vrot.slane %v10192_v35, %v8382_v51  ;;  %v10580_v0 = vcombine.low %v4028_v33, %v4035_v1  ;;  %v10583_v5 = vsub.s32 %v6826_v16, %v12024_v14  ;;  %v12026_v16 = vld [vmem:[#allocation20_spill] sm:$0xff] }
 0x1c5   :  { %6585 = vperm.xlu1 %7891, %v5180_v19   ;;  %v6267_v19 = vrot.slane %v6253_v44, %v8441_v18  ;;  %v4112_v55 = vrot.slane %v10216_v29, %v8373_v47  ;;  %v4119_v4 = vrot.slane %v10216_v29, %v8376_v48  ;;  %v4126_v37 = vrot.slane %v10216_v29, %v8379_v50  ;;  %v12029_v1 = vld [vmem:[#allocation40_spill] sm:$0xff] }
 0x1c6   :  { %v6868_v44 = vadd.s32 4294967224, %v10475_v17  ;;  %v6472_v10 = vpop.permute.xlu1 %6471  ;;  %v10592_v35 = vpop.permute.xlu0 %6504  ;;  %v5223_v61 = vrot.slane %v12026_v16, %v8441_v18  ;;  %v5230_v8 = vrot.slane %v12027_v57, %v8441_v18  ;;  %v5461_v33 = vrot.slane %v12028_v49, %v8441_v18 }
 0x1c7   :  { %v5468_v27 = vrot.slane %v12029_v1, %v8441_v18  ;;  %v6030_v23 = vcombine.low %v6022_v28, %v6029_v62  ;;  %v6268_v3 = vcombine.low %v6260_v63, %v6267_v19  ;;  %v10605_v11 = vcombine.low %v4042_v39, %v4049_v45 }
 0x1c8   :  { %6639 = vperm.xlu0 %7890, %v5486_v43   ;;  %v4133_v43 = vrot.slane %v10216_v29, %v8382_v51  ;;  %v4084_v16 = vrot.slane %v10218_v41, %v8373_v47  ;;  %v4091_v57 = vrot.slane %v10218_v41, %v8376_v48  ;;  %v6833_v49 = vadd.s32 4294967264, %v10475_v17 }
 0x1c9   :  { %6681 = vperm.xlu1 %7891, %v5724_v59   ;;  %v6920_v59 = vrot.slane %v6472_v10, %v10560_v52  ;;  %v10612_v24 = vcombine.low %v4112_v55, %v4119_v4  ;;  %v4098_v1 = vrot.slane %v10218_v41, %v8379_v50  ;;  %v6840_v29 = vadd.s32 4294967256, %v10475_v17 }
 0x1ca   :  { %v6924_v63 = vrot.slane %v10446_v12, %v10553_v25  ;;  %v6478_v39 = vpop.permute.xlu1 %6477  ;;  %v10619_v28 = vpop.permute.xlu0 %6510  ;;  %v5231_v19 = vcombine.low %v5223_v61, %v5230_v8  ;;  %v5469_v45 = vcombine.low %v5461_v33, %v5468_v27  ;;  %v5767_v55 = vrot.slane %v10172_v15, %v8441_v18 }
 0x1cb   :  { %v6929_v62 = vrot.slane %v6478_v39, %v10556_v7  ;;  %v5774_v10 = vrot.slane %v10182_v54, %v8441_v18  ;;  %v6005_v12 = vrot.slane %v10412_v38, %v8441_v18  ;;  %v10634_v39 = vsub.s32 %v6833_v49, %v12024_v14 }
 0x1cc   :  { %6735 = vperm.xlu0 %7890, %v6030_v23   ;;  %v6925_v4 = vsel %vm6817_vm1, %v6924_v63, %v6920_v59  ;;  %v10631_v23 = vcombine.low %v4126_v37, %v4133_v43  ;;  %v6847_v27 = vadd.s32 4294967248, %v10475_v17  ;;  %v10639_v61 = vsub.s32 %v6840_v29, %v12024_v14  ;;  %v12030_v59 = vld [vmem:[#allocation53_spill] sm:$0xff] }
 0x1cd   :  { %6777 = vperm.xlu1 %7891, %v6268_v3   ;;  %v6012_v3 = vrot.slane %v10426_v36, %v8441_v18  ;;  %v6930_v15 = vsel %vm6824_vm2, %v6929_v62, %v6925_v4  ;;  %v6854_v54 = vadd.s32 4294967240, %v10475_v17  ;;  %v6934_v38 = vrot.slane %v10479_v30, %v10583_v5  ;;  %v12031_v62 = vld [vmem:[#allocation54_spill] sm:$0xff] }
 0x1ce   :  { %v6484_v36 = vpop.permute.xlu1 %6483  ;;  %v10644_v37 = vpop.permute.xlu0 %6516  ;;  %v6311_v33 = vrot.slane %v10566_v46, %v8441_v18  ;;  %v6318_v43 = vrot.slane %v10576_v32, %v8441_v18  ;;  %v5206_v49 = vrot.slane %v12030_v59, %v8441_v18  ;;  %v5775_v63 = vcombine.low %v5767_v55, %v5774_v10 }
 0x1cf   :  { %v6939_v8 = vrot.slane %v6484_v36, %v10634_v39  ;;  %v6935_v29 = vsel %vm6831_vm3, %v6934_v38, %v6930_v15  ;;  %v6013_v30 = vcombine.low %v6005_v12, %v6012_v3  ;;  %v10660_v4 = vsub.s32 %v6847_v27, %v12024_v14  ;;  %v12032_v27 = vld [vmem:[#allocation30_spill] sm:$0xff]  ;;  %v12033_v38 = vld [vmem:[#allocation60_spill] sm:$0xff] }
 0x1d0   :  { %6594 = vperm.xlu0 %7890, %v5231_v19   ;;  %v5213_v19 = vrot.slane %v12031_v62, %v8441_v18  ;;  %v6861_v46 = vadd.s32 4294967232, %v10475_v17  ;;  %v10665_v36 = vsub.s32 %v6854_v54, %v12024_v14  ;;  %v6944_v55 = vrot.slane %v10506_v9, %v10639_v61 }
 0x1d1   :  { %6636 = vperm.xlu1 %7891, %v5469_v45   ;;  %v10657_v45 = vsub.s32 %v6868_v44, %v12024_v14  ;;  %v6940_v32 = vsel %vm6838_vm4, %v6939_v8, %v6935_v29  ;;  %v6319_v3 = vcombine.low %v6311_v33, %v6318_v43  ;;  %v5512_v15 = vrot.slane %v12032_v27, %v8441_v18  ;;  %v12034_v29 = vld [vmem:[#allocation9_spill] sm:$0xff] }
 0x1d2   :  { %v6490_v10 = vpop.permute.xlu1 %6489  ;;  %v10669_v44 = vpop.permute.xlu0 %6522  ;;  %v5519_v8 = vrot.slane %v12033_v38, %v8441_v18  ;;  %v6945_v54 = vsel %vm6845_vm5, %v6944_v55, %v6940_v32  ;;  %v5214_v59 = vcombine.low %v5206_v49, %v5213_v19  ;;  %v5750_v9 = vrot.slane %v12034_v29, %v8441_v18 }
 0x1d3   :  { %v6949_v12 = vrot.slane %v6490_v10, %v10660_v4  ;;  %v6882_v62 = vadd.s32 4294967208, %v10475_v17  ;;  %v10683_v10 = vsub.s32 %v6861_v46, %v12024_v14  ;;  %v6875_v33 = vadd.s32 4294967216, %v10475_v17 }
 0x1d4   :  { %6690 = vperm.xlu0 %7890, %v5775_v63   ;;  %v12035_v63 = vld [vmem:[#allocation18_spill] sm:$0xff]  ;;  %v6896_v27 = vadd.s32 4294967192, %v10475_v17  ;;  %v6954_v49 = vrot.slane %v10532_v31, %v10665_v36  ;;  %v5520_v46 = vcombine.low %v5512_v15, %v5519_v8  ;;  %v6056_v38 = vrot.slane %v10495_v60, %v8441_v18 }
 0x1d5   :  { %6732 = vperm.xlu1 %7891, %v6013_v30   ;;  %v5757_v30 = vrot.slane %v12035_v63, %v8441_v18  ;;  %v6950_v43 = vsel %vm6852_vm6, %v6949_v12, %v6945_v54  ;;  %v6063_v12 = vrot.slane %v10497_v20, %v8441_v18  ;;  %v6294_v31 = vrot.slane %v10580_v0, %v8441_v18 }
 0x1d6   :  { %v6496_v19 = vpop.permute.xlu1 %6495  ;;  %v10690_v32 = vpop.permute.xlu0 %6528  ;;  %v6955_v54 = vsel %vm6859_vm7, %v6954_v49, %v6950_v43  ;;  %v10706_v15 = vsub.s32 %v6875_v33, %v12024_v14  ;;  %v6889_v60 = vadd.s32 4294967200, %v10475_v17  ;;  %v10711_v20 = vsub.s32 %v6896_v27, %v12024_v14  ;;  %v12037_v43 = vld [vmem:[#allocation72_spill] sm:$0xff] }
 0x1d7   :  { %v6959_v55 = vrot.slane %v6496_v19, %v10683_v10  ;;  %v5758_v29 = vcombine.low %v5750_v9, %v5757_v30  ;;  %v6964_v0 = vrot.slane %v10564_v13, %v10657_v45  ;;  %v6064_v30 = vcombine.low %v6056_v38, %v6063_v12 }
 0x1d8   :  { %6786 = vperm.xlu0 %7890, %v6319_v3   ;;  %v6301_v3 = vrot.slane %v10605_v11, %v8441_v18  ;;  %v5264_v27 = vrot.slane %v12037_v43, %v8441_v18  ;;  %v6903_v38 = vadd.s32 4294967184, %v10475_v17 }
 0x1d9   :  { %6591 = vperm.xlu1 %7891, %v5214_v59   ;;  %v10703_v59 = vsub.s32 %v6882_v62, %v12024_v14  ;;  %v6960_v8 = vsel %vm6866_vm8, %v6959_v55, %v6955_v54  ;;  %v12036_v62 = vld [vmem:[#allocation71_spill] sm:$0xff]  ;;  %v12038_v55 = vld [vmem:[#allocation8_spill] sm:$0xff] }
 0x1da   :  { %v6502_v11 = vpop.permute.xlu1 %6501  ;;  %v10715_v9 = vpop.permute.xlu0 %6534  ;;  %v5257_v33 = vrot.slane %v12036_v62, %v8441_v18  ;;  %v6965_v49 = vsel %vm6873_vm9, %v6964_v0, %v6960_v8  ;;  %v6302_v19 = vcombine.low %v6294_v31, %v6301_v3  ;;  %v5495_v13 = vrot.slane %v12038_v55, %v8441_v18 }
 0x1db   :  { %v6969_v63 = vrot.slane %v6502_v11, %v10706_v15  ;;  %v10729_v11 = vsub.s32 %v6889_v60, %v12024_v14  ;;  %v6974_v62 = vrot.slane %v10592_v35, %v10703_v59  ;;  %v5801_v8 = vrot.slane %v10258_v56, %v8441_v18 }
 0x1dc   :  { %6645 = vperm.xlu0 %7890, %v5520_v46   ;;  %v12039_v46 = vld [vmem:[#allocation55_spill] sm:$0xff]  ;;  %v5808_v0 = vrot.slane %v10260_v42, %v8441_v18  ;;  %v5265_v60 = vcombine.low %v5257_v33, %v5264_v27  ;;  %v6039_v35 = vrot.slane %v10430_v40, %v8441_v18  ;;  %v4105_v56 = vrot.slane %v10218_v41, %v8382_v51  ;;  %v12047_v41 = vld [vmem:[#allocation48_spill] sm:$0xff] }
 0x1dd   :  { %6687 = vperm.xlu1 %7891, %v5758_v29   ;;  %v5502_v54 = vrot.slane %v12039_v46, %v8441_v18  ;;  %v6910_v29 = vadd.s32 4294967176, %v10475_v17  ;;  %v6970_v12 = vsel %vm6880_vm10, %v6969_v63, %v6965_v49  ;;  %v10753_v42 = vsub.s32 %v6903_v38, %v12024_v14  ;;  %v12040_v46 = vld [vmem:[#allocation73_spill] sm:$0xff] }
 0x1de   :  { %v6508_v31 = vpop.permute.xlu1 %6507  ;;  %v10735_v3 = vpop.permute.xlu0 %6540  ;;  %v6975_v63 = vsel %vm6887_vm11, %v6974_v62, %v6970_v12  ;;  %v6984_v27 = vrot.slane %v10619_v28, %v10711_v20  ;;  %v12041_v12 = vld [vmem:[#allocation16_spill] sm:$0xff] }
 0x1df   :  { %v6979_v17 = vrot.slane %v6508_v31, %v10729_v11  ;;  %v5503_v43 = vcombine.low %v5495_v13, %v5502_v54  ;;  %v10750_v49 = vsub.s32 %v6910_v29, %v12024_v14  ;;  %v6345_v13 = vrot.slane %v10612_v24, %v8441_v18 }
 0x1e0   :  { %6741 = vperm.xlu0 %7890, %v6064_v30   ;;  %v6046_v30 = vrot.slane %v10438_v58, %v8441_v18  ;;  %v6352_v14 = vrot.slane %v10631_v23, %v8441_v18  ;;  %v5240_v54 = vrot.slane %v12040_v46, %v8441_v18  ;;  %v5247_v62 = vrot.slane %v12041_v12, %v8441_v18 }
 0x1e1   :  { %6783 = vperm.xlu1 %7891, %v6302_v19   ;;  %v6980_v33 = vsel %vm6894_vm12, %v6979_v17, %v6975_v63  ;;  %v5809_v19 = vcombine.low %v5801_v8, %v5808_v0  ;;  %v6994_v28 = vrot.slane %v10644_v37, %v10750_v49  ;;  %v12042_v31 = vrot.slane %v12019_v21, %v8376_v48 }
 0x1e2   :  { %v6514_v40 = vpop.permute.xlu1 %6513  ;;  %v10758_v58 = vpop.permute.xlu0 %6546  ;;  %v6985_v29 = vsel %vm6901_vm13, %v6984_v27, %v6980_v33  ;;  %v6047_v38 = vcombine.low %v6039_v35, %v6046_v30  ;;  %v12043_v24 = vrot.slane %v12019_v21, %v8373_v47  ;;  %v12044_v23 = vrot.slane %v12019_v21, %v8382_v51 }
 0x1e3   :  { %v6989_v55 = vrot.slane %v6514_v40, %v10753_v42  ;;  %v12045_v0 = vrot.slane %v12019_v21, %v8379_v50  ;;  %v6321_v63 = vcombine.low %v4098_v1, %v4105_v56  ;;  %v7003_v30 = vrot.slane %v10669_v44, %v10553_v25 }
 0x1e4   :  { %6600 = vperm.xlu0 %7890, %v5265_v60   ;;  %v6082_v8 = vcombine.low %v12043_v24, %v12042_v31  ;;  %v6320_v60 = vcombine.low %v4084_v16, %v4091_v57  ;;  %v6353_v27 = vcombine.low %v6345_v13, %v6352_v14  ;;  %v12046_v16 = vld [vmem:[#allocation80_spill] sm:$0xff]  ;;  %v5248_v40 = vcombine.low %v5240_v54, %v5247_v62  ;;  %v12048_v13 = vld [vmem:[#allocation51_spill] sm:$0xff] }
 0x1e5   :  { %6642 = vperm.xlu1 %7891, %v5503_v43   ;;  %v6083_v37 = vcombine.low %v12045_v0, %v12044_v23  ;;  %v6990_v17 = vsel %vm6908_vm14, %v6989_v55, %v6985_v29  ;;  %v5546_v57 = vrot.slane %v12046_v16, %v8441_v18  ;;  %v5553_v1 = vrot.slane %v12047_v41, %v8441_v18 }
 0x1e6   :  { %v10795_v43 = vsel %vm6915_vm15, %v6994_v28, %v6990_v17  ;;  %v6520_v21 = vpop.permute.xlu1 %6519  ;;  %v10797_v35 = vpop.permute.xlu0 %6552  ;;  %v5784_v56 = vrot.slane %v10262_v53, %v8441_v18  ;;  %v3342_v55 = vrot.slane %v11990_v26, %v8379_v50  ;;  %v3349_v44 = vrot.slane %v11990_v26, %v8382_v51 }
 0x1e7   :  { %v6999_v33 = vrot.slane %v6520_v21, %v10560_v52  ;;  %v3307_v54 = vrot.slane %v12048_v13, %v8376_v48  ;;  %v12049_v53 = vrot.slane %v9998_v34, %v8376_v48  ;;  %v6090_v12 = vrot.slane %v6082_v8, %v8441_v18 }
 0x1e8   :  { %6696 = vperm.xlu0 %7890, %v5809_v19   ;;  %v5791_v19 = vrot.slane %v10264_v6, %v8441_v18  ;;  %v12050_v6 = vrot.slane %v9998_v34, %v8373_v47  ;;  %v6097_v31 = vrot.slane %v6083_v37, %v8441_v18  ;;  %v6328_v24 = vrot.slane %v6320_v60, %v8441_v18  ;;  %v12054_v37 = vld [vmem:[#allocation66_spill] sm:$0xff] }
 0x1e9   :  { %6738 = vperm.xlu1 %7891, %v6047_v38   ;;  %v7004_v46 = vsel %vm6817_vm1, %v7003_v30, %v6999_v33  ;;  %v6335_v23 = vrot.slane %v6321_v63, %v8441_v18  ;;  %v12051_v0 = vrot.slane %v9998_v34, %v8382_v51  ;;  %v12052_v17 = vrot.slane %v9998_v34, %v8379_v50 }
 0x1ea   :  { %v10825_v28 = vcombine.low %v12050_v6, %v12049_v53  ;;  %v6526_v29 = vpop.permute.xlu1 %6525  ;;  %v7013_v30 = vrot.slane %v10690_v32, %v10583_v5  ;;  %v5554_v33 = vcombine.low %v5546_v57, %v5553_v1  ;;  %v5792_v8 = vcombine.low %v5784_v56, %v5791_v19  ;;  %v12055_v6 = vld [vmem:[#allocation13_spill] sm:$0xff] }
 0x1eb   :  { %v10827_v38 = vpop.permute.xlu0 %6558  ;;  %v7008_v62 = vrot.slane %v6526_v29, %v10556_v7  ;;  %v6066_v21 = vcombine.low %v12052_v17, %v12051_v0  ;;  %v4168_v60 = vrot.slane %v12054_v37, %v8373_v47  ;;  %v4175_v63 = vrot.slane %v12054_v37, %v8376_v48  ;;  %v12057_v17 = vld [vmem:[#allocation56_spill] sm:$0xff] }
 0x1ec   :  { %6792 = vperm.xlu0 %7890, %v6353_v27   ;;  %v12053_v27 = vld [vmem:[#allocation68_spill] sm:$0xff]  ;;  %v4182_v34 = vrot.slane %v12054_v37, %v8379_v50  ;;  %v4189_v41 = vrot.slane %v12054_v37, %v8382_v51  ;;  %v6098_v19 = vcombine.low %v6090_v12, %v6097_v31  ;;  %v6336_v53 = vcombine.low %v6328_v24, %v6335_v23  ;;  %v12059_v37 = vld [vmem:[#allocation19_spill] sm:$0xff] }
 0x1ed   :  { %6597 = vperm.xlu1 %7891, %v5248_v40   ;;  %v3720_v16 = vrot.slane %v12053_v27, %v8373_v47  ;;  %v7009_v40 = vsel %vm6824_vm2, %v7008_v62, %v7004_v46  ;;  %v5291_v46 = vrot.slane %v12055_v6, %v8441_v18  ;;  %v7023_v29 = vrot.slane %v10715_v9, %v10639_v61  ;;  %v12056_v62 = vld [vmem:[#allocation57_spill] sm:$0xff] }
 0x1ee   :  { %v7014_v57 = vsel %vm6831_vm3, %v7013_v30, %v7009_v40  ;;  %v5298_v0 = vrot.slane %v12056_v62, %v8441_v18  ;;  %v12058_v30 = vld [vmem:[#allocation38_spill] sm:$0xff]  ;;  %v3748_v40 = vrot.slane %v12059_v37, %v8373_v47  ;;  %v3755_v12 = vrot.slane %v12059_v37, %v8376_v48 }
 0x1ef   :  { %v6532_v32 = vpop.permute.xlu1 %6531  ;;  %v3762_v31 = vrot.slane %v12059_v37, %v8379_v50  ;;  %v6371_v24 = vcombine.low %v4168_v60, %v4175_v63  ;;  %v5835_v62 = vrot.slane %v10304_v22, %v8441_v18  ;;  %v6073_v14 = vrot.slane %v10825_v28, %v8441_v18  ;;  %v12060_v22 = vld [vmem:[#allocation69_spill] sm:$0xff] }
 0x1f0   :  { %6651 = vperm.xlu0 %7890, %v5554_v33   ;;  %v10854_v1 = vpop.permute.xlu0 %6564  ;;  %v7018_v56 = vrot.slane %v6532_v32, %v10634_v39  ;;  %v5529_v33 = vrot.slane %v12057_v17, %v8441_v18  ;;  %v6080_v60 = vrot.slane %v6066_v21, %v8441_v18  ;;  %v6372_v63 = vcombine.low %v4182_v34, %v4189_v41 }
 0x1f1   :  { %6693 = vperm.xlu1 %7891, %v5792_v8   ;;  %v5536_v8 = vrot.slane %v12058_v30, %v8441_v18  ;;  %v5842_v30 = vrot.slane %v10330_v2, %v8441_v18  ;;  %v4147_v2 = vrot.slane %v12060_v22, %v8376_v48  ;;  %v4154_v28 = vrot.slane %v12060_v22, %v8379_v50 }
 0x1f2   :  { %v7019_v9 = vsel %vm6838_vm4, %v7018_v56, %v7014_v57  ;;  %v7033_v57 = vrot.slane %v10735_v3, %v10665_v36  ;;  %v5299_v56 = vcombine.low %v5291_v46, %v5298_v0  ;;  %v4161_v21 = vrot.slane %v12060_v22, %v8382_v51 }
 0x1f3   :  { %v6538_v23 = vpop.permute.xlu1 %6537  ;;  %v7024_v32 = vsel %vm6845_vm5, %v7023_v29, %v7019_v9  ;;  %v4140_v29 = vrot.slane %v12060_v22, %v8373_v47  ;;  %v5843_v0 = vcombine.low %v5835_v62, %v5842_v30  ;;  %v6116_v22 = vcombine.low %v3748_v40, %v3755_v12  ;;  %v12065_v40 = vld [vmem:[#allocation22_spill] sm:$0xff] }
 0x1f4   :  { %6747 = vperm.xlu0 %7890, %v6098_v19   ;;  %v10875_v6 = vpop.permute.xlu0 %6570  ;;  %v7028_v17 = vrot.slane %v6538_v23, %v10660_v4  ;;  %v5537_v19 = vcombine.low %v5529_v33, %v5536_v8  ;;  %v6081_v33 = vcombine.low %v6073_v14, %v6080_v60  ;;  %v6379_v8 = vrot.slane %v6371_v24, %v8441_v18  ;;  %v12063_v60 = vld [vmem:[#allocation65_spill] sm:$0xff] }
 0x1f5   :  { %6789 = vperm.xlu1 %7891, %v6336_v53   ;;  %v3769_v53 = vrot.slane %v12059_v37, %v8382_v51  ;;  %v7043_v37 = vrot.slane %v10758_v58, %v10657_v45  ;;  %v6386_v23 = vrot.slane %v6372_v63, %v8441_v18  ;;  %v6354_v62 = vcombine.low %v4140_v29, %v4147_v2 }
 0x1f6   :  { %v7029_v9 = vsel %vm6852_vm6, %v7028_v17, %v7024_v32  ;;  %v12061_v32 = vld [vmem:[#allocation58_spill] sm:$0xff]  ;;  %v5580_v63 = vrot.slane %v12063_v60, %v8441_v18  ;;  %v5818_v12 = vrot.slane %v12065_v40, %v8441_v18  ;;  %v6355_v29 = vcombine.low %v4154_v28, %v4161_v21 }
 0x1f7   :  { %v6544_v3 = vpop.permute.xlu1 %6543  ;;  %v7034_v34 = vsel %vm6859_vm7, %v7033_v57, %v7029_v9  ;;  %v5274_v17 = vrot.slane %v12061_v32, %v8441_v18  ;;  %v6117_v9 = vcombine.low %v3762_v31, %v3769_v53  ;;  %v12064_v32 = vld [vmem:[#allocation67_spill] sm:$0xff]  ;;  %v7053_v2 = vrot.slane %v10797_v35, %v10703_v59 }
 0x1f8   :  { %6606 = vperm.xlu0 %7890, %v5299_v56   ;;  %v10899_v41 = vpop.permute.xlu0 %6618  ;;  %v7038_v46 = vrot.slane %v6544_v3, %v10683_v10  ;;  %v12062_v56 = vld [vmem:[#allocation27_spill] sm:$0xff]  ;;  %v10946_v35 = vcombine.low %v3342_v55, %v3349_v44  ;;  %v7063_v55 = vrot.slane %v10827_v38, %v10711_v20 }
 0x1f9   :  { %6648 = vperm.xlu1 %7891, %v5537_v19   ;;  %v5281_v57 = vrot.slane %v12062_v56, %v8441_v18  ;;  %v3727_v19 = vrot.slane %v12053_v27, %v8376_v48  ;;  %v5587_v56 = vrot.slane %v12064_v32, %v8441_v18  ;;  %v12066_v31 = vld [vmem:[#allocation23_spill] sm:$0xff]  ;;  %v6131_v44 = vrot.slane %v6117_v9, %v8441_v18 }
 0x1fa   :  { %v7039_v14 = vsel %vm6866_vm8, %v7038_v46, %v7034_v34  ;;  %v5825_v53 = vrot.slane %v12066_v31, %v8441_v18  ;;  %v6387_v34 = vcombine.low %v6379_v8, %v6386_v23 }
 0x1fb   :  { %v6550_v24 = vpop.permute.xlu1 %6549  ;;  %v7044_v58 = vsel %vm6873_vm9, %v7043_v37, %v7039_v14  ;;  %v5282_v46 = vcombine.low %v5274_v17, %v5281_v57  ;;  %v3734_v14 = vrot.slane %v12053_v27, %v8379_v50  ;;  %v10951_v21 = vcombine.low %v3720_v16, %v3727_v19 }
 0x1fc   :  { %6702 = vperm.xlu0 %7890, %v5843_v0   ;;  %v10914_v30 = vpop.permute.xlu0 %6666  ;;  %v7048_v3 = vrot.slane %v6550_v24, %v10706_v15  ;;  %v12067_v0 = vrot.slane %v11990_v26, %v8376_v48  ;;  %v3741_v24 = vrot.slane %v12053_v27, %v8382_v51  ;;  %v5826_v60 = vcombine.low %v5818_v12, %v5825_v53  ;;  %v12070_v12 = vld [vmem:[#allocation59_spill] sm:$0xff]  ;;  %v12071_v53 = vld [vmem:[#allocation29_spill] sm:$0xff] }
 0x1fd   :  { %6744 = vperm.xlu1 %7891, %v6081_v33   ;;  %v12068_v33 = vrot.slane %v11990_v26, %v8373_v47  ;;  %v6124_v26 = vrot.slane %v6116_v22, %v8441_v18  ;;  %v6362_v27 = vrot.slane %v6354_v62, %v8441_v18  ;;  %v6369_v16 = vrot.slane %v6355_v29, %v8441_v18 }
 0x1fe   :  { %v7049_v28 = vsel %vm6880_vm10, %v7048_v3, %v7044_v58  ;;  %v5588_v58 = vcombine.low %v5580_v63, %v5587_v56  ;;  %v6100_v19 = vcombine.low %v3734_v14, %v3741_v24  ;;  %v12069_v3 = vld [vmem:[#allocation70_spill] sm:$0xff]  ;;  %v5325_v31 = vrot.slane %v12070_v12, %v8441_v18 }
 0x1ff   :  { %v10933_v37 = vcombine.low %v12068_v33, %v12067_v0  ;;  %v6556_v8 = vpop.permute.xlu1 %6555  ;;  %v7054_v23 = vsel %vm6887_vm11, %v7053_v2, %v7049_v28  ;;  %v4224_v32 = vrot.slane %v12069_v3, %v8373_v47  ;;  %v4231_v40 = vrot.slane %v12069_v3, %v8376_v48  ;;  %v12072_v2 = vld [vmem:[#allocation32_spill] sm:$0xff]  ;;  %v12073_v14 = vld [vmem:[#allocation6_spill] sm:$0xff] }
 0x200   :  { %6798 = vperm.xlu0 %7890, %v6387_v34   ;;  %v7058_v17 = vrot.slane %v6556_v8, %v10729_v11  ;;  %v10955_v57 = vpop.permute.xlu0 %6714  ;;  %v4238_v22 = vrot.slane %v12069_v3, %v8379_v50  ;;  %v4245_v38 = vrot.slane %v12069_v3, %v8382_v51  ;;  %v5332_v29 = vrot.slane %v12071_v53, %v8441_v18 }
 0x201   :  { %6603 = vperm.xlu1 %7891, %v5282_v46   ;;  %v5563_v34 = vrot.slane %v12072_v2, %v8441_v18  ;;  %v7073_v46 = vrot.slane %v10854_v1, %v10750_v49  ;;  %v6132_v0 = vcombine.low %v6124_v26, %v6131_v44  ;;  %v6370_v33 = vcombine.low %v6362_v27, %v6369_v16 }
 0x202   :  { %v7059_v63 = vsel %vm6894_vm12, %v7058_v17, %v7054_v23  ;;  %v5570_v24 = vrot.slane %v12073_v14, %v8441_v18  ;;  %v3314_v28 = vrot.slane %v12048_v13, %v8379_v50  ;;  %v3321_v8 = vrot.slane %v12048_v13, %v8382_v51 }
 0x203   :  { %v6562_v9 = vpop.permute.xlu1 %6561  ;;  %v7064_v62 = vsel %vm6901_vm13, %v7063_v55, %v7059_v63  ;;  %v12074_v23 = vrot.slane %v12048_v13, %v8373_v47  ;;  %v6406_v26 = vcombine.low %v4238_v22, %v4245_v38  ;;  %v7082_v27 = vrot.slane %v10875_v6, %v10553_v25  ;;  %v12075_v38 = vld [vmem:[#allocation77_spill] sm:$0xff] }
 0x204   :  { %6657 = vperm.xlu0 %7890, %v5588_v58   ;;  %v7068_v56 = vrot.slane %v6562_v9, %v10753_v42  ;;  %v5869_v13 = vrot.slane %v10933_v37, %v8441_v18  ;;  %v5333_v3 = vcombine.low %v5325_v31, %v5332_v29  ;;  %v6114_v63 = vrot.slane %v6100_v19, %v8441_v18 }
 0x205   :  { %6699 = vperm.xlu1 %7891, %v5826_v60   ;;  %v10994_v17 = vcombine.low %v12074_v23, %v3307_v54  ;;  %v6405_v60 = vcombine.low %v4224_v32, %v4231_v40  ;;  %v5876_v54 = vrot.slane %v10946_v35, %v8441_v18  ;;  %v5571_v32 = vcombine.low %v5563_v34, %v5570_v24  ;;  %v12078_v24 = vld [vmem:[#allocation47_spill] sm:$0xff] }
 0x206   :  { %v7069_v1 = vsel %vm6908_vm14, %v7068_v56, %v7064_v62  ;;  %v10997_v58 = vpop.permute.xlu0 %6762  ;;  %v6107_v40 = vrot.slane %v10951_v21, %v8441_v18  ;;  %v5845_v22 = vcombine.low %v3314_v28, %v3321_v8  ;;  %v4196_v9 = vrot.slane %v12075_v38, %v8373_v47 }
 0x207   :  { %v11000_v55 = vsel %vm6915_vm15, %v7073_v46, %v7069_v1  ;;  %v6568_v44 = vpop.permute.xlu1 %6567  ;;  %v4203_v6 = vrot.slane %v12075_v38, %v8376_v48  ;;  %v4210_v35 = vrot.slane %v12075_v38, %v8379_v50  ;;  %v4217_v56 = vrot.slane %v12075_v38, %v8382_v51  ;;  %v12076_v46 = vld [vmem:[#allocation45_spill] sm:$0xff] }
 0x208   :  { %6753 = vperm.xlu0 %7890, %v6132_v0   ;;  %v7078_v16 = vrot.slane %v6568_v44, %v10560_v52  ;;  %v6413_v19 = vrot.slane %v6405_v60, %v8441_v18  ;;  %v7161_v12 = vrot.slane %v10899_v41, %v10553_v25  ;;  %v5877_v53 = vcombine.low %v5869_v13, %v5876_v54 }
 0x209   :  { %6795 = vperm.xlu1 %7891, %v6370_v33   ;;  %v6420_v29 = vrot.slane %v6406_v26, %v8441_v18  ;;  %v6115_v34 = vcombine.low %v6107_v40, %v6114_v63  ;;  %v5308_v0 = vrot.slane %v12076_v46, %v8441_v18  ;;  %v12077_v33 = vld [vmem:[#allocation46_spill] sm:$0xff]  ;;  %v2880_v28 = vrot.slane %v12078_v24, %v8373_v47 }
 0x20a   :  { %v11017_v62 = vsel %vm6817_vm1, %v7082_v27, %v7078_v16  ;;  %v5315_v14 = vrot.slane %v12077_v33, %v8441_v18  ;;  %v2887_v41 = vrot.slane %v12078_v24, %v8376_v48  ;;  %v2894_v1 = vrot.slane %v12078_v24, %v8379_v50  ;;  %v7516_v46 = vld [vmem:[%s11617_s1 + $0x80] sm:$0xff] }
 0x20b   :  { %v6622_v37 = vpop.permute.xlu0 %6621  ;;  %v6616_v21 = vpop.permute.xlu1 %6615  ;;  %v2901_v60 = vrot.slane %v12078_v24, %v8382_v51  ;;  %v6388_v27 = vcombine.low %v4196_v9, %v4203_v6  ;;  %v6389_v16 = vcombine.low %v4210_v35, %v4217_v56  ;;  %v7240_v13 = vrot.slane %v10914_v30, %v10553_v25  ;;  %v12079_v6 = vld [vmem:[#allocation36_spill] sm:$0xff]  ;;  %v7500_v33 = vld [vmem:[%s11617_s1] sm:$0xff] }
 0x20c   :  { %6612 = vperm.xlu0 %7890, %v5333_v3   ;;  %v7157_v31 = vrot.slane %v6616_v21, %v10560_v52  ;;  %v7166_v2 = vrot.slane %v6622_v37, %v10556_v7  ;;  %v6421_v3 = vcombine.low %v6413_v19, %v6420_v29  ;;  %v5852_v40 = vrot.slane %v10994_v17, %v8441_v18 }
 0x20d   :  { %6654 = vperm.xlu1 %7891, %v5571_v32   ;;  %v5316_v32 = vcombine.low %v5308_v0, %v5315_v14  ;;  %v5859_v63 = vrot.slane %v5845_v22, %v8441_v18  ;;  %v5589_v38 = vcombine.low %v2880_v28, %v2887_v41  ;;  %v5590_v9 = vcombine.low %v2894_v1, %v2901_v60  ;;  %v7517_v0 = vld [vmem:[%s11617_s1 + $0x88] sm:$0xff] }
 0x20e   :  { %v7162_v8 = vsel %vm6817_vm1, %v7161_v12, %v7157_v31  ;;  %v3776_v35 = vrot.slane %v12079_v6, %v8373_v47  ;;  %v3783_v30 = vrot.slane %v12079_v6, %v8376_v48  ;;  %v3790_v17 = vrot.slane %v12079_v6, %v8379_v50  ;;  %v7549_v1 = vld [vmem:[%s11617_s1 + $0x188] sm:$0xff] }
 0x20f   :  { %v6718_v23 = vpop.permute.xlu0 %6717  ;;  %v6664_v26 = vpop.permute.xlu1 %6663  ;;  %v11043_v44 = vsel %vm6824_vm2, %v7166_v2, %v7162_v8  ;;  %v3797_v22 = vrot.slane %v12079_v6, %v8382_v51  ;;  %v7319_v19 = vrot.slane %v10955_v57, %v10553_v25  ;;  %v5860_v47 = vcombine.low %v5852_v40, %v5859_v63  ;;  %v7501_v8 = vld [vmem:[%s11617_s1 + $0x8] sm:$0xff]  ;;  %v7518_v40 = vld [vmem:[%s11617_s1 + $0x90] sm:$0xff] }
 0x210   :  { %6708 = vperm.xlu0 %7890, %v5877_v53   ;;  %v7236_v54 = vrot.slane %v6664_v26, %v10560_v52  ;;  %v7324_v31 = vrot.slane %v6718_v23, %v10556_v7  ;;  %v6396_v53 = vrot.slane %v6388_v27, %v8441_v18  ;;  %v6403_v48 = vrot.slane %v6389_v16, %v8441_v18  ;;  %v7548_v23 = vld [vmem:[%s11617_s1 + $0x180] sm:$0xff] }
 0x211   :  { %6750 = vperm.xlu1 %7891, %v6115_v34   ;;  %v6133_v50 = vcombine.low %v3776_v35, %v3783_v30  ;;  %v5597_v51 = vrot.slane %v5589_v38, %v8441_v18  ;;  %v7398_v14 = vrot.slane %v10997_v58, %v10553_v25  ;;  %v5604_v28 = vrot.slane %v5590_v9, %v8441_v18  ;;  %v7519_v35 = vld [vmem:[%s11617_s1 + $0x98] sm:$0xff]  ;;  %v7502_v30 = vld [vmem:[%s11617_s1 + $0x10] sm:$0xff] }
 0x212   :  { %v11052_v37 = vsel %vm6817_vm1, %v7240_v13, %v7236_v54  ;;  %v7819_v41 = vpack.c.bf16 %v7517_v0, %v7516_v46  ;;  %v6134_v60 = vcombine.low %v3790_v17, %v3797_v22  ;;  %v6404_v26 = vcombine.low %v6396_v53, %v6403_v48 }
 0x213   :  { %v11054_v21 = vpop.permute.xlu0 %6576  ;;  %v6712_v56 = vpop.permute.xlu1 %6711  ;;  %v7821_v58 = vpack.c.bf16 %v7501_v8, %v7500_v33  ;;  %v7851_v27 = vpack.c.bf16 %v7549_v1, %v7548_v23  ;;  %v5605_v38 = vcombine.low %v5597_v51, %v5604_v28  ;;  %v6141_v9 = vrot.slane %v6133_v50, %v8441_v18  ;;  %v7535_v51 = vld [vmem:[%s11617_s1 + $0x118] sm:$0xff]  ;;  %v7521_v33 = vld [vmem:[%s11617_s1 + $0xa8] sm:$0xff]  ;;  %v7552_v1 = vld [vmem:[%s11617_s1 + $0x1a0] sm:$0xff] }
 0x214   :  { %6804 = vperm.xlu0 %7890, %v6421_v3   ;;  %v7315_v12 = vrot.slane %v6712_v56, %v10560_v52  ;;  %7820 = vmatprep.subr.bf16.mxu0 %v7819_v41  ;;  %v7532_v3 = vld [vmem:[%s11617_s1 + $0x100] sm:$0xff]  ;;  %v7503_v56 = vld [vmem:[%s11617_s1 + $0x18] sm:$0xff]  ;;  %v7092_v17 = vrot.slane %v11054_v21, %v10583_v5  ;;  %v6148_v22 = vrot.slane %v6134_v60, %v8441_v18  ;;  %v7553_v60 = vld [vmem:[%s11617_s1 + $0x1a8] sm:$0xff] }
 0x215   :  { %6609 = vperm.xlu1 %7891, %v5316_v32   ;;  %7822 = vmatpush3.bf16.msra.mxu0 %v7821_v58  ;;  %v7533_v32 = vld [vmem:[%s11617_s1 + $0x108] sm:$0xff] }
 0x216   :  { %v7320_v29 = vsel %vm6817_vm1, %v7319_v19, %v7315_v12  ;;  %7852 = vmatprep.subr.bf16.mxu1 %v7851_v27  ;;  %v7853_v6 = vpack.c.bf16 %v7533_v32, %v7532_v3  ;;  %v7823_v19 = vpack.c.bf16 %v7519_v35, %v7518_v40  ;;  %v7825_v12 = vpack.c.bf16 %v7503_v56, %v7502_v30  ;;  %v7536_v32 = vld [vmem:[%s11617_s1 + $0x120] sm:$0xff]  ;;  %v7522_v40 = vld [vmem:[%s11617_s1 + $0xb0] sm:$0xff]  ;;  %v7507_v35 = vld [vmem:[%s11617_s1 + $0x38] sm:$0xff] }
 0x217   :  { %v11071_v2 = vpop.permute.xlu0 %6672  ;;  %v11075_v57 = vsel %vm6824_vm2, %v7324_v31, %v7320_v29  ;;  %v7550_v31 = vld [vmem:[%s11617_s1 + $0x190] sm:$0xff]  ;;  %v6149_v41 = vcombine.low %v6141_v9, %v6148_v22  ;;  %v7859_v27 = vpack.c.bf16 %v7553_v60, %v7552_v1  ;;  %v7523_v9 = vld [vmem:[%s11617_s1 + $0xb8] sm:$0xff]  ;;  %v7541_v60 = vld [vmem:[%s11617_s1 + $0x148] sm:$0xff] }
 0x218   :  { %v6760_v34 = vpop.permute.xlu1 %6759  ;;  %7854 = vmatpush3.bf16.msra.mxu1 %v7853_v6  ;;  %7824 = vmatprep.subr.bf16.mxu0 %v7823_v19  ;;  %v7250_v28 = vrot.slane %v11071_v2, %v10583_v5  ;;  %v7506_v6 = vld [vmem:[%s11617_s1 + $0x30] sm:$0xff]  ;;  %v7555_v19 = vld [vmem:[%s11617_s1 + $0x1b8] sm:$0xff] }
 0x219   :  { %6705 = vperm.xlu1 %7891, %v5860_v47   ;;  %v7394_v24 = vrot.slane %v6760_v34, %v10560_v52  ;;  %v7551_v47 = vld [vmem:[%s11617_s1 + $0x198] sm:$0xff]  ;;  %v7534_v34 = vld [vmem:[%s11617_s1 + $0x110] sm:$0xff]  ;;  %7826 = vmatpush3.bf16.msra.mxu0 %v7825_v12 }
 0x21a   :  { %v7855_v29 = vpack.c.bf16 %v7551_v47, %v7550_v31  ;;  %v7857_v0 = vpack.c.bf16 %v7535_v51, %v7534_v34  ;;  %v7554_v22 = vld [vmem:[%s11617_s1 + $0x1b0] sm:$0xff] }
 0x21b   :  { %v11100_v16 = vsel %vm6817_vm1, %v7398_v14, %v7394_v24  ;;  %v11102_v13 = vpop.permute.xlu0 %6768  ;;  %v7504_v14 = vld [vmem:[%s11617_s1 + $0x20] sm:$0xff]  ;;  %v7505_v24 = vld [vmem:[%s11617_s1 + $0x28] sm:$0xff]  ;;  %v7863_v47 = vpack.c.bf16 %v7555_v19, %v7554_v22 }
 0x21c   :  { %v6574_v54 = vpop.permute.xlu1 %6573  ;;  %7856 = vmatprep.subr.bf16.mxu1 %v7855_v29  ;;  %v7829_v23 = vpack.c.bf16 %v7505_v24, %v7504_v14  ;;  %v7539_v29 = vld [vmem:[%s11617_s1 + $0x138] sm:$0xff]  ;;  %v7528_v22 = vld [vmem:[%s11617_s1 + $0xe0] sm:$0xff]  ;;  %v7529_v19 = vld [vmem:[%s11617_s1 + $0xe8] sm:$0xff] }
 0x21d   :  { %6801 = vperm.xlu1 %7891, %v6404_v26   ;;  %v7087_v63 = vrot.slane %v6574_v54, %v10556_v7  ;;  %7858 = vmatpush3.bf16.msra.mxu1 %v7857_v0  ;;  %v7509_v0 = vld [vmem:[%s11617_s1 + $0x48] sm:$0xff] }
 0x21e   :  { %7860 = vmatprep.subr.bf16.mxu1 %v7859_v27  ;;  %v7527_v27 = vld [vmem:[%s11617_s1 + $0xd8] sm:$0xff] }
 0x21f   :  { %v7088_v53 = vsel %vm6824_vm2, %v7087_v63, %v11017_v62  ;;  %v11135_v48 = vpop.permute.xlu0 %6627  ;;  %v7520_v62 = vld [vmem:[%s11617_s1 + $0xa0] sm:$0xff]  ;;  %v7408_v63 = vrot.slane %v11102_v13, %v10583_v5  ;;  %v7833_v13 = vpack.c.bf16 %v7507_v35, %v7506_v6  ;;  %v7559_v6 = vld [vmem:[%s11617_s1 + $0x1d8] sm:$0xff]  ;;  %v7542_v35 = vld [vmem:[%s11617_s1 + $0x150] sm:$0xff] }
 0x220   :  { %v6670_v21 = vpop.permute.xlu1 %6669  ;;  %v11138_v50 = vsel %vm6831_vm3, %v7092_v17, %v7088_v53  ;;  %v7827_v8 = vpack.c.bf16 %v7521_v33, %v7520_v62  ;;  %v7831_v17 = vpack.c.bf16 %v7523_v9, %v7522_v40  ;;  %v7538_v53 = vld [vmem:[%s11617_s1 + $0x130] sm:$0xff]  ;;  %v7176_v34 = vrot.slane %v11135_v48, %v10634_v39  ;;  %v7525_v62 = vld [vmem:[%s11617_s1 + $0xc8] sm:$0xff]  ;;  %v7511_v40 = vld [vmem:[%s11617_s1 + $0x58] sm:$0xff] }
 0x221   :  { %6660 = vperm.xlu1 %7891, %v5605_v38   ;;  %v7245_v46 = vrot.slane %v6670_v21, %v10556_v7  ;;  %v7524_v21 = vld [vmem:[%s11617_s1 + $0xc0] sm:$0xff]  ;;  %v7865_v51 = vpack.c.bf16 %v7539_v29, %v7538_v53  ;;  %v7843_v53 = vpack.c.bf16 %v7529_v19, %v7528_v22  ;;  %v7513_v29 = vld [vmem:[%s11617_s1 + $0x68] sm:$0xff] }
 0x222   :  { %7828 = vmatprep.subr.bf16.mxu0 %v7827_v8  ;;  %v7835_v48 = vpack.c.bf16 %v7525_v62, %v7524_v21  ;;  %v7540_v8 = vld [vmem:[%s11617_s1 + $0x140] sm:$0xff] }
 0x223   :  { %v7246_v26 = vsel %vm6824_vm2, %v7245_v46, %v11052_v37  ;;  %v11169_v58 = vpop.permute.xlu0 %6723  ;;  %7830 = vmatpush3.bf16.msra.mxu0 %v7829_v23  ;;  %v7537_v37 = vld [vmem:[%s11617_s1 + $0x128] sm:$0xff]  ;;  %v7508_v46 = vld [vmem:[%s11617_s1 + $0x40] sm:$0xff] }
 0x224   :  { %v6766_v54 = vpop.permute.xlu1 %6765  ;;  %v11172_v2 = vsel %vm6831_vm3, %v7250_v28, %v7246_v26  ;;  %v7861_v38 = vpack.c.bf16 %v7537_v37, %v7536_v32  ;;  %7832 = vmatprep.subr.bf16.mxu0 %v7831_v17  ;;  %v7837_v24 = vpack.c.bf16 %v7509_v0, %v7508_v46  ;;  %v7556_v28 = vld [vmem:[%s11617_s1 + $0x1c0] sm:$0xff]  ;;  %v7526_v26 = vld [vmem:[%s11617_s1 + $0xd0] sm:$0xff]  ;;  %v7545_v0 = vld [vmem:[%s11617_s1 + $0x168] sm:$0xff] }
 0x225   :  { %6756 = vperm.xlu1 %7891, %v6149_v41   ;;  %v7403_v3 = vrot.slane %v6766_v54, %v10556_v7  ;;  %v7557_v41 = vld [vmem:[%s11617_s1 + $0x1c8] sm:$0xff]  ;;  %v7839_v32 = vpack.c.bf16 %v7527_v27, %v7526_v26  ;;  %v7510_v37 = vld [vmem:[%s11617_s1 + $0x50] sm:$0xff]  ;;  %v7560_v21 = vld [vmem:[%s11617_s1 + $0x1e0] sm:$0xff] }
 0x226   :  { %7862 = vmatpush3.bf16.msra.mxu1 %v7861_v38  ;;  %v7334_v38 = vrot.slane %v11169_v58, %v10634_v39  ;;  %v7841_v9 = vpack.c.bf16 %v7511_v40, %v7510_v37  ;;  %v7544_v46 = vld [vmem:[%s11617_s1 + $0x160] sm:$0xff]  ;;  %v7563_v26 = vld [vmem:[%s11617_s1 + $0x1f8] sm:$0xff]  ;;  %v7546_v37 = vld [vmem:[%s11617_s1 + $0x170] sm:$0xff] }
 0x227   :  { %v7404_v30 = vsel %vm6824_vm2, %v7403_v3, %v11100_v16  ;;  %v11197_v56 = vpop.permute.xlu0 %6582  ;;  %7834 = vmatpush3.bf16.msra.mxu0 %v7833_v13  ;;  %7864 = vmatprep.subr.bf16.mxu1 %v7863_v47  ;;  %v7869_v3 = vpack.c.bf16 %v7541_v60, %v7540_v8  ;;  %v7562_v60 = vld [vmem:[%s11617_s1 + $0x1f0] sm:$0xff]  ;;  %v7547_v40 = vld [vmem:[%s11617_s1 + $0x178] sm:$0xff] }
 0x228   :  { %v6625_v12 = vpop.permute.xlu1 %6624  ;;  %v11206_v31 = vsel %vm6831_vm3, %v7408_v63, %v7404_v30  ;;  %7836 = vmatprep.subr.bf16.mxu0 %v7835_v48  ;;  %v7558_v63 = vld [vmem:[%s11617_s1 + $0x1d0] sm:$0xff]  ;;  %v7543_v30 = vld [vmem:[%s11617_s1 + $0x158] sm:$0xff]  ;;  %v7102_v48 = vrot.slane %v11197_v56, %v10639_v61 }
 0x229   :  { %v7171_v16 = vrot.slane %v6625_v12, %v10583_v5  ;;  %v7871_v58 = vpack.c.bf16 %v7559_v6, %v7558_v63  ;;  %v7512_v12 = vld [vmem:[%s11617_s1 + $0x60] sm:$0xff]  ;;  %v7515_v56 = vld [vmem:[%s11617_s1 + $0x78] sm:$0xff] }
 0x22a   :  { %7866 = vmatpush3.bf16.msra.mxu1 %v7865_v51 }
 0x22b   :  { %v7172_v33 = vsel %vm6831_vm3, %v7171_v16, %v11043_v44  ;;  %v11231_v14 = vpop.permute.xlu0 %6678  ;;  %v7867_v44 = vpack.c.bf16 %v7557_v41, %v7556_v28  ;;  %7838 = vmatpush3.bf16.msra.mxu0 %v7837_v24  ;;  %v7845_v24 = vpack.c.bf16 %v7513_v29, %v7512_v12  ;;  %v7531_v28 = vld [vmem:[%s11617_s1 + $0xf8] sm:$0xff]  ;;  %v7514_v41 = vld [vmem:[%s11617_s1 + $0x70] sm:$0xff] }
 0x22c   :  { %v6721_v23 = vpop.permute.xlu1 %6720  ;;  %v11243_v1 = vsel %vm6838_vm4, %v7176_v34, %v7172_v33  ;;  %7840 = vmatprep.subr.bf16.mxu0 %v7839_v32  ;;  %v7561_v34 = vld [vmem:[%s11617_s1 + $0x1e8] sm:$0xff]  ;;  %v7530_v33 = vld [vmem:[%s11617_s1 + $0xf0] sm:$0xff]  ;;  %v7879_v32 = vpack.c.bf16 %v7563_v26, %v7562_v60  ;;  %v7260_v63 = vrot.slane %v11231_v14, %v10639_v61 }
 0x22d   :  { %v7329_v54 = vrot.slane %v6721_v23, %v10583_v5  ;;  %7868 = vmatprep.subr.bf16.mxu1 %v7867_v44  ;;  %v7875_v62 = vpack.c.bf16 %v7561_v34, %v7560_v21  ;;  %v7847_v44 = vpack.c.bf16 %v7531_v28, %v7530_v33 }
 0x22e   :  { %7870 = vmatpush3.bf16.msra.mxu1 %v7869_v3 }
 0x22f   :  { %v7330_v17 = vsel %vm6831_vm3, %v7329_v54, %v11075_v57  ;;  %v6775_v13 = vpop.permute.xlu0 %6774  ;;  %v7873_v57 = vpack.c.bf16 %v7543_v30, %v7542_v35  ;;  %7872 = vmatprep.subr.bf16.mxu1 %v7871_v58  ;;  %7842 = vmatpush3.bf16.msra.mxu0 %v7841_v9 }
 0x230   :  { %v6580_v47 = vpop.permute.xlu1 %6579  ;;  %v7335_v16 = vsel %vm6838_vm4, %v7334_v38, %v7330_v17  ;;  %7844 = vmatprep.subr.bf16.mxu0 %v7843_v53  ;;  %v7849_v38 = vpack.c.bf16 %v7515_v56, %v7514_v41  ;;  %v7881_v17 = vpack.c.bf16 %v7547_v40, %v7546_v37  ;;  %v7418_v22 = vrot.slane %v6775_v13, %v10639_v61 }
 0x231   :  { %v7097_v51 = vrot.slane %v6580_v47, %v10634_v39 }
 0x232   :  { %7874 = vmatpush3.bf16.msra.mxu1 %v7873_v57 }
 0x233   :  { %v7098_v8 = vsel %vm6838_vm4, %v7097_v51, %v11138_v50  ;;  %v6634_v23 = vpop.permute.xlu0 %6633  ;;  %v7877_v50 = vpack.c.bf16 %v7545_v0, %v7544_v46  ;;  %7876 = vmatprep.subr.bf16.mxu1 %v7875_v62  ;;  %7846 = vmatpush3.bf16.msra.mxu0 %v7845_v24 }
 0x234   :  { %v6676_v27 = vpop.permute.xlu1 %6675  ;;  %v7103_v54 = vsel %vm6845_vm5, %v7102_v48, %v7098_v8  ;;  %7848 = vmatprep.subr.bf16.mxu0 %v7847_v44  ;;  %v7186_v57 = vrot.slane %v6634_v23, %v10660_v4 }
 0x235   :  { %v7255_v3 = vrot.slane %v6676_v27, %v10634_v39 }
 0x236   :  { %7878 = vmatpush3.bf16.msra.mxu1 %v7877_v50 }
 0x237   :  { %v7256_v9 = vsel %vm6838_vm4, %v7255_v3, %v11172_v2  ;;  %v6730_v6 = vpop.permute.xlu0 %6729  ;;  %7880 = vmatprep.subr.bf16.mxu1 %v7879_v32  ;;  %7850 = vmatpush3.bf16.msra.mxu0 %v7849_v38 }
 0x238   :  { %v6772_v35 = vpop.permute.xlu1 %6771  ;;  %v7261_v30 = vsel %vm6845_vm5, %v7260_v63, %v7256_v9 }
 0x239   :  { %v7413_v58 = vrot.slane %v6772_v35, %v10634_v39 }
 0x23a   :  { %7882 = vmatpush3.bf16.msra.mxu1 %v7881_v17 }
 0x23b   :  { %v7414_v14 = vsel %vm6838_vm4, %v7413_v58, %v11206_v31  ;;  %v6589_v19 = vpop.permute.xlu0 %6588  ;;  %v7344_v31 = vrot.slane %v6730_v6, %v10660_v4 }
 0x23c   :  { %v6631_v12 = vpop.permute.xlu1 %6630  ;;  %v7419_v2 = vsel %vm6845_vm5, %v7418_v22, %v7414_v14  ;;  %v7112_v48 = vrot.slane %v6589_v19, %v10665_v36 }
 0x23d   :  { %v7181_v47 = vrot.slane %v6631_v12, %v10639_v61 }
 0x23f   :  { %v7182_v53 = vsel %vm6845_vm5, %v7181_v47, %v11243_v1  ;;  %v6685_v29 = vpop.permute.xlu0 %6684 }
 0x240   :  { %v6727_v21 = vpop.permute.xlu1 %6726  ;;  %v7187_v13 = vsel %vm6852_vm6, %v7186_v57, %v7182_v53  ;;  %v7270_v23 = vrot.slane %v6685_v29, %v10665_v36 }
 0x241   :  { %v7339_v34 = vrot.slane %v6727_v21, %v10639_v61 }
 0x243   :  { %v7340_v51 = vsel %vm6845_vm5, %v7339_v34, %v7335_v16  ;;  %v6781_v62 = vpop.permute.xlu0 %6780 }
 0x244   :  { %v6586_v46 = vpop.permute.xlu1 %6585  ;;  %v7345_v0 = vsel %vm6852_vm6, %v7344_v31, %v7340_v51  ;;  %v7428_v27 = vrot.slane %v6781_v62, %v10665_v36 }
 0x245   :  { %v7107_v33 = vrot.slane %v6586_v46, %v10660_v4 }
 0x247   :  { %v7108_v1 = vsel %vm6852_vm6, %v7107_v33, %v7103_v54  ;;  %v6640_v24 = vpop.permute.xlu0 %6639 }
 0x248   :  { %v6682_v28 = vpop.permute.xlu1 %6681  ;;  %v7113_v41 = vsel %vm6859_vm7, %v7112_v48, %v7108_v1  ;;  %v7196_v40 = vrot.slane %v6640_v24, %v10683_v10 }
 0x249   :  { %v7265_v8 = vrot.slane %v6682_v28, %v10660_v4  ;;  %v12080_v28 = vld [vmem:[#allocation44_spill] sm:$0xff] }
 0x24b   :  { %v7266_v16 = vsel %vm6852_vm6, %v7265_v8, %v7261_v30  ;;  %v6736_v44 = vpop.permute.xlu0 %6735 }
 0x24c   :  { %v6778_v56 = vpop.permute.xlu1 %6777  ;;  %v7271_v60 = vsel %vm6859_vm7, %v7270_v23, %v7266_v16  ;;  %v7354_v30 = vrot.slane %v6736_v44, %v10683_v10  ;;  %v12081_v23 = vld [vmem:[#allocation74_spill] sm:$0xff]  ;;  %v12082_v44 = vld [vmem:[#allocation76_spill] sm:$0xff] }
 0x24d   :  { %v7423_v26 = vrot.slane %v6778_v56, %v10660_v4  ;;  %v6816_v16 = vrot.slane %v12081_v23, %v10553_v25  ;;  %v6823_v56 = vrot.slane %v12082_v44, %v10556_v7  ;;  %v12090_v44 = vld [vmem:[#allocation49_spill] sm:$0xff] }
 0x24f   :  { %v7424_v54 = vsel %vm6852_vm6, %v7423_v26, %v7419_v2  ;;  %v11363_v50 = vpop.permute.xlu0 %6594 }
 0x250   :  { %v6637_v3 = vpop.permute.xlu1 %6636  ;;  %v11366_v32 = vsel %vm6859_vm7, %v7428_v27, %v7424_v54  ;;  %v12083_v27 = vld [vmem:[#allocation24_spill] sm:$0xff] }
 0x251   :  { %v7191_v37 = vrot.slane %v6637_v3, %v10665_v36  ;;  %v6830_v54 = vrot.slane %v12083_v27, %v10583_v5 }
 0x253   :  { %v7192_v63 = vsel %vm6859_vm7, %v7191_v37, %v7187_v13  ;;  %v11371_v38 = vpop.permute.xlu0 %6690  ;;  %v12084_v37 = vld [vmem:[#allocation12_spill] sm:$0xff] }
 0x254   :  { %v6733_v9 = vpop.permute.xlu1 %6732  ;;  %v11374_v6 = vsel %vm6866_vm8, %v7196_v40, %v7192_v63  ;;  %v12085_v40 = vld [vmem:[#allocation79_spill] sm:$0xff] }
 0x255   :  { %v7349_v35 = vrot.slane %v6733_v9, %v10665_v36  ;;  %v6844_v63 = vrot.slane %v12085_v40, %v10639_v61  ;;  %v12086_v9 = vld [vmem:[#allocation50_spill] sm:$0xff] }
 0x256   :  { %v6851_v7 = vrot.slane %v12086_v9, %v10660_v4 }
 0x257   :  { %v7350_v17 = vsel %vm6859_vm7, %v7349_v35, %v7345_v0  ;;  %v11379_v58 = vpop.permute.xlu0 %6786 }
 0x258   :  { %v6592_v22 = vpop.permute.xlu1 %6591  ;;  %v11382_v14 = vsel %vm6866_vm8, %v7354_v30, %v7350_v17  ;;  %v12087_v17 = vld [vmem:[#allocation75_spill] sm:$0xff] }
 0x259   :  { %v7117_v19 = vrot.slane %v6592_v22, %v10683_v10  ;;  %v6858_v5 = vrot.slane %v12087_v17, %v10665_v36  ;;  %v12089_v36 = vld [vmem:[#allocation15_spill] sm:$0xff]  ;;  %v12093_v17 = vld [vmem:[#allocation61_spill] sm:$0xff] }
 0x25b   :  { %v11386_v12 = vsel %vm6866_vm8, %v7117_v19, %v7113_v41  ;;  %v11388_v2 = vpop.permute.xlu0 %6645  ;;  %v6811_v41 = vrot.slane %v12080_v28, %v10560_v52  ;;  %v6837_v52 = vrot.slane %v12084_v37, %v10634_v39  ;;  %v12088_v39 = vld [vmem:[#allocation39_spill] sm:$0xff]  ;;  %v12091_v37 = vld [vmem:[#allocation17_spill] sm:$0xff] }
 0x25c   :  { %v6688_v47 = vpop.permute.xlu1 %6687 }
 0x25d   :  { %v7275_v57 = vrot.slane %v6688_v47, %v10683_v10  ;;  %v6818_v26 = vsel %vm6817_vm1, %v6816_v16, %v6811_v41  ;;  %v6865_v47 = vrot.slane %v12088_v39, %v10683_v10  ;;  %v6879_v16 = vrot.slane %v12089_v36, %v10706_v15 }
 0x25e   :  { %v6825_v25 = vsel %vm6824_vm2, %v6823_v56, %v6818_v26  ;;  %v6872_v56 = vrot.slane %v12090_v44, %v10657_v45 }
 0x25f   :  { %v11392_v53 = vsel %vm6866_vm8, %v7275_v57, %v7271_v60  ;;  %v11394_v29 = vpop.permute.xlu0 %6741  ;;  %v6832_v30 = vsel %vm6831_vm3, %v6830_v54, %v6825_v25 }
 0x260   :  { %v11396_v21 = vpop.permute.xlu1 %6783  ;;  %v6839_v19 = vsel %vm6838_vm4, %v6837_v52, %v6832_v30  ;;  %v6893_v52 = vrot.slane %v12091_v37, %v10729_v11  ;;  %v7206_v37 = vrot.slane %v11388_v2, %v10706_v15 }
 0x261   :  { %v6846_v61 = vsel %vm6845_vm5, %v6844_v63, %v6839_v19  ;;  %v12092_v63 = vld [vmem:[#allocation78_spill] sm:$0xff] }
 0x262   :  { %v6853_v57 = vsel %vm6852_vm6, %v6851_v7, %v6846_v61  ;;  %v6886_v25 = vrot.slane %v12092_v63, %v10703_v59  ;;  %v12094_v19 = vld [vmem:[#allocation14_spill] sm:$0xff] }
 0x263   :  { %v11398_v13 = vpop.permute.xlu0 %6600  ;;  %v6860_v4 = vsel %vm6859_vm7, %v6858_v5, %v6853_v57  ;;  %v6907_v5 = vrot.slane %v12093_v17, %v10753_v42  ;;  %v6900_v39 = vrot.slane %v12094_v19, %v10711_v20 }
 0x264   :  { %v11400_v34 = vpop.permute.xlu1 %6642  ;;  %v6867_v23 = vsel %vm6866_vm8, %v6865_v47, %v6860_v4  ;;  %v7433_v47 = vrot.slane %v11396_v21, %v10683_v10  ;;  %v7122_v21 = vrot.slane %v11363_v50, %v10657_v45 }
 0x265   :  { %v6874_v26 = vsel %vm6873_vm9, %v6872_v56, %v6867_v23  ;;  %v7280_v23 = vrot.slane %v11371_v38, %v10657_v45  ;;  %v7201_v36 = vrot.slane %v11400_v34, %v10657_v45 }
 0x266   :  { %v6881_v54 = vsel %vm6880_vm10, %v6879_v16, %v6874_v26  ;;  %v7434_v34 = vsel %vm6866_vm8, %v7433_v47, %v11366_v32 }
 0x267   :  { %v11402_v31 = vpop.permute.xlu0 %6696  ;;  %v6888_v9 = vsel %vm6887_vm11, %v6886_v25, %v6881_v54  ;;  %v7281_v38 = vsel %vm6873_vm9, %v7280_v23, %v11392_v53  ;;  %v7202_v50 = vsel %vm6873_vm9, %v7201_v36, %v11374_v6  ;;  %v7123_v54 = vsel %vm6873_vm9, %v7122_v21, %v11386_v12 }
 0x268   :  { %v11404_v51 = vpop.permute.xlu1 %6738  ;;  %v6895_v30 = vsel %vm6894_vm12, %v6893_v52, %v6888_v9 }
 0x269   :  { %v6902_v4 = vsel %vm6901_vm13, %v6900_v39, %v6895_v30  ;;  %v7359_v53 = vrot.slane %v11404_v51, %v10657_v45 }
 0x26a   :  { %v11489_v44 = vsel %vm6908_vm14, %v6907_v5, %v6902_v4 }
 0x26b   :  { %v11406_v62 = vpop.permute.xlu0 %6792 }
 0x26c   :  { %v11408_v46 = vpop.permute.xlu1 %6597 }
 0x26d   :  { %v7127_v10 = vrot.slane %v11408_v46, %v10706_v15 }
 0x26f   :  { %v11410_v0 = vpop.permute.xlu0 %6651 }
 0x270   :  { %v6694_v33 = vpop.permute.xlu1 %6693  ;;  %v7216_v23 = vrot.slane %v11410_v0, %v10729_v11 }
 0x271   :  { %v7285_v61 = vrot.slane %v6694_v33, %v10706_v15  ;;  %v7438_v33 = vrot.slane %v11379_v58, %v10657_v45  ;;  %v7290_v58 = vrot.slane %v11402_v31, %v10703_v59  ;;  %v7132_v31 = vrot.slane %v11398_v13, %v10703_v59 }
 0x272   :  { %v7448_v13 = vrot.slane %v11406_v62, %v10703_v59 }
 0x273   :  { %v11412_v48 = vpop.permute.xlu0 %6747  ;;  %v7286_v56 = vsel %vm6880_vm10, %v7285_v61, %v7281_v38  ;;  %v7439_v45 = vsel %vm6873_vm9, %v7438_v33, %v7434_v34 }
 0x274   :  { %v11414_v1 = vpop.permute.xlu1 %6789  ;;  %v7291_v51 = vsel %vm6887_vm11, %v7290_v58, %v7286_v56 }
 0x275   :  { %v7443_v26 = vrot.slane %v11414_v1, %v10706_v15  ;;  %v7364_v1 = vrot.slane %v11394_v29, %v10706_v15  ;;  %v7207_v15 = vsel %vm6880_vm10, %v7206_v37, %v7202_v50  ;;  %v12095_v37 = vld [vmem:[#allocation25_spill] sm:$0xff] }
 0x277   :  { %v11416_v24 = vpop.permute.xlu0 %6606  ;;  %v7444_v2 = vsel %vm6880_vm10, %v7443_v26, %v7439_v45 }
 0x278   :  { %v11420_v8 = vpop.permute.xlu1 %6648  ;;  %v7142_v30 = vrot.slane %v11416_v24, %v10711_v20  ;;  %v7449_v19 = vsel %vm6887_vm11, %v7448_v13, %v7444_v2 }
 0x279   :  { %v7211_v12 = vrot.slane %v11420_v8, %v10703_v59 }
 0x27b   :  { %v11426_v60 = vpop.permute.xlu0 %6702 }
 0x27c   :  { %v11431_v3 = vpop.permute.xlu1 %6744  ;;  %v7300_v25 = vrot.slane %v11426_v60, %v10711_v20 }
 0x27d   :  { %v7369_v39 = vrot.slane %v11431_v3, %v10703_v59 }
 0x27f   :  { %v11440_v35 = vpop.permute.xlu0 %6798 }
 0x280   :  { %v11445_v22 = vpop.permute.xlu1 %6603  ;;  %v7458_v36 = vrot.slane %v11440_v35, %v10711_v20 }
 0x281   :  { %v7137_v6 = vrot.slane %v11445_v22, %v10729_v11  ;;  %v7360_v22 = vsel %vm6873_vm9, %v7359_v53, %v11382_v14  ;;  %v7212_v14 = vsel %vm6887_vm11, %v7211_v12, %v7207_v15 }
 0x282   :  { %v7365_v59 = vsel %vm6880_vm10, %v7364_v1, %v7360_v22  ;;  %v7217_v34 = vsel %vm6894_vm12, %v7216_v23, %v7212_v14  ;;  %v6914_v1 = vrot.slane %v12095_v37, %v10750_v49 }
 0x283   :  { %v11452_v28 = vpop.permute.xlu0 %6657  ;;  %v7370_v26 = vsel %vm6887_vm11, %v7369_v39, %v7365_v59 }
 0x284   :  { %v6700_v41 = vpop.permute.xlu1 %6699 }
 0x285   :  { %v7295_v46 = vrot.slane %v6700_v41, %v10729_v11  ;;  %v7128_v41 = vsel %vm6880_vm10, %v7127_v10, %v7123_v54 }
 0x286   :  { %v7133_v8 = vsel %vm6887_vm11, %v7132_v31, %v7128_v41 }
 0x287   :  { %v11464_v40 = vpop.permute.xlu0 %6753  ;;  %v7296_v29 = vsel %vm6894_vm12, %v7295_v46, %v7291_v51  ;;  %v7138_v17 = vsel %vm6894_vm12, %v7137_v6, %v7133_v8 }
 0x288   :  { %v6796_v27 = vpop.permute.xlu1 %6795  ;;  %v7301_v60 = vsel %vm6901_vm13, %v7300_v25, %v7296_v29  ;;  %v7143_v10 = vsel %vm6901_vm13, %v7142_v30, %v7138_v17 }
 0x289   :  { %v7453_v63 = vrot.slane %v6796_v27, %v10729_v11 }
 0x28b   :  { %v11479_v57 = vpop.permute.xlu0 %6612  ;;  %v7454_v47 = vsel %vm6894_vm12, %v7453_v63, %v7449_v19 }
 0x28c   :  { %v11469_v7 = vpop.permute.xlu1 %6654  ;;  %v7152_v0 = vrot.slane %v11479_v57, %v10750_v49  ;;  %v7459_v56 = vsel %vm6901_vm13, %v7458_v36, %v7454_v47  ;;  %v7226_v57 = vrot.slane %v11452_v28, %v10753_v42 }
 0x28d   :  { %v7221_v24 = vrot.slane %v11469_v7, %v10711_v20 }
 0x28f   :  { %v6709_v52 = vpop.permute.xlu0 %6708  ;;  %v7222_v46 = vsel %vm6901_vm13, %v7221_v24, %v7217_v34 }
 0x290   :  { %v11486_v16 = vpop.permute.xlu1 %6750  ;;  %v7310_v62 = vrot.slane %v6709_v52, %v10750_v49  ;;  %v7227_v6 = vsel %vm6908_vm14, %v7226_v57, %v7222_v46  ;;  %v7384_v52 = vrot.slane %v11464_v40, %v10753_v42 }
 0x291   :  { %v7379_v50 = vrot.slane %v11486_v16, %v10711_v20 }
 0x293   :  { %v6805_v61 = vpop.permute.xlu0 %6804 }
 0x294   :  { %v6610_v32 = vpop.permute.xlu1 %6609  ;;  %v7468_v35 = vrot.slane %v6805_v61, %v10750_v49 }
 0x295   :  { %v7147_v5 = vrot.slane %v6610_v32, %v10753_v42 }
 0x297   :  { %v7148_v3 = vsel %vm6908_vm14, %v7147_v5, %v7143_v10 }
 0x298   :  { %v6706_v9 = vpop.permute.xlu1 %6705  ;;  %v7153_v53 = vsel %vm6915_vm15, %v7152_v0, %v7148_v3 }
 0x299   :  { %v7305_v27 = vrot.slane %v6706_v9, %v10753_v42 }
 0x29b   :  { %v7306_v4 = vsel %vm6908_vm14, %v7305_v27, %v7301_v60 }
 0x29c   :  { %v7311_v21 = vsel %vm6915_vm15, %v7310_v62, %v7306_v4  ;;  %v6802_v33 = vpop.permute.xlu1 %6801 }
 0x29d   :  { %v7463_v7 = vrot.slane %v6802_v33, %v10753_v42  ;;  %v7472_v38 = vsel %vm7470_vm0, %v7311_v21, %v10795_v43  ;;  %v7374_v43 = vrot.slane %v11412_v48, %v10729_v11  ;;  %v6916_v11 = vsel %vm6915_vm15, %v6914_v1, %v11489_v44 }
 0x29f   :  { %v7464_v58 = vsel %vm6908_vm14, %v7463_v7, %v7459_v56  ;;  %v7375_v16 = vsel %vm6894_vm12, %v7374_v43, %v7370_v26 }
 0x2a0   :  { %v7469_v54 = vsel %vm6915_vm15, %v7468_v35, %v7464_v58  ;;  %v6661_v32 = vpop.permute.xlu1 %6660  ;;  %v7380_v48 = vsel %vm6901_vm13, %v7379_v50, %v7375_v16 }
 0x2a1   :  { %v7231_v41 = vrot.slane %v6661_v32, %v10750_v49  ;;  %v7474_v20 = vsel %vm7470_vm0, %v7469_v54, %v7153_v53  ;;  %v7385_v2 = vsel %vm6908_vm14, %v7384_v52, %v7380_v48 }
 0x2a3   :  { %v7232_v28 = vsel %vm6915_vm15, %v7231_v41, %v7227_v6 }
 0x2a4   :  { %v7471_v31 = vsel %vm7470_vm0, %v7232_v28, %v6916_v11  ;;  %v6757_v45 = vpop.permute.xlu1 %6756 }
 0x2a5   :  { %v7475_v12 = vcombine.low %v7471_v31, %v7472_v38  ;;  %v7389_v51 = vrot.slane %v6757_v45, %v10750_v49 }
 0x2a7   :  { %v7390_v15 = vsel %vm6915_vm15, %v7389_v51, %v7385_v2  ;;  %v7483_v63 = vrot.slane %v7475_v12, %v8441_v18 }
 0x2a8   :  { %v7473_v44 = vsel %vm7470_vm0, %v7390_v15, %v11000_v55  ;;  %v7748_v55 = vld [vmem:[%s11618_s2] ss:$0 sm:$0xff] }
 0x2a9   :  { %v7476_v29 = vcombine.low %v7473_v44, %v7474_v20 }
 0x2ab   :  { %v7490_v22 = vrot.slane %v7476_v29, %v8441_v18 }
 0x2ad   :  { %v7491_v13 = vcombine.low %v7483_v63, %v7490_v22 }
 0x2af   :  { %v7499_v42 = vmul.f32 0.03125, %v7491_v13 }
 0x2b1   :  { %v7579_v40 = vrot.slane %v7499_v42, %v8441_v18  ;;  %v7572_v25 = vcombine.high %v7499_v42, %v7499_v42 }
 0x2b3   :  { %v7587_v8 = vcombine.high %v7579_v40, %v7579_v40  ;;  %v7586_v49 = vrot.slane %v7572_v25, %v8441_v18 }
 0x2b5   :  { %7657 = vmatprep.mubr.f32.mxu0 %v7587_v8  ;;  %v7588_v9 = vcombine.high %v7586_v49, %v7586_v49 }
 0x2b6   :  { %7658 = vmatmul.mubr.f32.vlgmr.msra.gmra.mrb[0].mxu0 %v7579_v40 }
 0x2b7   :  { %7727 = vmatprep.mubr.f32.mxu1 %v7588_v9 }
 0x2b8   :  { %7728 = vmatmul.mubr.f32.vlgmr.msra.gmra.mrb[0].mxu1 %v7586_v49 }
 0x389   :  { %v7781_v30 = vpop.f32.mrb[0].mxu0 }
 0x38a   :  { %v7782_v17 = vpop.f32.mrb[1].mxu0 }
 0x38b   :  { %v7783_v5 = vadd.f32 %v7782_v17, %v7781_v30  ;;  %v7816_v27 = vpop.f32.mrb[0].mxu1 }
 0x38c   :  { %v7817_v14 = vpop.f32.mrb[1].mxu1 }
 0x38d   :  { %v7660_v19 = vadd.f32 %v7783_v5, %v7748_v55  ;;  %v7818_v62 = vadd.f32 %v7817_v14, %v7816_v27 }
 0x38f   :  { %v7730_v60 = vadd.f32 %v7818_v62, %v7660_v19 }
 0x391   :  { %7733 = vst [vmem:[#allocation3] sm:$0x3] %v7730_v60 }
 0x392   :  { %7903 = shalt.err (!%p7900_p4)
}
 0x393   :  { %s7904_s18 = scalar_lea.hbm %s11619_s3, 32 }
 0x394   :  { %p7905_p5 = scmp.ne.s32.totalorder %s11619_s3, %s7904_s18  ;;  %p7908_p6 = scmp.lt.u32.totalorder %s7904_s18, %s11619_s3 }
 0x396   :  { %p7910_p7 = pnand %p7908_p6, %p7905_p5 }
 0x398   :  { %7913 = shalt.err (!%p7910_p7)
}
 0x399   :  { %7743 = dma.vmem_to_hbm [thread:$0]  %s7741_s15, 32, %s11619_s3, [#allocation4]  }
 0x39a   :  { %7914 = dma.done.wait [#allocation4], 32  }
 0x39b   :  { %7915 = vsyncadd [#allocation4], 4294967264 }
 0x39c   :  { %7747 = vsyncpa [#allocation4], 1 }

</bundles_post_ra>
